<compile_context>
chip_gen: v6e
topology: v6e:2x2x1
jax: 0.10.0
libtpu: 0.0.40
codegen_flags: <defaults>
</compile_context>

<pallas_src>
import jax
import jax.numpy as jnp
from jax.experimental import pallas as pl
from jax.experimental.pallas import tpu as pltpu

LANE = 128
ALIGN = 256                      # row alignment of padded operands


def _round_up(x, m):
    return ((x + m - 1) // m) * m


def _vmem_budget_bytes():
    """Generation-aware VMEM budget (~3/4 of physical VMEM)."""
    phys = 64 * 1024 * 1024      # v7x worst case
    try:
        cap = int(getattr(pltpu.get_tpu_info(), "vmem_capacity_bytes", 0))
        if cap > 0:
            phys = cap
    except Exception:
        pass
    return (phys * 3) // 4


def _pick_tile(total_padded, candidates, fits_fn):
    """Largest candidate dividing total_padded that fits the VMEM budget,
    preferring one that leaves >=2 grid steps (v7x dual-TC sharding)."""
    best = None
    for c in candidates:
        if total_padded % c != 0 or not fits_fn(c):
            continue
        if best is None:
            best = c
        if total_padded // c >= 2:
            return c
    return best


def _phase1_resident_bytes(tile_g, node_p, dp):
    buf = 2                                             # double buffering
    b = 0
    b += buf * 2 * tile_g * node_p * 2                  # uh, ih tiles (bf16)
    b += buf * 2 * node_p * dp * 2                      # ue, ie (bf16, resident)
    b += buf * tile_g * dp * 2                          # group_emb tile (bf16)
    b += buf * 3 * dp * dp * 2                          # W^T (bf16)
    b += buf * dp * 4                                   # bias (fp32)
    b += buf * 2 * tile_g * dp * 4                      # he residual in + out (fp32)
    b += buf * tile_g * dp * 2                          # msg bf16 out
    b += tile_g * 3 * dp * 8                            # in-kernel temporaries slack
    return b


def _phase2_resident_bytes(tile_rows, g_p, dp):
    buf = 2
    b = 0
    b += buf * tile_rows * g_p * 2                      # full_hyper tile (bf16)
    b += buf * g_p * dp * 2                             # msg (bf16, resident)
    b += buf * 2 * tile_rows * dp * 4                   # emb residual in + out (fp32)
    b += buf * tile_rows * dp * 2                       # norm bf16 out
    b += tile_rows * dp * 8                             # slack
    return b


# ---------------------------------------------------------------------------
# Phase 1: hyperedge messages  msg = Linear([u_msg | i_msg | i_msg*g_emb])
# ---------------------------------------------------------------------------
def _msg_kernel_resident(uh_ref, ih_ref, ue_ref, ie_ref, ge_ref, wt_ref, b_ref,
                         he_resid_ref, he_out_ref, msg_b16_ref):
    um = jnp.dot(uh_ref[...], ue_ref[...], preferred_element_type=jnp.float32)
    im = jnp.dot(ih_ref[...], ie_ref[...], preferred_element_type=jnp.float32)
    ige = im * ge_ref[...].astype(jnp.float32)
    cat = jnp.concatenate([um, im, ige], axis=1).astype(wt_ref.dtype)
    msg = jnp.dot(cat, wt_ref[...], preferred_element_type=jnp.float32) + b_ref[...]
    he_out_ref[...] = he_resid_ref[...] + msg        # fused residual sum
    msg_b16_ref[...] = msg.astype(jnp.bfloat16)


def _msg_kernel_tiled(uh_ref, ih_ref, ue_ref, ie_ref, ge_ref, wt_ref, b_ref,
                      he_resid_ref, he_out_ref, msg_b16_ref, acc_ref):
    Dp = ge_ref.shape[1]
    k = pl.program_id(1)

    @pl.when(k == 0)
    def _():
        acc_ref[...] = jnp.zeros_like(acc_ref)

    acc_ref[:, 0:Dp] += jnp.dot(uh_ref[...], ue_ref[...],
                                preferred_element_type=jnp.float32)
    acc_ref[:, Dp:2 * Dp] += jnp.dot(ih_ref[...], ie_ref[...],
                                     preferred_element_type=jnp.float32)

    @pl.when(k == pl.num_programs(1) - 1)
    def _():
        acc_ref[:, 2 * Dp:3 * Dp] = (acc_ref[:, Dp:2 * Dp]
                                     * ge_ref[...].astype(jnp.float32))
        cat = acc_ref[...].astype(wt_ref.dtype)
        msg = jnp.dot(cat, wt_ref[...],
                      preferred_element_type=jnp.float32) + b_ref[...]
        he_out_ref[...] = he_resid_ref[...] + msg
        msg_b16_ref[...] = msg.astype(jnp.bfloat16)


def hgnn_msg_phase(uh, ih, node_emb, ge, wt_p, b_p, he_resid, *, vmem_budget):
    G_p, NodeP = uh.shape
    Dp = ge.shape[1]

    flops = 2 * G_p * NodeP * Dp * 2 + 2 * G_p * (3 * Dp) * Dp
    bytes_accessed = (2 * (uh.size + ih.size + ge.size) + 2 * node_emb.size
                      + 2 * wt_p.size + 4 * b_p.size + 8 * he_resid.size
                      + 2 * G_p * Dp)
    cost = pl.CostEstimate(flops=int(flops), transcendentals=0,
                           bytes_accessed=int(bytes_accessed))
    out_shape = (jax.ShapeDtypeStruct((G_p, Dp), jnp.float32),    # he residual (aliased)
                 jax.ShapeDtypeStruct((G_p, Dp), jnp.bfloat16))   # msg for phase 2

    tile_g = _pick_tile(
        G_p, (1024, 512, 256),
        lambda t: _phase1_resident_bytes(t, NodeP, Dp) <= vmem_budget)

    if tile_g is not None:
        # Resident fast path: embedding tables live in VMEM, full-K dots.
        return pl.pallas_call(
            _msg_kernel_resident,
            out_shape=out_shape,
            grid_spec=pltpu.PrefetchScalarGridSpec(
                num_scalar_prefetch=0,
                grid=(G_p // tile_g,),
                in_specs=[
                    pl.BlockSpec((tile_g, NodeP), lambda g: (g, 0)),   # user_hyper
                    pl.BlockSpec((tile_g, NodeP), lambda g: (g, 0)),   # item_hyper
                    pl.BlockSpec((NodeP, Dp), lambda g: (0, 0)),       # user emb (resident)
                    pl.BlockSpec((NodeP, Dp), lambda g: (1, 0)),       # item emb (resident)
                    pl.BlockSpec((tile_g, Dp), lambda g: (g, 0)),      # group_emb
                    pl.BlockSpec((3 * Dp, Dp), lambda g: (0, 0)),      # W^T (resident)
                    pl.BlockSpec((1, Dp), lambda g: (0, 0)),           # bias (resident)
                    pl.BlockSpec((tile_g, Dp), lambda g: (g, 0)),      # he residual in
                ],
                out_specs=(pl.BlockSpec((tile_g, Dp), lambda g: (g, 0)),
                           pl.BlockSpec((tile_g, Dp), lambda g: (g, 0))),
            ),
            compiler_params=pltpu.CompilerParams(
                dimension_semantics=("parallel",),
                vmem_limit_bytes=vmem_budget),
            cost_estimate=cost,
            input_output_aliases={7: 0},
        )(uh, ih, node_emb, node_emb, ge, wt_p, b_p, he_resid)

    # Fallback: tile the node-contraction axis (tables too large for VMEM).
    tile_g = 512 if G_p % 512 == 0 else 256
    tile_node = 512 if NodeP % 512 == 0 else 256
    item_block_off = NodeP // tile_node
    grid = (G_p // tile_g, NodeP // tile_node)
    return pl.pallas_call(
        _msg_kernel_tiled,
        out_shape=out_shape,
        grid_spec=pltpu.PrefetchScalarGridSpec(
            num_scalar_prefetch=0,
            grid=grid,
            in_specs=[
                pl.BlockSpec((tile_g, tile_node), lambda g, k: (g, k)),
                pl.BlockSpec((tile_g, tile_node), lambda g, k: (g, k)),
                pl.BlockSpec((tile_node, Dp), lambda g, k: (k, 0)),
                pl.BlockSpec((tile_node, Dp), lambda g, k: (item_block_off + k, 0)),
                pl.BlockSpec((tile_g, Dp), lambda g, k: (g, 0)),
                pl.BlockSpec((3 * Dp, Dp), lambda g, k: (0, 0)),
                pl.BlockSpec((1, Dp), lambda g, k: (0, 0)),
                pl.BlockSpec((tile_g, Dp), lambda g, k: (g, 0)),
            ],
            out_specs=(pl.BlockSpec((tile_g, Dp), lambda g, k: (g, 0)),
                       pl.BlockSpec((tile_g, Dp), lambda g, k: (g, 0))),
            scratch_shapes=[pltpu.VMEM((tile_g, 3 * Dp), jnp.float32)],
        ),
        compiler_params=pltpu.CompilerParams(
            dimension_semantics=("parallel", "arbitrary"),
            vmem_limit_bytes=vmem_budget),
        cost_estimate=cost,
        input_output_aliases={7: 0},
    )(uh, ih, node_emb, node_emb, ge, wt_p, b_p, he_resid)


# ---------------------------------------------------------------------------
# Phase 2: hyperedge -> node   norm = full_hyper @ msg
# ---------------------------------------------------------------------------
def _norm_kernel_resident(fh_ref, msg_ref, resid_ref, emb_out_ref, norm_b16_ref):
    norm = jnp.dot(fh_ref[...], msg_ref[...], preferred_element_type=jnp.float32)
    emb_out_ref[...] = resid_ref[...] + norm         # fused residual sum
    norm_b16_ref[...] = norm.astype(jnp.bfloat16)


def _norm_kernel_tiled(fh_ref, msg_ref, resid_ref, emb_out_ref, norm_b16_ref,
                       acc_ref):
    k = pl.program_id(1)

    @pl.when(k == 0)
    def _():
        acc_ref[...] = jnp.zeros_like(acc_ref)

    acc_ref[...] += jnp.dot(fh_ref[...], msg_ref[...],
                            preferred_element_type=jnp.float32)

    @pl.when(k == pl.num_programs(1) - 1)
    def _():
        emb_out_ref[...] = resid_ref[...] + acc_ref[...]
        norm_b16_ref[...] = acc_ref[...].astype(jnp.bfloat16)


def hgnn_norm_phase(fh, msg_b16, emb_resid, *, vmem_budget):
    NRows, G_p = fh.shape
    Dp = msg_b16.shape[1]

    flops = 2 * NRows * G_p * Dp
    bytes_accessed = (2 * fh.size + 2 * msg_b16.size + 8 * emb_resid.size
                      + 2 * NRows * Dp)
    cost = pl.CostEstimate(flops=int(flops), transcendentals=0,
                           bytes_accessed=int(bytes_accessed))
    out_shape = (jax.ShapeDtypeStruct((NRows, Dp), jnp.float32),   # emb residual (aliased)
                 jax.ShapeDtypeStruct((NRows, Dp), jnp.bfloat16))  # next-layer node emb

    tile_rows = _pick_tile(
        NRows, (1024, 512, 256),
        lambda t: _phase2_resident_bytes(t, G_p, Dp) <= vmem_budget)

    if tile_rows is not None:
        # Resident fast path: msg lives in VMEM, one full-K dot per row tile.
        return pl.pallas_call(
            _norm_kernel_resident,
            out_shape=out_shape,
            grid_spec=pltpu.PrefetchScalarGridSpec(
                num_scalar_prefetch=0,
                grid=(NRows // tile_rows,),
                in_specs=[pl.BlockSpec((tile_rows, G_p), lambda i: (i, 0)),
                          pl.BlockSpec((G_p, Dp), lambda i: (0, 0)),        # msg resident
                          pl.BlockSpec((tile_rows, Dp), lambda i: (i, 0))],  # residual in
                out_specs=(pl.BlockSpec((tile_rows, Dp), lambda i: (i, 0)),
                           pl.BlockSpec((tile_rows, Dp), lambda i: (i, 0))),
            ),
            compiler_params=pltpu.CompilerParams(
                dimension_semantics=("parallel",),
                vmem_limit_bytes=vmem_budget),
            cost_estimate=cost,
            input_output_aliases={2: 0},
        )(fh, msg_b16, emb_resid)

    # Fallback: tile the hyperedge contraction axis.
    tile_rows = 512 if NRows % 512 == 0 else 256
    tile_k = 512 if G_p % 512 == 0 else 256
    grid = (NRows // tile_rows, G_p // tile_k)
    return pl.pallas_call(
        _norm_kernel_tiled,
        out_shape=out_shape,
        grid_spec=pltpu.PrefetchScalarGridSpec(
            num_scalar_prefetch=0,
            grid=grid,
            in_specs=[pl.BlockSpec((tile_rows, tile_k), lambda i, k: (i, k)),
                      pl.BlockSpec((tile_k, Dp), lambda i, k: (k, 0)),
                      pl.BlockSpec((tile_rows, Dp), lambda i, k: (i, 0))],
            out_specs=(pl.BlockSpec((tile_rows, Dp), lambda i, k: (i, 0)),
                       pl.BlockSpec((tile_rows, Dp), lambda i, k: (i, 0))),
            scratch_shapes=[pltpu.VMEM((tile_rows, Dp), jnp.float32)],
        ),
        compiler_params=pltpu.CompilerParams(
            dimension_semantics=("parallel", "arbitrary"),
            vmem_limit_bytes=vmem_budget),
        cost_estimate=cost,
        input_output_aliases={2: 0},
    )(fh, msg_b16, emb_resid)


# ---------------------------------------------------------------------------
# Parameter padding helper
# ---------------------------------------------------------------------------
def _pad_linear(w_t, b, D, Dp):
    """Pad Linear(3D->D) params (weight.T (3D,D), bias (D,)) to (3*Dp, Dp)/(1, Dp),
    block-aligned with the [user_msg | item_msg | ige] lane layout."""
    wt_p = jnp.zeros((3 * Dp, Dp), jnp.float32)
    wt_p = wt_p.at[0:D, 0:D].set(w_t[0:D])
    wt_p = wt_p.at[Dp:Dp + D, 0:D].set(w_t[D:2 * D])
    wt_p = wt_p.at[2 * Dp:2 * Dp + D, 0:D].set(w_t[2 * D:3 * D])
    b_p = jnp.zeros((1, Dp), jnp.float32).at[0, 0:D].set(b)
    return wt_p.astype(jnp.bfloat16), b_p


# ---------------------------------------------------------------------------
# Multi-layer HyperGraphConvolution (residual sums fused into the kernels)
# ---------------------------------------------------------------------------
def hypergraph_convolution(user_emb, item_emb, group_emb,
                           user_hyper, item_hyper, full_hyper,
                           layer_params, num_users, num_items):
    U, D = user_emb.shape
    I = item_emb.shape[0]
    G = group_emb.shape[0]

    Dp = _round_up(D, LANE)
    NodeP = _round_up(max(U, I), ALIGN)
    G_p = _round_up(G, 2 * ALIGN)
    budget = _vmem_budget_bytes()

    # One-time padded bf16 copies of the (layer-invariant) incidence matrices.
    uh_p = jnp.zeros((G_p, NodeP), jnp.bfloat16).at[:G, :U].set(
        user_hyper.astype(jnp.bfloat16))
    ih_p = jnp.zeros((G_p, NodeP), jnp.bfloat16).at[:G, :I].set(
        item_hyper.astype(jnp.bfloat16))
    # full_hyper in node-padded layout: user rows [0, NodeP), item rows
    # [NodeP, 2*NodeP) -> phase-2 output directly feeds the next layer.
    fh_p = jnp.zeros((2 * NodeP, G_p), jnp.bfloat16)
    fh_p = fh_p.at[:U, :G].set(full_hyper[:U].astype(jnp.bfloat16))
    fh_p = fh_p.at[NodeP:NodeP + I, :G].set(full_hyper[U:].astype(jnp.bfloat16))

    ge_p = jnp.zeros((G_p, Dp), jnp.bfloat16).at[:G, :D].set(
        group_emb.astype(jnp.bfloat16))

    # Node embeddings (bf16, node-padded layout).
    node_emb = jnp.zeros((2 * NodeP, Dp), jnp.bfloat16)
    node_emb = node_emb.at[:U, :D].set(user_emb.astype(jnp.bfloat16))
    node_emb = node_emb.at[NodeP:NodeP + I, :D].set(item_emb.astype(jnp.bfloat16))

    # fp32 residual accumulators, updated in-kernel via input_output_aliases.
    emb_resid = jnp.zeros((2 * NodeP, Dp), jnp.float32)
    emb_resid = emb_resid.at[:U, :D].set(user_emb)
    emb_resid = emb_resid.at[NodeP:NodeP + I, :D].set(item_emb)
    he_resid = jnp.zeros((G_p, Dp), jnp.float32).at[:G, :D].set(group_emb)

    for (w_t, b) in layer_params:
        wt_p, b_p = _pad_linear(w_t, b, D, Dp)
        he_resid, msg_b16 = hgnn_msg_phase(uh_p, ih_p, node_emb, ge_p,
                                           wt_p, b_p, he_resid,
                                           vmem_budget=budget)
        emb_resid, node_emb = hgnn_norm_phase(fh_p, msg_b16, emb_resid,
                                              vmem_budget=budget)

    final_emb = jnp.concatenate([emb_resid[:U, :D],
                                 emb_resid[NodeP:NodeP + I, :D]], axis=0)
    final_he = he_resid[:G, :D]
    return final_emb, final_he


# ---------------------------------------------------------------------------
# Pure-JAX fp32 reference (mirrors the PyTorch module exactly)
# ---------------------------------------------------------------------------
def _reference(user_emb, item_emb, group_emb,
               user_hyper, item_hyper, full_hyper,
               layer_params, num_users, num_items):
    final = jnp.concatenate([user_emb, item_emb], axis=0)
    final_he = group_emb
    ue, ie = user_emb, item_emb
    for (w_t, b) in layer_params:
        um = user_hyper @ ue
        im = item_hyper @ ie
        ige = im * group_emb
        msg = jnp.concatenate([um, im, ige], axis=1) @ w_t + b
        norm = full_hyper @ msg
        ue, ie = norm[:num_users], norm[num_users:]
        final = final + norm
        final_he = final_he + msg
    return final, final_he


if __name__ == "__main__":
    num_users, num_items, num_groups, D, n_layers = 300, 200, 300, 32, 2

    key = jax.random.PRNGKey(0)
    keys = jax.random.split(key, 8)

    user_emb = jax.random.normal(keys[0], (num_users, D), jnp.float32)
    item_emb = jax.random.normal(keys[1], (num_items, D), jnp.float32)
    group_emb = jax.random.normal(keys[2], (num_groups, D), jnp.float32)

    # Hypergraph incidence matrices (torch.sparse in the original; dense here).
    user_hyper = jax.random.uniform(keys[3], (num_groups, num_users), jnp.float32)
    item_hyper = jax.random.uniform(keys[4], (num_groups, num_items), jnp.float32)
    full_hyper = jax.random.uniform(keys[5], (num_users + num_items, num_groups),
                                    jnp.float32)

    # Linear(3D, D) params per layer, stored as weight.T so kernels do x @ W^T.
    layer_params = []
    bound = 1.0 / jnp.sqrt(3.0 * D)
    wkeys = jax.random.split(keys[6], n_layers)
    bkeys = jax.random.split(keys[7], n_layers)
    for li in range(n_layers):
        w_t = jax.random.uniform(wkeys[li], (3 * D, D), jnp.float32,
                                 minval=-bound, maxval=bound)
        b = jax.random.uniform(bkeys[li], (D,), jnp.float32,
                               minval=-bound, maxval=bound)
        layer_params.append((w_t, b))

    run = jax.jit(hypergraph_convolution, static_argnums=(7, 8))
    final_emb, final_he = run(user_emb, item_emb, group_emb,
                              user_hyper, item_hyper, full_hyper,
                              layer_params, num_users, num_items)
    jax.block_until_ready((final_emb, final_he))

    assert final_emb.shape == (num_users + num_items, D)
    assert final_he.shape == (num_groups, D)

    # Validate against the fp32 reference (loose tolerance: bf16 storage).
    ref_emb, ref_he = _reference(user_emb, item_emb, group_emb,
                                 user_hyper, item_hyper, full_hyper,
                                 layer_params, num_users, num_items)

    def rel_err(a, b):
        return float(jnp.linalg.norm(a - b) / (jnp.linalg.norm(b) + 1e-6))

    assert rel_err(final_emb, ref_emb) < 0.08, rel_err(final_emb, ref_emb)
    assert rel_err(final_he, ref_he) < 0.08, rel_err(final_he, ref_he)

    print("KERNEL_OK")
</pallas_src>

<mosaic_0001>
module attributes {stable_mosaic.version = 11 : i64} {
  func.func @_msg_kernel_resident(%arg0: i32, %arg1: memref<256x512xbf16, #tpu.memory_space<vmem>>, %arg2: memref<256x512xbf16, #tpu.memory_space<vmem>>, %arg3: memref<512x128xbf16, #tpu.memory_space<vmem>>, %arg4: memref<512x128xbf16, #tpu.memory_space<vmem>>, %arg5: memref<256x128xbf16, #tpu.memory_space<vmem>>, %arg6: memref<384x128xbf16, #tpu.memory_space<vmem>>, %arg7: memref<1x128xf32, #tpu.memory_space<vmem>>, %arg8: memref<256x128xf32, #tpu.memory_space<vmem>>, %arg9: memref<256x128xf32, #tpu.memory_space<vmem>>, %arg10: memref<256x128xbf16, #tpu.memory_space<vmem>>) attributes {dimension_semantics = [#tpu.dimension_semantics<parallel>], iteration_bounds = array<i64: 2>, scalar_prefetch = 0 : i64, scratch_operands = 0 : i64, tpu.core_type = #tpu.core_type<tc>, window_params = [{transform_indices = @transform_0, window_bounds = array<i64: 256, 512>}, {transform_indices = @transform_1, window_bounds = array<i64: 256, 512>}, {transform_indices = @transform_2, window_bounds = array<i64: 512, 128>}, {transform_indices = @transform_3, window_bounds = array<i64: 512, 128>}, {transform_indices = @transform_4, window_bounds = array<i64: 256, 128>}, {pipeline_mode = #tpu.pipeline_mode<synchronous>, transform_indices = @transform_5, window_bounds = array<i64: 384, 128>}, {pipeline_mode = #tpu.pipeline_mode<synchronous>, transform_indices = @transform_6, window_bounds = array<i64: 1, 128>}, {transform_indices = @transform_7, window_bounds = array<i64: 256, 128>}, {transform_indices = @transform_8, window_bounds = array<i64: 256, 128>}, {transform_indices = @transform_9, window_bounds = array<i64: 256, 128>}]} {
    %c0 = arith.constant 0 : index
    %c0_0 = arith.constant 0 : index
    %0 = vector.load %arg1[%c0, %c0_0] : memref<256x512xbf16, #tpu.memory_space<vmem>>, vector<256x512xbf16>
    %c0_1 = arith.constant 0 : index
    %c0_2 = arith.constant 0 : index
    %1 = vector.load %arg3[%c0_1, %c0_2] : memref<512x128xbf16, #tpu.memory_space<vmem>>, vector<512x128xbf16>
    %cst = arith.constant dense<0.000000e+00> : vector<256x128xf32>
    %2 = tpu.matmul %0, %1, %cst {dimension_numbers = #tpu.dot_dimension_numbers<[1], [0], [0], [1], [0, 0, 1, 1], [], []>} : vector<256x512xbf16>, vector<512x128xbf16>, vector<256x128xf32> -> vector<256x128xf32>
    %c0_3 = arith.constant 0 : index
    %c0_4 = arith.constant 0 : index
    %3 = vector.load %arg2[%c0_3, %c0_4] : memref<256x512xbf16, #tpu.memory_space<vmem>>, vector<256x512xbf16>
    %c0_5 = arith.constant 0 : index
    %c0_6 = arith.constant 0 : index
    %4 = vector.load %arg4[%c0_5, %c0_6] : memref<512x128xbf16, #tpu.memory_space<vmem>>, vector<512x128xbf16>
    %cst_7 = arith.constant dense<0.000000e+00> : vector<256x128xf32>
    %5 = tpu.matmul %3, %4, %cst_7 {dimension_numbers = #tpu.dot_dimension_numbers<[1], [0], [0], [1], [0, 0, 1, 1], [], []>} : vector<256x512xbf16>, vector<512x128xbf16>, vector<256x128xf32> -> vector<256x128xf32>
    %c0_8 = arith.constant 0 : index
    %c0_9 = arith.constant 0 : index
    %6 = vector.load %arg5[%c0_8, %c0_9] : memref<256x128xbf16, #tpu.memory_space<vmem>>, vector<256x128xbf16>
    %7 = arith.extf %6 : vector<256x128xbf16> to vector<256x128xf32>
    %8 = arith.mulf %5, %7 : vector<256x128xf32>
    %9 = tpu.concatenate %2, %5, %8 in 1 : vector<256x128xf32>, vector<256x128xf32>, vector<256x128xf32> -> vector<256x384xf32>
    %10 = arith.truncf %9 : vector<256x384xf32> to vector<256x384xbf16>
    %c0_10 = arith.constant 0 : index
    %c0_11 = arith.constant 0 : index
    %11 = vector.load %arg6[%c0_10, %c0_11] : memref<384x128xbf16, #tpu.memory_space<vmem>>, vector<384x128xbf16>
    %cst_12 = arith.constant dense<0.000000e+00> : vector<256x128xf32>
    %12 = tpu.matmul %10, %11, %cst_12 {dimension_numbers = #tpu.dot_dimension_numbers<[1], [0], [0], [1], [0, 0, 1, 1], [], []>} : vector<256x384xbf16>, vector<384x128xbf16>, vector<256x128xf32> -> vector<256x128xf32>
    %c0_13 = arith.constant 0 : index
    %c0_14 = arith.constant 0 : index
    %13 = vector.load %arg7[%c0_13, %c0_14] : memref<1x128xf32, #tpu.memory_space<vmem>>, vector<1x128xf32>
    %14 = vector.broadcast %13 : vector<1x128xf32> to vector<256x128xf32>
    %15 = arith.addf %12, %14 : vector<256x128xf32>
    %c0_15 = arith.constant 0 : index
    %c0_16 = arith.constant 0 : index
    %16 = vector.load %arg8[%c0_15, %c0_16] : memref<256x128xf32, #tpu.memory_space<vmem>>, vector<256x128xf32>
    %17 = arith.addf %16, %15 : vector<256x128xf32>
    %c0_17 = arith.constant 0 : index
    %c0_18 = arith.constant 0 : index
    %18 = vector.load %arg9[%c0_17, %c0_18] : memref<256x128xf32, #tpu.memory_space<vmem>>, vector<256x128xf32>
    tpu.vector_store %arg9[%c0_17, %c0_18], %17 {strides = array<i32>} : memref<256x128xf32, #tpu.memory_space<vmem>>, vector<256x128xf32>,
    %19 = arith.truncf %15 : vector<256x128xf32> to vector<256x128xbf16>
    %c0_19 = arith.constant 0 : index
    %c0_20 = arith.constant 0 : index
    %20 = vector.load %arg10[%c0_19, %c0_20] : memref<256x128xbf16, #tpu.memory_space<vmem>>, vector<256x128xbf16>
    tpu.vector_store %arg10[%c0_19, %c0_20], %19 {strides = array<i32>} : memref<256x128xbf16, #tpu.memory_space<vmem>>, vector<256x128xbf16>,
    return
  }
  func.func @transform_0(%arg0: i32) -> (i32, i32) {
    %c0_i32 = arith.constant 0 : i32
    %c0_i32_0 = arith.constant 0 : i32
    return %arg0, %c0_i32 : i32, i32
  }
  func.func @transform_1(%arg0: i32) -> (i32, i32) {
    %c0_i32 = arith.constant 0 : i32
    %c0_i32_0 = arith.constant 0 : i32
    return %arg0, %c0_i32 : i32, i32
  }
  func.func @transform_2(%arg0: i32) -> (i32, i32) {
    %c0_i32 = arith.constant 0 : i32
    %c0_i32_0 = arith.constant 0 : i32
    %c0_i32_1 = arith.constant 0 : i32
    return %c0_i32, %c0_i32_0 : i32, i32
  }
  func.func @transform_3(%arg0: i32) -> (i32, i32) {
    %c1_i32 = arith.constant 1 : i32
    %c0_i32 = arith.constant 0 : i32
    %c0_i32_0 = arith.constant 0 : i32
    return %c1_i32, %c0_i32 : i32, i32
  }
  func.func @transform_4(%arg0: i32) -> (i32, i32) {
    %c0_i32 = arith.constant 0 : i32
    %c0_i32_0 = arith.constant 0 : i32
    return %arg0, %c0_i32 : i32, i32
  }
  func.func @transform_5(%arg0: i32) -> (i32, i32) {
    %c0_i32 = arith.constant 0 : i32
    %c0_i32_0 = arith.constant 0 : i32
    %c0_i32_1 = arith.constant 0 : i32
    return %c0_i32, %c0_i32_0 : i32, i32
  }
  func.func @transform_6(%arg0: i32) -> (i32, i32) {
    %c0_i32 = arith.constant 0 : i32
    %c0_i32_0 = arith.constant 0 : i32
    %c0_i32_1 = arith.constant 0 : i32
    return %c0_i32, %c0_i32_0 : i32, i32
  }
  func.func @transform_7(%arg0: i32) -> (i32, i32) {
    %c0_i32 = arith.constant 0 : i32
    %c0_i32_0 = arith.constant 0 : i32
    return %arg0, %c0_i32 : i32, i32
  }
  func.func @transform_8(%arg0: i32) -> (i32, i32) {
    %c0_i32 = arith.constant 0 : i32
    %c0_i32_0 = arith.constant 0 : i32
    return %arg0, %c0_i32 : i32, i32
  }
  func.func @transform_9(%arg0: i32) -> (i32, i32) {
    %c0_i32 = arith.constant 0 : i32
    %c0_i32_0 = arith.constant 0 : i32
    return %arg0, %c0_i32 : i32, i32
  }
}

module attributes {stable_mosaic.version = 11 : i64} {
  func.func @_norm_kernel_resident(%arg0: i32, %arg1: memref<512x512xbf16, #tpu.memory_space<vmem>>, %arg2: memref<512x128xbf16, #tpu.memory_space<vmem>>, %arg3: memref<512x128xf32, #tpu.memory_space<vmem>>, %arg4: memref<512x128xf32, #tpu.memory_space<vmem>>, %arg5: memref<512x128xbf16, #tpu.memory_space<vmem>>) attributes {dimension_semantics = [#tpu.dimension_semantics<parallel>], iteration_bounds = array<i64: 2>, scalar_prefetch = 0 : i64, scratch_operands = 0 : i64, tpu.core_type = #tpu.core_type<tc>, window_params = [{transform_indices = @transform_0, window_bounds = array<i64: 512, 512>}, {pipeline_mode = #tpu.pipeline_mode<synchronous>, transform_indices = @transform_1, window_bounds = array<i64: 512, 128>}, {transform_indices = @transform_2, window_bounds = array<i64: 512, 128>}, {transform_indices = @transform_3, window_bounds = array<i64: 512, 128>}, {transform_indices = @transform_4, window_bounds = array<i64: 512, 128>}]} {
    %c0 = arith.constant 0 : index
    %c0_0 = arith.constant 0 : index
    %0 = vector.load %arg1[%c0, %c0_0] : memref<512x512xbf16, #tpu.memory_space<vmem>>, vector<512x512xbf16>
    %c0_1 = arith.constant 0 : index
    %c0_2 = arith.constant 0 : index
    %1 = vector.load %arg2[%c0_1, %c0_2] : memref<512x128xbf16, #tpu.memory_space<vmem>>, vector<512x128xbf16>
    %cst = arith.constant dense<0.000000e+00> : vector<512x128xf32>
    %2 = tpu.matmul %0, %1, %cst {dimension_numbers = #tpu.dot_dimension_numbers<[1], [0], [0], [1], [0, 0, 1, 1], [], []>} : vector<512x512xbf16>, vector<512x128xbf16>, vector<512x128xf32> -> vector<512x128xf32>
    %c0_3 = arith.constant 0 : index
    %c0_4 = arith.constant 0 : index
    %3 = vector.load %arg3[%c0_3, %c0_4] : memref<512x128xf32, #tpu.memory_space<vmem>>, vector<512x128xf32>
    %4 = arith.addf %3, %2 : vector<512x128xf32>
    %c0_5 = arith.constant 0 : index
    %c0_6 = arith.constant 0 : index
    %5 = vector.load %arg4[%c0_5, %c0_6] : memref<512x128xf32, #tpu.memory_space<vmem>>, vector<512x128xf32>
    tpu.vector_store %arg4[%c0_5, %c0_6], %4 {strides = array<i32>} : memref<512x128xf32, #tpu.memory_space<vmem>>, vector<512x128xf32>,
    %6 = arith.truncf %2 : vector<512x128xf32> to vector<512x128xbf16>
    %c0_7 = arith.constant 0 : index
    %c0_8 = arith.constant 0 : index
    %7 = vector.load %arg5[%c0_7, %c0_8] : memref<512x128xbf16, #tpu.memory_space<vmem>>, vector<512x128xbf16>
    tpu.vector_store %arg5[%c0_7, %c0_8], %6 {strides = array<i32>} : memref<512x128xbf16, #tpu.memory_space<vmem>>, vector<512x128xbf16>,
    return
  }
  func.func @transform_0(%arg0: i32) -> (i32, i32) {
    %c0_i32 = arith.constant 0 : i32
    %c0_i32_0 = arith.constant 0 : i32
    return %arg0, %c0_i32 : i32, i32
  }
  func.func @transform_1(%arg0: i32) -> (i32, i32) {
    %c0_i32 = arith.constant 0 : i32
    %c0_i32_0 = arith.constant 0 : i32
    %c0_i32_1 = arith.constant 0 : i32
    return %c0_i32, %c0_i32_0 : i32, i32
  }
  func.func @transform_2(%arg0: i32) -> (i32, i32) {
    %c0_i32 = arith.constant 0 : i32
    %c0_i32_0 = arith.constant 0 : i32
    return %arg0, %c0_i32 : i32, i32
  }
  func.func @transform_3(%arg0: i32) -> (i32, i32) {
    %c0_i32 = arith.constant 0 : i32
    %c0_i32_0 = arith.constant 0 : i32
    return %arg0, %c0_i32 : i32, i32
  }
  func.func @transform_4(%arg0: i32) -> (i32, i32) {
    %c0_i32 = arith.constant 0 : i32
    %c0_i32_0 = arith.constant 0 : i32
    return %arg0, %c0_i32 : i32, i32
  }
}

module attributes {stable_mosaic.version = 11 : i64} {
  func.func @_norm_kernel_resident(%arg0: i32, %arg1: memref<512x512xbf16, #tpu.memory_space<vmem>>, %arg2: memref<512x128xbf16, #tpu.memory_space<vmem>>, %arg3: memref<512x128xf32, #tpu.memory_space<vmem>>, %arg4: memref<512x128xf32, #tpu.memory_space<vmem>>, %arg5: memref<512x128xbf16, #tpu.memory_space<vmem>>) attributes {dimension_semantics = [#tpu.dimension_semantics<parallel>], iteration_bounds = array<i64: 2>, scalar_prefetch = 0 : i64, scratch_operands = 0 : i64, tpu.core_type = #tpu.core_type<tc>, window_params = [{transform_indices = @transform_0, window_bounds = array<i64: 512, 512>}, {pipeline_mode = #tpu.pipeline_mode<synchronous>, transform_indices = @transform_1, window_bounds = array<i64: 512, 128>}, {transform_indices = @transform_2, window_bounds = array<i64: 512, 128>}, {transform_indices = @transform_3, window_bounds = array<i64: 512, 128>}, {transform_indices = @transform_4, window_bounds = array<i64: 512, 128>}]} {
    %c0 = arith.constant 0 : index
    %c0_0 = arith.constant 0 : index
    %0 = vector.load %arg1[%c0, %c0_0] : memref<512x512xbf16, #tpu.memory_space<vmem>>, vector<512x512xbf16>
    %c0_1 = arith.constant 0 : index
    %c0_2 = arith.constant 0 : index
    %1 = vector.load %arg2[%c0_1, %c0_2] : memref<512x128xbf16, #tpu.memory_space<vmem>>, vector<512x128xbf16>
    %cst = arith.constant dense<0.000000e+00> : vector<512x128xf32>
    %2 = tpu.matmul %0, %1, %cst {dimension_numbers = #tpu.dot_dimension_numbers<[1], [0], [0], [1], [0, 0, 1, 1], [], []>} : vector<512x512xbf16>, vector<512x128xbf16>, vector<512x128xf32> -> vector<512x128xf32>
    %c0_3 = arith.constant 0 : index
    %c0_4 = arith.constant 0 : index
    %3 = vector.load %arg3[%c0_3, %c0_4] : memref<512x128xf32, #tpu.memory_space<vmem>>, vector<512x128xf32>
    %4 = arith.addf %3, %2 : vector<512x128xf32>
    %c0_5 = arith.constant 0 : index
    %c0_6 = arith.constant 0 : index
    %5 = vector.load %arg4[%c0_5, %c0_6] : memref<512x128xf32, #tpu.memory_space<vmem>>, vector<512x128xf32>
    tpu.vector_store %arg4[%c0_5, %c0_6], %4 {strides = array<i32>} : memref<512x128xf32, #tpu.memory_space<vmem>>, vector<512x128xf32>,
    %6 = arith.truncf %2 : vector<512x128xf32> to vector<512x128xbf16>
    %c0_7 = arith.constant 0 : index
    %c0_8 = arith.constant 0 : index
    %7 = vector.load %arg5[%c0_7, %c0_8] : memref<512x128xbf16, #tpu.memory_space<vmem>>, vector<512x128xbf16>
    tpu.vector_store %arg5[%c0_7, %c0_8], %6 {strides = array<i32>} : memref<512x128xbf16, #tpu.memory_space<vmem>>, vector<512x128xbf16>,
    return
  }
  func.func @transform_0(%arg0: i32) -> (i32, i32) {
    %c0_i32 = arith.constant 0 : i32
    %c0_i32_0 = arith.constant 0 : i32
    return %arg0, %c0_i32 : i32, i32
  }
  func.func @transform_1(%arg0: i32) -> (i32, i32) {
    %c0_i32 = arith.constant 0 : i32
    %c0_i32_0 = arith.constant 0 : i32
    %c0_i32_1 = arith.constant 0 : i32
    return %c0_i32, %c0_i32_0 : i32, i32
  }
  func.func @transform_2(%arg0: i32) -> (i32, i32) {
    %c0_i32 = arith.constant 0 : i32
    %c0_i32_0 = arith.constant 0 : i32
    return %arg0, %c0_i32 : i32, i32
  }
  func.func @transform_3(%arg0: i32) -> (i32, i32) {
    %c0_i32 = arith.constant 0 : i32
    %c0_i32_0 = arith.constant 0 : i32
    return %arg0, %c0_i32 : i32, i32
  }
  func.func @transform_4(%arg0: i32) -> (i32, i32) {
    %c0_i32 = arith.constant 0 : i32
    %c0_i32_0 = arith.constant 0 : i32
    return %arg0, %c0_i32 : i32, i32
  }
}

</mosaic_0001>

<bundles_post_ra>
// kernel: hypergraph_convolution.4
= control target key start
LH: loop header
LB: loop body
LE: loop exit
PB: predicated region body
PF: predicated region fallthrough
CT: control target
= control target key end

     0   :  { %s4943_s30 = smov 0   ;;  %s5991_s0 = inlined_call_operand.vmem [shape: bf16[512,512], index: 0, kind: input, shape index: {}]   ;;  %s5992_s1 = inlined_call_operand.vmem [shape: bf16[512,512], index: 1, kind: input, shape index: {}]   ;;  %s5993_s2 = inlined_call_operand.vmem [shape: bf16[1024,128], index: 2, kind: input, shape index: {}, may-alias: {2,3}]   ;;  %s5994_s3 = inlined_call_operand.vmem [shape: bf16[1024,128], index: 3, kind: input, shape index: {}, may-alias: {2,3}]   ;;  %s5995_s4 = inlined_call_operand.vmem [shape: bf16[512,128], index: 4, kind: input, shape index: {}]   ;;  %s5996_s5 = inlined_call_operand.vmem [shape: bf16[384,128], index: 5, kind: input, shape index: {}]   ;;  %s5997_s6 = inlined_call_operand.vmem [shape: f32[1,128], index: 6, kind: input, shape index: {}]   ;;  %s5998_s7 = inlined_call_operand.vmem [shape: f32[512,128], index: 7, kind: input, shape index: {}, may-alias: {7,8}]   ;;  %s5999_s8 = inlined_call_operand.vmem [shape: f32[512,128], index: 8, kind: output, shape index: {0}, may-alias: {7,8}]   ;;  %s6000_s9 = inlined_call_operand.vmem [shape: bf16[512,128], index: 9, kind: output, shape index: {1}]  }
   0x1 LB: > { %s3406_s10 = sadd.s32 4294967295, %s4891_s30   ;;  %p3411_p0 = scmp.ge.s32.totalorder %s4891_s30, 1  ;;  %s4891_s30 = sphi %s4943_s30, %s20_s30  }
   0x2   : > { %p327_p1 = scmp.lt.s32.totalorder %s4891_s30, 3 }
   0x4   : > { %p328_p2 = pnand %p3411_p0, %p327_p1 }
   0x6   : > { %331 = sbr.rel (%p328_p2) target bundleno = 738 (0x2e2), region = 52 }
   0xb   : > { %v4605_v0 = vld [vmem:[%s5993_s2 + $0x78] sm:$0xff]   ;;  %s3412_s13 = sshll.u32 %s3406_s10, 5  ;;  %v4607_v2 = vld [vmem:[%s5993_s2 + $0x70] sm:$0xff]   ;;  %v4609_v4 = vld [vmem:[%s5993_s2 + $0x68] sm:$0xff]  }
   0xc   : > { %v4606_v1 = vld [vmem:[%s5993_s2 + $0x38] sm:$0xff]   ;;  %4581 = vmatprep.subr.bf16.mxu1 %v4605_v0  ;;  %3949 = vmatprep.subr.bf16.mxu0 %v4605_v0  ;;  %v4608_v3 = vld [vmem:[%s5993_s2 + $0x30] sm:$0xff]   ;;  %p387_p3 = scmp.lt.s32.totalorder %s3412_s13, 63  ;;  %v4610_v5 = vld [vmem:[%s5993_s2 + $0x28] sm:$0xff]  }
   0xd   : > { %4589 = vmatpush3.bf16.msra.mxu1 %v4606_v1  ;;  %3950 = vmatpush3.bf16.msra.mxu0 %v4606_v1  ;;  %v4611_v6 = vld [vmem:[%s5993_s2 + $0x60] sm:$0xff]   ;;  %v4613_v8 = vld [vmem:[%s5993_s2 + $0x58] sm:$0xff]   ;;  %v4615_v10 = vld [vmem:[%s5993_s2 + $0x50] sm:$0xff]  }
   0xe   : > { %4582 = vmatprep.subr.bf16.mxu1 %v4607_v2  ;;  %3951 = vmatprep.subr.bf16.mxu0 %v4607_v2  ;;  %s6076_s13 = smov (!%p387_p3, %s3412_s13), 63  ;;  %v4612_v7 = vld [vmem:[%s5993_s2 + $0x20] sm:$0xff]   ;;  %v4614_v9 = vld [vmem:[%s5993_s2 + $0x18] sm:$0xff]   ;;  %v4616_v12 = vld [vmem:[%s5993_s2 + $0x10] sm:$0xff]  }
   0xf   : > { %s3741_s28 = sshll.u32 %s6076_s13, 4  ;;  %v4617_v13 = vld [vmem:[%s5993_s2 + $0x48] sm:$0xff]   ;;  %v4619_v15 = vld [vmem:[%s5993_s2 + $0x40] sm:$0xff]   ;;  %v4624_v17 = vld [vmem:[%s5993_s2 + $0xf8] sm:$0xff]   ;;  %s3421_s22 = sshll.u32 %s6076_s13, 3 }
  0x10   : > { %s4986_s14 = scalar_lea.vmem %s5991_s0, %s3741_s28  ;;  %v4618_v14 = vld [vmem:[%s5993_s2 + $0x8] sm:$0xff]   ;;  %v4620_v16 = vld [vmem:[%s5993_s2] sm:$0xff]   ;;  %v4625_v19 = vld [vmem:[%s5993_s2 + $0xb8] sm:$0xff]   ;;  %s5195_s23 = scalar_lea.vmem %s5992_s1, %s3741_s28 }
  0x11   : > { %4590 = vmatpush3.bf16.msra.mxu1 %v4608_v3  ;;  %3952 = vmatpush3.bf16.msra.mxu0 %v4608_v3  ;;  %v4623_v11 = vld [vmem:[%s4986_s14 + $0x184] ss:$16 sps:$4 sm:$0xff]   ;;  %v4621_v18 = vld [vmem:[%s4986_s14 + $0x180] ss:$16 sps:$4 sm:$0xff]   ;;  %v4631_v23 = vld [vmem:[%s5993_s2 + $0xe8] sm:$0xff]   ;;  %s5771_s28 = scalar_lea.vmem %s5998_s7, %s3421_s22  ;;  %s5863_s11 = scalar_lea.vmem %s5999_s8, %s3421_s22 }
  0x12   : > { %4583 = vmatprep.subr.bf16.mxu1 %v4609_v4  ;;  %3953 = vmatprep.subr.bf16.mxu0 %v4609_v4  ;;  %v4628_v20 = vld [vmem:[%s4986_s14 + $0x1a4] ss:$16 sps:$4 sm:$0xff]   ;;  %v4630_v24 = vld [vmem:[%s4986_s14 + $0x1a0] ss:$16 sps:$4 sm:$0xff]   ;;  %v4632_v27 = vld [vmem:[%s5993_s2 + $0xa8] sm:$0xff]  }
  0x13   : > { %1194 = vmatprep.mubr.bf16.mxu1 %v4623_v11  ;;  %v4626_v21 = vld [vmem:[%s5993_s2 + $0xf0] sm:$0xff]   ;;  %v4633_v29 = vld [vmem:[%s5993_s2 + $0xe0] sm:$0xff]   ;;  %v4638_v33 = vld [vmem:[%s5993_s2 + $0xd8] sm:$0xff]  }
  0x14   : > { %v4627_v22 = vld [vmem:[%s5993_s2 + $0xb0] sm:$0xff]   ;;  %v4634_v31 = vld [vmem:[%s5993_s2 + $0xa0] sm:$0xff]   ;;  %v4639_v35 = vld [vmem:[%s5993_s2 + $0x98] sm:$0xff]  }
  0x15   : > { %4591 = vmatpush3.bf16.msra.mxu1 %v4610_v5  ;;  %3954 = vmatpush3.bf16.msra.mxu0 %v4610_v5  ;;  %v4649_v25 = vld [vmem:[%s4986_s14] ss:$16 sps:$4 sm:$0xff]   ;;  %v4651_v26 = vld [vmem:[%s4986_s14 + $0x4] ss:$16 sps:$4 sm:$0xff]   ;;  %v4645_v41 = vld [vmem:[%s5993_s2 + $0xc8] sm:$0xff]  }
  0x16   : > { %4584 = vmatprep.subr.bf16.mxu1 %v4611_v6  ;;  %3955 = vmatprep.subr.bf16.mxu0 %v4611_v6  ;;  %v4635_v28 = vld [vmem:[%s4986_s14 + $0x1c4] ss:$16 sps:$4 sm:$0xff]   ;;  %v4637_v32 = vld [vmem:[%s4986_s14 + $0x1c0] ss:$16 sps:$4 sm:$0xff]   ;;  %v4646_v42 = vld [vmem:[%s5993_s2 + $0x88] sm:$0xff]  }
  0x17   : > { %1098 = vmatprep.mubr.bf16.mxu0 %v4651_v26  ;;  %v4657_v30 = vld [vmem:[%s4986_s14 + $0x24] ss:$16 sps:$4 sm:$0xff]   ;;  %v4661_v34 = vld [vmem:[%s4986_s14 + $0x20] ss:$16 sps:$4 sm:$0xff]   ;;  %v4654_v44 = vld [vmem:[%s4986_s14 + $0xc] ss:$16 sps:$4 sm:$0xff]  }
  0x18   : > { %v4663_v36 = vld [vmem:[%s4986_s14 + $0x44] ss:$16 sps:$4 sm:$0xff]   ;;  %v4644_v40 = vld [vmem:[%s4986_s14 + $0x1e0] ss:$16 sps:$4 sm:$0xff]   ;;  %v4683_v46 = vld [vmem:[%s5994_s3 + $0x178] sm:$0xff]  }
  0x19   : > { %4592 = vmatpush3.bf16.msra.mxu1 %v4612_v7  ;;  %3956 = vmatpush3.bf16.msra.mxu0 %v4612_v7  ;;  %v4642_v37 = vld [vmem:[%s4986_s14 + $0x1e4] ss:$16 sps:$4 sm:$0xff]   ;;  %v4667_v43 = vld [vmem:[%s4986_s14 + $0x40] ss:$16 sps:$4 sm:$0xff]   ;;  %v4685_v48 = vld [vmem:[%s5994_s3 + $0x138] sm:$0xff]  }
  0x1a   : > { %4585 = vmatprep.subr.bf16.mxu1 %v4613_v8  ;;  %3957 = vmatprep.subr.bf16.mxu0 %v4613_v8  ;;  %v4640_v38 = vld [vmem:[%s5993_s2 + $0xd0] sm:$0xff]   ;;  %v4647_v47 = vld [vmem:[%s5993_s2 + $0xc0] sm:$0xff]   ;;  %v4652_v50 = vld [vmem:[%s4986_s14 + $0x8] ss:$16 sps:$4 sm:$0xff]  }
  0x1b   : > { %v4641_v39 = vld [vmem:[%s5993_s2 + $0x90] sm:$0xff]   ;;  %v4648_v49 = vld [vmem:[%s5993_s2 + $0x80] sm:$0xff]   ;;  %v4655_v51 = vld [vmem:[%s5994_s3 + $0x1f8] sm:$0xff]  }
  0x1c   : > { %v4671_v45 = vld [vmem:[%s4986_s14 + $0x64] ss:$16 sps:$4 sm:$0xff]   ;;  %v4675_v52 = vld [vmem:[%s4986_s14 + $0x60] ss:$16 sps:$4 sm:$0xff]   ;;  %v4656_v53 = vld [vmem:[%s5994_s3 + $0x1b8] sm:$0xff]  }
  0x1d   : > { %4593 = vmatpush3.bf16.msra.mxu1 %v4614_v9  ;;  %3958 = vmatpush3.bf16.msra.mxu0 %v4614_v9  ;;  %v4659_v54 = vld [vmem:[%s4986_s14 + $0x2c] ss:$16 sps:$4 sm:$0xff]   ;;  %v4677_v55 = vld [vmem:[%s4986_s14 + $0x84] ss:$16 sps:$4 sm:$0xff]   ;;  %v4681_v60 = vld [vmem:[%s4986_s14 + $0x80] ss:$16 sps:$4 sm:$0xff]  }
  0x1e   : > { %4586 = vmatprep.subr.bf16.mxu1 %v4615_v10  ;;  %3959 = vmatprep.subr.bf16.mxu0 %v4615_v10  ;;  %v4693_v56 = vld [vmem:[%s5994_s3 + $0x170] sm:$0xff]   ;;  %v4662_v61 = vld [vmem:[%s4986_s14 + $0x28] ss:$16 sps:$4 sm:$0xff]   ;;  %v4665_v63 = vld [vmem:[%s4986_s14 + $0x4c] ss:$16 sps:$4 sm:$0xff]  }
  0x1f   : > { %v4669_v57 = vld [vmem:[%s5994_s3 + $0x1f0] sm:$0xff]   ;;  %v4684_v62 = vld [vmem:[%s5994_s3 + $0x1e8] sm:$0xff]   ;;  %v4701_v2 = vld [vmem:[%s5994_s3 + $0x1e0] sm:$0xff]  }
  0x20   : > { %v4694_v58 = vld [vmem:[%s5994_s3 + $0x130] sm:$0xff]   ;;  %v4686_v0 = vld [vmem:[%s5994_s3 + $0x1a8] sm:$0xff]   ;;  %v4702_v6 = vld [vmem:[%s5994_s3 + $0x1a0] sm:$0xff]  }
  0x21   : > { %4594 = vmatpush3.bf16.msra.mxu1 %v4616_v12  ;;  %3960 = vmatpush3.bf16.msra.mxu0 %v4616_v12  ;;  %v4670_v59 = vld [vmem:[%s5994_s3 + $0x1b0] sm:$0xff]   ;;  %v4709_v3 = vld [vmem:[%s5994_s3 + $0x168] sm:$0xff]   ;;  %v4717_v8 = vld [vmem:[%s5994_s3 + $0x1d8] sm:$0xff]  }
  0x22   : > { %4587 = vmatprep.subr.bf16.mxu1 %v4617_v13  ;;  %3961 = vmatprep.subr.bf16.mxu0 %v4617_v13  ;;  %v4687_v1 = vld [vmem:[%s4986_s14 + $0xa4] ss:$16 sps:$4 sm:$0xff]   ;;  %v4710_v4 = vld [vmem:[%s5994_s3 + $0x128] sm:$0xff]   ;;  %v4691_v5 = vld [vmem:[%s4986_s14 + $0xa0] ss:$16 sps:$4 sm:$0xff]  }
  0x23   : > { %v4668_v7 = vld [vmem:[%s4986_s14 + $0x48] ss:$16 sps:$4 sm:$0xff]   ;;  %v4673_v9 = vld [vmem:[%s4986_s14 + $0x6c] ss:$16 sps:$4 sm:$0xff]   ;;  %v4695_v10 = vld [vmem:[%s4986_s14 + $0xc4] ss:$16 sps:$4 sm:$0xff]  }
  0x24   : > { %v4719_v11 = vld [vmem:[%s5994_s3 + $0x160] sm:$0xff]   ;;  %v4718_v12 = vld [vmem:[%s5994_s3 + $0x198] sm:$0xff]  }
  0x25   : > { %4595 = vmatpush3.bf16.msra.mxu1 %v4618_v14  ;;  %3962 = vmatpush3.bf16.msra.mxu0 %v4618_v14  ;;  %v4720_v13 = vld [vmem:[%s5994_s3 + $0x120] sm:$0xff]   ;;  %v4676_v14 = vld [vmem:[%s4986_s14 + $0x68] ss:$16 sps:$4 sm:$0xff]   ;;  %v4689_v26 = vld [vmem:[%s4986_s14 + $0xac] ss:$16 sps:$4 sm:$0xff]  }
  0x26   : > { %4588 = vmatprep.subr.bf16.mxu1 %v4619_v15  ;;  %3963 = vmatprep.subr.bf16.mxu0 %v4619_v15  ;;  %v4699_v15 = vld [vmem:[%s4986_s14 + $0xc0] ss:$16 sps:$4 sm:$0xff]  }
  0x29   : > { %4596 = vmatpush3.bf16.msra.mxu1 %v4620_v16  ;;  %3964 = vmatpush3.bf16.msra.mxu0 %v4620_v16  ;;  %v4703_v16 = vld [vmem:[%s4986_s14 + $0xe4] ss:$16 sps:$4 sm:$0xff]  }
  0x2a   : > { %4061 = vmatprep.subr.bf16.mxu1 %v4624_v17  ;;  %4173 = vmatprep.subr.bf16.mxu0 %v4683_v46  ;;  %v4679_v17 = vld [vmem:[%s4986_s14 + $0x8c] ss:$16 sps:$4 sm:$0xff]   ;;  %v4737_v46 = vld [vmem:[%s4986_s14 + $0x164] ss:$16 sps:$4 sm:$0xff]  }
  0x2c   : > { %1195 = vmatmul.mubr.bf16.vlgmr.msra.gmra.mxu1 %v4621_v18  ;;  %1099 = vmatmul.mubr.bf16.vlgmr.msra.gmra.mxu0 %v4649_v25  ;;  %v4733_v18 = vld [vmem:[%s5994_s3 + $0x158] sm:$0xff]   ;;  %v4744_v25 = vld [vmem:[%s5994_s3 + $0x110] sm:$0xff]  }
  0x2d   : > { %4062 = vmatpush3.bf16.msra.mxu1 %v4625_v19  ;;  %1202 = vmatprep.mubr.bf16.mxu1 %v4628_v20  ;;  %v4734_v19 = vld [vmem:[%s5994_s3 + $0x1d0] sm:$0xff]   ;;  %v4735_v20 = vld [vmem:[%s5994_s3 + $0x118] sm:$0xff]  }
  0x2e   : > { %4063 = vmatprep.subr.bf16.mxu1 %v4626_v21  ;;  %1106 = vmatprep.mubr.bf16.mxu0 %v4657_v30  ;;  %v4736_v21 = vld [vmem:[%s5994_s3 + $0x190] sm:$0xff]   ;;  %v4753_v30 = vld [vmem:[%s5994_s3 + $0x148] sm:$0xff]  }
  0x2f   : > { %4174 = vmatpush3.bf16.msra.mxu0 %v4685_v48  ;;  %v4741_v48 = vld [vmem:[%s4986_s14 + $0x160] ss:$16 sps:$4 sm:$0xff]  }
  0x30   : > { %4175 = vmatprep.subr.bf16.mxu0 %v4693_v56  ;;  %v4773_v56 = vld [vmem:[%s5195_s23 + $0x20] ss:$16 sps:$4 sm:$0xff]  }
  0x31   : > { %4064 = vmatpush3.bf16.msra.mxu1 %v4627_v22  ;;  %v4707_v22 = vld [vmem:[%s4986_s14 + $0xe0] ss:$16 sps:$4 sm:$0xff]  }
  0x32   : > { %4065 = vmatprep.subr.bf16.mxu1 %v4631_v23  ;;  %v4682_v23 = vld [vmem:[%s4986_s14 + $0x88] ss:$16 sps:$4 sm:$0xff]  }
  0x33   : > { %4176 = vmatpush3.bf16.msra.mxu0 %v4694_v58  ;;  %v4777_v58 = vld [vmem:[%s5195_s23 + $0x44] ss:$16 sps:$4 sm:$0xff]  }
  0x34   : > { %1203 = vmatmul.mubr.bf16.gmra.mxu1 %v4630_v24  ;;  %1107 = vmatmul.mubr.bf16.gmra.mxu0 %v4661_v34  ;;  %v4743_v24 = vld [vmem:[%s5994_s3 + $0x150] sm:$0xff]   ;;  %v4697_v34 = vld [vmem:[%s4986_s14 + $0xcc] ss:$16 sps:$4 sm:$0xff]  }
  0x35   : > { %4066 = vmatpush3.bf16.msra.mxu1 %v4632_v27  ;;  %1210 = vmatprep.mubr.bf16.mxu1 %v4635_v28  ;;  %v4711_v27 = vld [vmem:[%s4986_s14 + $0x104] ss:$16 sps:$4 sm:$0xff]   ;;  %v4748_v28 = vld [vmem:[%s5994_s3 + $0x1c8] sm:$0xff]  }
  0x36   : > { %4067 = vmatprep.subr.bf16.mxu1 %v4633_v29  ;;  %1114 = vmatprep.mubr.bf16.mxu0 %v4663_v36  ;;  %v4749_v29 = vld [vmem:[%s5994_s3 + $0x188] sm:$0xff]   ;;  %v4758_v36 = vld [vmem:[%s5994_s3 + $0x1c0] sm:$0xff]  }
  0x37   : > { %4177 = vmatprep.subr.bf16.mxu0 %v4709_v3  ;;  %v4747_v3 = vld [vmem:[%s4986_s14 + $0x188] ss:$16 sps:$4 sm:$0xff]  }
  0x38   : > { %4178 = vmatpush3.bf16.msra.mxu0 %v4710_v4  ;;  %v4789_v4 = vld [vmem:[%s5195_s23 + $0x84] ss:$16 sps:$4 sm:$0xff]  }
  0x39   : > { %4068 = vmatpush3.bf16.msra.mxu1 %v4634_v31  ;;  %4179 = vmatprep.subr.bf16.mxu0 %v4719_v11  ;;  %v4754_v31 = vld [vmem:[%s5994_s3 + $0x108] sm:$0xff]  }
  0x3a   : > { %4069 = vmatprep.subr.bf16.mxu1 %v4638_v33  ;;  %v4715_v33 = vld [vmem:[%s4986_s14 + $0x100] ss:$16 sps:$4 sm:$0xff]   ;;  %v4755_v11 = vld [vmem:[%s4986_s14 + $0x1cc] ss:$16 sps:$4 sm:$0xff]  }
  0x3c   : > { %1211 = vmatmul.mubr.bf16.gmra.mxu1 %v4637_v32  ;;  %1115 = vmatmul.mubr.bf16.gmra.mxu0 %v4667_v43  ;;  %v4692_v32 = vld [vmem:[%s4986_s14 + $0xa8] ss:$16 sps:$4 sm:$0xff]   ;;  %v4705_v43 = vld [vmem:[%s4986_s14 + $0xec] ss:$16 sps:$4 sm:$0xff]  }
  0x3d   : > { %4070 = vmatpush3.bf16.msra.mxu1 %v4639_v35  ;;  %1218 = vmatprep.mubr.bf16.mxu1 %v4642_v37  ;;  %v4721_v35 = vld [vmem:[%s4986_s14 + $0x124] ss:$16 sps:$4 sm:$0xff]  }
  0x3e   : > { %4071 = vmatprep.subr.bf16.mxu1 %v4640_v38  ;;  %1122 = vmatprep.mubr.bf16.mxu0 %v4671_v45  ;;  %v4759_v37 = vld [vmem:[%s5994_s3 + $0x180] sm:$0xff]   ;;  %v4708_v45 = vld [vmem:[%s4986_s14 + $0xe8] ss:$16 sps:$4 sm:$0xff]  }
  0x3f   : > { %4180 = vmatpush3.bf16.msra.mxu0 %v4720_v13  ;;  %v4760_v38 = vld [vmem:[%s5994_s3 + $0x140] sm:$0xff]   ;;  %v4757_v13 = vld [vmem:[%s4986_s14 + $0x1c8] ss:$16 sps:$4 sm:$0xff]  }
  0x40   : > { %4181 = vmatprep.subr.bf16.mxu0 %v4733_v18  ;;  %v4860_v18 = vld [vmem:[%s5996_s5 + $0x28] sm:$0xff]  }
  0x41   : > { %4072 = vmatpush3.bf16.msra.mxu1 %v4641_v39  ;;  %v4761_v39 = vld [vmem:[%s5994_s3 + $0x100] sm:$0xff]  }
  0x42   : > { %4073 = vmatprep.subr.bf16.mxu1 %v4645_v41  ;;  %v4700_v41 = vld [vmem:[%s4986_s14 + $0xc8] ss:$16 sps:$4 sm:$0xff]  }
  0x43   : > { %4182 = vmatpush3.bf16.msra.mxu0 %v4735_v20  ;;  %v4807_v20 = vld [vmem:[%s5195_s23 + $0xe4] ss:$16 sps:$4 sm:$0xff]  }
  0x44   : > { %1219 = vmatmul.mubr.bf16.gmra.mxu1 %v4644_v40  ;;  %1123 = vmatmul.mubr.bf16.gmra.mxu0 %v4675_v52  ;;  %v4725_v40 = vld [vmem:[%s4986_s14 + $0x120] ss:$16 sps:$4 sm:$0xff]  }
  0x45   : > { %4074 = vmatpush3.bf16.msra.mxu1 %v4646_v42  ;;  %1259 = vmatprep.mubr.bf16.mxu1 %v4654_v44  ;;  %v4727_v42 = vld [vmem:[%s4986_s14 + $0x144] ss:$16 sps:$4 sm:$0xff]   ;;  %v4731_v44 = vld [vmem:[%s4986_s14 + $0x140] ss:$16 sps:$4 sm:$0xff]  }
  0x46   : > { %4075 = vmatprep.subr.bf16.mxu1 %v4647_v47  ;;  %1130 = vmatprep.mubr.bf16.mxu0 %v4677_v55  ;;  %v4713_v47 = vld [vmem:[%s4986_s14 + $0x10c] ss:$16 sps:$4 sm:$0xff]   ;;  %v4765_v52 = vld [vmem:[%s5195_s23] ss:$16 sps:$4 sm:$0xff]  }
  0x47   : > { %4183 = vmatprep.subr.bf16.mxu0 %v4743_v24  ;;  %v4729_v55 = vld [vmem:[%s4986_s14 + $0x14c] ss:$16 sps:$4 sm:$0xff]   ;;  %v4813_v24 = vld [vmem:[%s5195_s23 + $0x104] ss:$16 sps:$4 sm:$0xff]  }
  0x48   : > { %4184 = vmatpush3.bf16.msra.mxu0 %v4744_v25  ;;  %v4774_v25 = vld [vmem:[%s5195_s23 + $0x2c] ss:$16 sps:$4 sm:$0xff]  }
  0x49   : > { %4076 = vmatpush3.bf16.msra.mxu1 %v4648_v49  ;;  %4185 = vmatprep.subr.bf16.mxu0 %v4753_v30  ;;  %v4716_v49 = vld [vmem:[%s4986_s14 + $0x108] ss:$16 sps:$4 sm:$0xff]   ;;  %v4819_v30 = vld [vmem:[%s5195_s23 + $0x124] ss:$16 sps:$4 sm:$0xff]  }
  0x4a   : > { %4285 = vmatprep.subr.bf16.mxu1 %v4655_v51  ;;  %v4723_v51 = vld [vmem:[%s4986_s14 + $0x12c] ss:$16 sps:$4 sm:$0xff]  }
  0x4c   : > { %1260 = vmatmul.mubr.bf16.vlgmr.msra.gmra.mxu1 %v4652_v50  ;;  %1131 = vmatmul.mubr.bf16.gmra.mxu0 %v4681_v60  ;;  %v4767_v50 = vld [vmem:[%s5195_s23 + $0x4] ss:$16 sps:$4 sm:$0xff]   ;;  %v4779_v60 = vld [vmem:[%s5195_s23 + $0x40] ss:$16 sps:$4 sm:$0xff]  }
  0x4d   : > { %4286 = vmatpush3.bf16.msra.mxu1 %v4656_v53  ;;  %1267 = vmatprep.mubr.bf16.mxu1 %v4659_v54  ;;  %v4726_v53 = vld [vmem:[%s4986_s14 + $0x128] ss:$16 sps:$4 sm:$0xff]   ;;  %v4771_v54 = vld [vmem:[%s5195_s23 + $0x24] ss:$16 sps:$4 sm:$0xff]  }
  0x4e   : > { %4287 = vmatprep.subr.bf16.mxu1 %v4669_v57  ;;  %1138 = vmatprep.mubr.bf16.mxu0 %v4687_v1  ;;  %v4732_v57 = vld [vmem:[%s4986_s14 + $0x148] ss:$16 sps:$4 sm:$0xff]   ;;  %v4745_v1 = vld [vmem:[%s4986_s14 + $0x18c] ss:$16 sps:$4 sm:$0xff]  }
  0x4f   : > { %4186 = vmatpush3.bf16.msra.mxu0 %v4754_v31  ;;  %v4780_v31 = vld [vmem:[%s5195_s23 + $0x4c] ss:$16 sps:$4 sm:$0xff]  }
  0x50   : > { %4187 = vmatprep.subr.bf16.mxu0 %v4760_v38  ;;  %v4870_v38 = vld [vmem:[%s5996_s5 + $0x18] sm:$0xff]  }
  0x51   : > { %4288 = vmatpush3.bf16.msra.mxu1 %v4670_v59  ;;  %v4739_v59 = vld [vmem:[%s4986_s14 + $0x16c] ss:$16 sps:$4 sm:$0xff]  }
  0x52   : > { %4289 = vmatprep.subr.bf16.mxu1 %v4684_v62  ;;  %v4783_v62 = vld [vmem:[%s5195_s23 + $0x64] ss:$16 sps:$4 sm:$0xff]  }
  0x53   : > { %4188 = vmatpush3.bf16.msra.mxu0 %v4761_v39  ;;  %v4788_v39 = vld [vmem:[%s5195_s23 + $0x68] ss:$16 sps:$4 sm:$0xff]  }
  0x54   : > { %1268 = vmatmul.mubr.bf16.gmra.mxu1 %v4662_v61  ;;  %1139 = vmatmul.mubr.bf16.gmra.mxu0 %v4691_v5  ;;  %v4742_v61 = vld [vmem:[%s4986_s14 + $0x168] ss:$16 sps:$4 sm:$0xff]   ;;  %v4750_v5 = vld [vmem:[%s4986_s14 + $0x1ac] ss:$16 sps:$4 sm:$0xff]  }
  0x55   : > { %1275 = vmatprep.mubr.bf16.mxu1 %v4665_v63  ;;  %4290 = vmatpush3.bf16.msra.mxu1 %v4686_v0  ;;  %v4828_v63 = vld [vmem:[%s5996_s5 + $0x78] sm:$0xff]  }
  0x56   : > { %4291 = vmatprep.subr.bf16.mxu1 %v4701_v2  ;;  %1146 = vmatprep.mubr.bf16.mxu0 %v4695_v10  ;;  %v4832_v0 = vld [vmem:[%s5996_s5 + $0x38] sm:$0xff]   ;;  %v4785_v2 = vld [vmem:[%s5195_s23 + $0x60] ss:$16 sps:$4 sm:$0xff]   ;;  %v4795_v10 = vld [vmem:[%s5195_s23 + $0xa4] ss:$16 sps:$4 sm:$0xff]  }
  0x57   : > { %4397 = vmatprep.subr.bf16.mxu0 %v4828_v63 }
  0x59   : > { %4292 = vmatpush3.bf16.msra.mxu1 %v4702_v6  ;;  %v4791_v6 = vld [vmem:[%s5195_s23 + $0x80] ss:$16 sps:$4 sm:$0xff]  }
  0x5a   : > { %4293 = vmatprep.subr.bf16.mxu1 %v4717_v8  ;;  %v4846_v8 = vld [vmem:[%s5996_s5 + $0x30] sm:$0xff]  }
  0x5c   : > { %1276 = vmatmul.mubr.bf16.gmra.mxu1 %v4668_v7  ;;  %1147 = vmatmul.mubr.bf16.gmra.mxu0 %v4699_v15  ;;  %v4842_v7 = vld [vmem:[%s5996_s5 + $0x70] sm:$0xff]   ;;  %v4762_v15 = vld [vmem:[%s4986_s14 + $0x1ec] ss:$16 sps:$4 sm:$0xff]  }
  0x5d   : > { %1283 = vmatprep.mubr.bf16.mxu1 %v4673_v9  ;;  %4294 = vmatpush3.bf16.msra.mxu1 %v4718_v12  ;;  %v4752_v9 = vld [vmem:[%s4986_s14 + $0x1a8] ss:$16 sps:$4 sm:$0xff]   ;;  %v4797_v12 = vld [vmem:[%s5195_s23 + $0xa0] ss:$16 sps:$4 sm:$0xff]  }
  0x5e   : > { %4295 = vmatprep.subr.bf16.mxu1 %v4734_v19  ;;  %1154 = vmatprep.mubr.bf16.mxu0 %v4703_v16  ;;  %v4803_v16 = vld [vmem:[%s5195_s23 + $0xc0] ss:$16 sps:$4 sm:$0xff]   ;;  %v4764_v19 = vld [vmem:[%s4986_s14 + $0x1e8] ss:$16 sps:$4 sm:$0xff]  }
  0x61   : > { %4296 = vmatpush3.bf16.msra.mxu1 %v4736_v21  ;;  %v4770_v21 = vld [vmem:[%s5195_s23 + $0xc] ss:$16 sps:$4 sm:$0xff]  }
  0x62   : > { %4297 = vmatprep.subr.bf16.mxu1 %v4748_v28  ;;  %v4868_v28 = vld [vmem:[%s5996_s5 + $0x20] sm:$0xff]  }
  0x64   : > { %1284 = vmatmul.mubr.bf16.gmra.mxu1 %v4676_v14  ;;  %1155 = vmatmul.mubr.bf16.gmra.mxu0 %v4707_v22  ;;  %v4801_v14 = vld [vmem:[%s5195_s23 + $0xc4] ss:$16 sps:$4 sm:$0xff]   ;;  %v4809_v22 = vld [vmem:[%s5195_s23 + $0xe0] ss:$16 sps:$4 sm:$0xff]  }
  0x65   : > { %1291 = vmatprep.mubr.bf16.mxu1 %v4679_v17  ;;  %1162 = vmatprep.mubr.bf16.mxu0 %v4711_v27  ;;  %v4856_v17 = vld [vmem:[%s5996_s5 + $0x68] sm:$0xff]   ;;  %v4867_v27 = vld [vmem:[%s5996_s5 + $0x60] sm:$0xff]  }
  0x66   : > { %4298 = vmatpush3.bf16.msra.mxu1 %v4749_v29  ;;  %v4776_v29 = vld [vmem:[%s5195_s23 + $0x28] ss:$16 sps:$4 sm:$0xff]  }
  0x67   : > { %4299 = vmatprep.subr.bf16.mxu1 %v4758_v36  ;;  %v4827_v36 = vld [vmem:[%s5195_s23 + $0x140] ss:$16 sps:$4 sm:$0xff]  }
  0x6a   : > { %4300 = vmatpush3.bf16.msra.mxu1 %v4759_v37  ;;  %v4869_v37 = vld [vmem:[%s5996_s5 + $0x58] sm:$0xff]  }
  0x6c   : > { %1292 = vmatmul.mubr.bf16.gmra.mxu1 %v4682_v23  ;;  %1163 = vmatmul.mubr.bf16.gmra.mxu0 %v4715_v33  ;;  %v4768_v23 = vld [vmem:[%s5195_s23 + $0x8] ss:$16 sps:$4 sm:$0xff]  }
  0x6d   : > { %1299 = vmatprep.mubr.bf16.mxu1 %v4689_v26  ;;  %1170 = vmatprep.mubr.bf16.mxu0 %v4721_v35  ;;  %v4815_v26 = vld [vmem:[%s5195_s23 + $0x100] ss:$16 sps:$4 sm:$0xff]   ;;  %v4782_v33 = vld [vmem:[%s5195_s23 + $0x48] ss:$16 sps:$4 sm:$0xff]   ;;  %v4786_v35 = vld [vmem:[%s5195_s23 + $0x6c] ss:$16 sps:$4 sm:$0xff]  }
  0x74   : > { %1300 = vmatmul.mubr.bf16.gmra.mxu1 %v4692_v32  ;;  %1171 = vmatmul.mubr.bf16.gmra.mxu0 %v4725_v40  ;;  %v4821_v32 = vld [vmem:[%s5195_s23 + $0x120] ss:$16 sps:$4 sm:$0xff]   ;;  %v4833_v40 = vld [vmem:[%s5195_s23 + $0x164] ss:$16 sps:$4 sm:$0xff]  }
  0x75   : > { %1307 = vmatprep.mubr.bf16.mxu1 %v4697_v34  ;;  %1178 = vmatprep.mubr.bf16.mxu0 %v4727_v42  ;;  %v4825_v34 = vld [vmem:[%s5195_s23 + $0x144] ss:$16 sps:$4 sm:$0xff]   ;;  %v4871_v42 = vld [vmem:[%s5996_s5 + $0xb8] sm:$0xff]  }
  0x76   : > { %4533 = vmatprep.subr.bf16.mxu1 %v4871_v42 }
  0x7c   : > { %1308 = vmatmul.mubr.bf16.gmra.mxu1 %v4700_v41  ;;  %1179 = vmatmul.mubr.bf16.gmra.mxu0 %v4731_v44  ;;  %v4792_v41 = vld [vmem:[%s5195_s23 + $0x8c] ss:$16 sps:$4 sm:$0xff]   ;;  %v4794_v44 = vld [vmem:[%s5195_s23 + $0x88] ss:$16 sps:$4 sm:$0xff]  }
  0x7d   : > { %1315 = vmatprep.mubr.bf16.mxu1 %v4705_v43  ;;  %1186 = vmatprep.mubr.bf16.mxu0 %v4737_v46  ;;  %v4835_v43 = vld [vmem:[%s5195_s23 + $0x160] ss:$16 sps:$4 sm:$0xff]   ;;  %v4798_v46 = vld [vmem:[%s5195_s23 + $0xac] ss:$16 sps:$4 sm:$0xff]  }
  0x84   : > { %1316 = vmatmul.mubr.bf16.gmra.mxu1 %v4708_v45  ;;  %1187 = vmatmul.mubr.bf16.gmra.mxu0 %v4741_v48  ;;  %v4839_v45 = vld [vmem:[%s5195_s23 + $0x184] ss:$16 sps:$4 sm:$0xff]  }
  0x85   : > { %1323 = vmatprep.mubr.bf16.mxu1 %v4713_v47  ;;  %2060 = vmatprep.mubr.bf16.mxu0 %v4767_v50  ;;  %v4841_v50 = vld [vmem:[%s5195_s23 + $0x180] ss:$16 sps:$4 sm:$0xff]  }
  0x8c   : > { %1324 = vmatmul.mubr.bf16.gmra.mxu1 %v4716_v49  ;;  %2061 = vmatmul.mubr.bf16.vlgmr.msra.gmra.mxu0 %v4765_v52  ;;  %v4873_v52 = vld [vmem:[%s5996_s5 + $0x10] sm:$0xff]  }
  0x8d   : > { %1331 = vmatprep.mubr.bf16.mxu1 %v4723_v51  ;;  %2068 = vmatprep.mubr.bf16.mxu0 %v4771_v54  ;;  %v4872_v51 = vld [vmem:[%s5996_s5 + $0x50] sm:$0xff]   ;;  %v4800_v54 = vld [vmem:[%s5195_s23 + $0xa8] ss:$16 sps:$4 sm:$0xff]  }
  0x8e   : > { %4398 = vmatpush3.bf16.msra.mxu0 %v4832_v0 }
  0x8f   : > { %4399 = vmatprep.subr.bf16.mxu0 %v4842_v7  ;;  %v4810_v7 = vld [vmem:[%s5195_s23 + $0xec] ss:$16 sps:$4 sm:$0xff]  }
  0x92   : > { %4400 = vmatpush3.bf16.msra.mxu0 %v4846_v8 }
  0x93   : > { %4401 = vmatprep.subr.bf16.mxu0 %v4856_v17 }
  0x94   : > { %1332 = vmatmul.mubr.bf16.gmra.mxu1 %v4726_v53  ;;  %2069 = vmatmul.mubr.bf16.gmra.mxu0 %v4773_v56  ;;  %v4804_v56 = vld [vmem:[%s5195_s23 + $0xcc] ss:$16 sps:$4 sm:$0xff]  }
  0x95   : > { %1339 = vmatprep.mubr.bf16.mxu1 %v4729_v55  ;;  %2076 = vmatprep.mubr.bf16.mxu0 %v4777_v58  ;;  %v4847_v55 = vld [vmem:[%s5195_s23 + $0x1a4] ss:$16 sps:$4 sm:$0xff]  }
  0x96   : > { %4402 = vmatpush3.bf16.msra.mxu0 %v4860_v18  ;;  %v4855_v18 = vld [vmem:[%s5195_s23 + $0x1c0] ss:$16 sps:$4 sm:$0xff]  }
  0x97   : > { %4403 = vmatprep.subr.bf16.mxu0 %v4867_v27 }
  0x9a   : > { %4404 = vmatpush3.bf16.msra.mxu0 %v4868_v28 }
  0x9b   : > { %4405 = vmatprep.subr.bf16.mxu0 %v4869_v37 }
  0x9c   : > { %1340 = vmatmul.mubr.bf16.gmra.mxu1 %v4732_v57  ;;  %2077 = vmatmul.mubr.bf16.gmra.mxu0 %v4779_v60  ;;  %v4874_v57 = vld [vmem:[%s5996_s5 + $0xb0] sm:$0xff]  }
  0x9d   : > { %1347 = vmatprep.mubr.bf16.mxu1 %v4739_v59  ;;  %2084 = vmatprep.mubr.bf16.mxu0 %v4783_v62 }
  0x9e   : > { %4406 = vmatpush3.bf16.msra.mxu0 %v4870_v38  ;;  %v4816_v38 = vld [vmem:[%s5195_s23 + $0x108] ss:$16 sps:$4 sm:$0xff]  }
  0x9f   : > { %4407 = vmatprep.subr.bf16.mxu0 %v4872_v51 }
  0xa2   : > { %4408 = vmatpush3.bf16.msra.mxu0 %v4873_v52  ;;  %v4878_v52 = vld [vmem:[%s5996_s5 + $0x40] sm:$0xff]  }
  0xa4   : > { %1348 = vmatmul.mubr.bf16.gmra.mxu1 %v4742_v61  ;;  %2085 = vmatmul.mubr.bf16.gmra.mxu0 %v4785_v2 }
  0xa5   : > { %1355 = vmatprep.mubr.bf16.mxu1 %v4745_v1  ;;  %2092 = vmatprep.mubr.bf16.mxu0 %v4789_v4 }
  0xac   : > { %1356 = vmatmul.mubr.bf16.gmra.mxu1 %v4747_v3  ;;  %2093 = vmatmul.mubr.bf16.gmra.mxu0 %v4791_v6  ;;  %v4849_v3 = vld [vmem:[%s5195_s23 + $0x1a0] ss:$16 sps:$4 sm:$0xff]   ;;  %v4853_v6 = vld [vmem:[%s5195_s23 + $0x1c4] ss:$16 sps:$4 sm:$0xff]  }
  0xad   : > { %1363 = vmatprep.mubr.bf16.mxu1 %v4750_v5  ;;  %2100 = vmatprep.mubr.bf16.mxu0 %v4795_v10  ;;  %v4806_v5 = vld [vmem:[%s5195_s23 + $0xc8] ss:$16 sps:$4 sm:$0xff]  }
  0xb4   : > { %1364 = vmatmul.mubr.bf16.gmra.mxu1 %v4752_v9  ;;  %2101 = vmatmul.mubr.bf16.gmra.mxu0 %v4797_v12 }
  0xb5   : > { %1371 = vmatprep.mubr.bf16.mxu1 %v4755_v11  ;;  %2108 = vmatprep.mubr.bf16.mxu0 %v4801_v14 }
  0xbc   : > { %1372 = vmatmul.mubr.bf16.gmra.mxu1 %v4757_v13  ;;  %2109 = vmatmul.mubr.bf16.gmra.mxu0 %v4803_v16 }
  0xbd   : > { %1379 = vmatprep.mubr.bf16.mxu1 %v4762_v15  ;;  %2116 = vmatprep.mubr.bf16.mxu0 %v4807_v20  ;;  %v4876_v20 = vld [vmem:[%s5996_s5 + $0x8] sm:$0xff]  }
  0xc4   : > { %1380 = vmatmul.mubr.bf16.gmra.mxu1 %v4764_v19  ;;  %2117 = vmatmul.mubr.bf16.gmra.mxu0 %v4809_v22  ;;  %v4875_v19 = vld [vmem:[%s5996_s5 + $0x48] sm:$0xff]  }
  0xc5   : > { %2221 = vmatprep.mubr.bf16.mxu1 %v4770_v21  ;;  %2124 = vmatprep.mubr.bf16.mxu0 %v4813_v24  ;;  %v4812_v22 = vld [vmem:[%s5195_s23 + $0xe8] ss:$16 sps:$4 sm:$0xff]   ;;  %v4818_v24 = vld [vmem:[%s5195_s23 + $0x10c] ss:$16 sps:$4 sm:$0xff]  }
  0xc6   : > { %4409 = vmatprep.subr.bf16.mxu0 %v4875_v19  ;;  %v4838_v19 = vld [vmem:[%s5195_s23 + $0x16c] ss:$16 sps:$4 sm:$0xff]  }
  0xc7   : > { %4410 = vmatpush3.bf16.msra.mxu0 %v4876_v20 }
  0xc8   : > { %4411 = vmatprep.subr.bf16.mxu0 %v4878_v52 }
  0xcc   : > { %2222 = vmatmul.mubr.bf16.vlgmr.msra.gmra.mxu1 %v4768_v23  ;;  %2125 = vmatmul.mubr.bf16.gmra.mxu0 %v4815_v26  ;;  %v4861_v23 = vld [vmem:[%s5195_s23 + $0x1e4] ss:$16 sps:$4 sm:$0xff]   ;;  %v4877_v26 = vld [vmem:[%s5996_s5 + $0xa8] sm:$0xff]  }
  0xcd   : > { %2229 = vmatprep.mubr.bf16.mxu1 %v4774_v25  ;;  %2132 = vmatprep.mubr.bf16.mxu0 %v4819_v30 }
  0xce   : > { %4534 = vmatpush3.bf16.msra.mxu1 %v4871_v42 }
  0xcf   : > { %4535 = vmatprep.subr.bf16.mxu1 %v4874_v57 }
  0xd2   : > { %4536 = vmatpush3.bf16.msra.mxu1 %v4874_v57 }
  0xd3   : > { %4537 = vmatprep.subr.bf16.mxu1 %v4877_v26 }
  0xd4   : > { %2230 = vmatmul.mubr.bf16.gmra.mxu1 %v4776_v29  ;;  %2133 = vmatmul.mubr.bf16.gmra.mxu0 %v4821_v32 }
  0xd5   : > { %2237 = vmatprep.mubr.bf16.mxu1 %v4780_v31  ;;  %2140 = vmatprep.mubr.bf16.mxu0 %v4825_v34 }
  0xd6   : > { %4538 = vmatpush3.bf16.msra.mxu1 %v4877_v26 }
  0xdc   : > { %2238 = vmatmul.mubr.bf16.gmra.mxu1 %v4782_v33  ;;  %2141 = vmatmul.mubr.bf16.gmra.mxu0 %v4827_v36  ;;  %v4863_v36 = vld [vmem:[%s5195_s23 + $0x1e0] ss:$16 sps:$4 sm:$0xff]  }
  0xdd   : > { %2245 = vmatprep.mubr.bf16.mxu1 %v4786_v35  ;;  %2148 = vmatprep.mubr.bf16.mxu0 %v4833_v40 }
  0xe4   : > { %2246 = vmatmul.mubr.bf16.gmra.mxu1 %v4788_v39  ;;  %2149 = vmatmul.mubr.bf16.gmra.mxu0 %v4835_v43  ;;  %v4824_v39 = vld [vmem:[%s5195_s23 + $0x12c] ss:$16 sps:$4 sm:$0xff]  }
  0xe5   : > { %2253 = vmatprep.mubr.bf16.mxu1 %v4792_v41  ;;  %2156 = vmatprep.mubr.bf16.mxu0 %v4839_v45 }
  0xec   : > { %v4037_v47 = vpop.f32.mrf.mxu1  ;;  %2254 = vmatmul.mubr.bf16.gmra.mxu1 %v4794_v44  ;;  %v3965_v60 = vpop.f32.mrf.mxu0  ;;  %2157 = vmatmul.mubr.bf16.gmra.mxu0 %v4841_v50 }
  0xed   : > { %2261 = vmatprep.mubr.bf16.mxu1 %v4798_v46  ;;  %2164 = vmatprep.mubr.bf16.mxu0 %v4847_v55  ;;  %v4880_v46 = vld [vmem:[%s5996_s5 + $0xa0] sm:$0xff]   ;;  %v4822_v55 = vld [vmem:[%s5195_s23 + $0x128] ss:$16 sps:$4 sm:$0xff]  }
  0xee   : > { %v4038_v48 = vpop.f32.mrf.mxu1  ;;  %v3966_v62 = vpop.f32.mrf.mxu0  ;;  %4539 = vmatprep.subr.bf16.mxu1 %v4880_v46 }
  0xef   : > { %v5293_v49 = vadd.f32 %v4038_v48, %v4037_v47  ;;  %v5310_v0 = vadd.f32 %v3966_v62, %v3965_v60  ;;  %4540 = vmatpush3.bf16.msra.mxu1 %v4880_v46 }
  0xf0   : > { %v4040_v53 = vpop.f32.mrf.mxu1  ;;  %v5314_v2 = vpop.f32.mrf.mxu0 }
  0xf2   : > { %v4041_v58 = vpop.f32.mrf.mxu1  ;;  %v5320_v8 = vpop.f32.mrf.mxu0 }
  0xf3   : > { %v5308_v59 = vadd.f32 %v4041_v58, %v4040_v53  ;;  %v4879_v53 = vld [vmem:[%s5996_s5] sm:$0xff]   ;;  %v3970_v57 = vadd.f32 %v5320_v8, %v5314_v2  ;;  %v4831_v58 = vld [vmem:[%s5195_s23 + $0x14c] ss:$16 sps:$4 sm:$0xff]  }
  0xf4   : > { %v4043_v61 = vpop.f32.mrf.mxu1  ;;  %2262 = vmatmul.mubr.bf16.gmra.mxu1 %v4800_v54  ;;  %v3971_v11 = vpop.f32.mrf.mxu0  ;;  %2165 = vmatmul.mubr.bf16.gmra.mxu0 %v4849_v3 }
  0xf5   : > { %2269 = vmatprep.mubr.bf16.mxu1 %v4804_v56  ;;  %2172 = vmatprep.mubr.bf16.mxu0 %v4853_v6 }
  0xf6   : > { %v4044_v63 = vpop.f32.mrf.mxu1  ;;  %v3972_v13 = vpop.f32.mrf.mxu0  ;;  %4412 = vmatpush3.bf16.msra.mxu0 %v4879_v53 }
  0xf7   : > { %v5312_v1 = vadd.f32 %v4044_v63, %v4043_v61  ;;  %v5324_v15 = vadd.f32 %v3972_v13, %v3971_v11  ;;  %v4881_v61 = vld [vmem:[%s5996_s5 + $0x98] sm:$0xff]  }
  0xf8   : > { %v4046_v4 = vpop.f32.mrf.mxu1  ;;  %v5328_v17 = vpop.f32.mrf.mxu0  ;;  %4541 = vmatprep.subr.bf16.mxu1 %v4881_v61  ;;  %v4829_v13 = vld [vmem:[%s5195_s23 + $0x148] ss:$16 sps:$4 sm:$0xff]  }
  0xf9   : > { %4542 = vmatpush3.bf16.msra.mxu1 %v4881_v61 }
  0xfa   : > { %v4047_v9 = vpop.f32.mrf.mxu1  ;;  %v5340_v25 = vpop.f32.mrf.mxu0 }
  0xfb   : > { %v5322_v10 = vadd.f32 %v4047_v9, %v4046_v4 }
  0xfc   : > { %v4049_v12 = vpop.f32.mrf.mxu1  ;;  %2270 = vmatmul.mubr.bf16.gmra.mxu1 %v4806_v5  ;;  %v3977_v29 = vpop.f32.mrf.mxu0  ;;  %2173 = vmatmul.mubr.bf16.gmra.mxu0 %v4855_v18  ;;  %v4882_v5 = vld [vmem:[%s5996_s5 + $0x90] sm:$0xff]   ;;  %v3976_v18 = vadd.f32 %v5340_v25, %v5328_v17  ;;  %v4884_v17 = vld [vmem:[%s5996_s5 + $0x80] sm:$0xff]  }
  0xfd   : > { %2277 = vmatprep.mubr.bf16.mxu1 %v4810_v7  ;;  %2180 = vmatprep.mubr.bf16.mxu0 %v4861_v23 }
  0xfe   : > { %v4050_v14 = vpop.f32.mrf.mxu1  ;;  %v3978_v31 = vpop.f32.mrf.mxu0  ;;  %4543 = vmatprep.subr.bf16.mxu1 %v4882_v5 }
  0xff   : > { %v5326_v16 = vadd.f32 %v4050_v14, %v4049_v12  ;;  %v5347_v33 = vadd.f32 %v3978_v31, %v3977_v29  ;;  %4544 = vmatpush3.bf16.msra.mxu1 %v4882_v5 }
 0x100   : > { %v4052_v21 = vpop.f32.mrf.mxu1  ;;  %v5351_v35 = vpop.f32.mrf.mxu0 }
 0x102   : > { %v4053_v27 = vpop.f32.mrf.mxu1  ;;  %v5356_v40 = vpop.f32.mrf.mxu0 }
 0x103   : > { %v5345_v28 = vadd.f32 %v4053_v27, %v4052_v21  ;;  %v4883_v21 = vld [vmem:[%s5996_s5 + $0x88] sm:$0xff]  }
 0x104   : > { %v4055_v30 = vpop.f32.mrf.mxu1  ;;  %2278 = vmatmul.mubr.bf16.gmra.mxu1 %v4812_v22  ;;  %v3983_v43 = vpop.f32.mrf.mxu0  ;;  %2181 = vmatmul.mubr.bf16.gmra.mxu0 %v4863_v36 }
 0x105   : > { %2285 = vmatprep.mubr.bf16.mxu1 %v4818_v24  ;;  %4545 = vmatprep.subr.bf16.mxu1 %v4883_v21 }
 0x106   : > { %v4056_v32 = vpop.f32.mrf.mxu1  ;;  %v3984_v45 = vpop.f32.mrf.mxu0  ;;  %4546 = vmatpush3.bf16.msra.mxu1 %v4883_v21 }
 0x107   : > { %v5349_v34 = vadd.f32 %v4056_v32, %v4055_v30  ;;  %v5363_v48 = vadd.f32 %v3984_v45, %v3983_v43  ;;  %4547 = vmatprep.subr.bf16.mxu1 %v4884_v17 }
 0x108   : > { %v4058_v37 = vpop.f32.mrf.mxu1  ;;  %v5365_v51 = vpop.f32.mrf.mxu0 }
 0x10a   : > { %v4059_v41 = vpop.f32.mrf.mxu1  ;;  %v5380_v60 = vpop.f32.mrf.mxu0  ;;  %4548 = vmatpush3.bf16.msra.mxu1 %v4884_v17 }
 0x10b   : > { %v5358_v42 = vadd.f32 %v4059_v41, %v4058_v37  ;;  %v4836_v37 = vld [vmem:[%s5195_s23 + $0x168] ss:$16 sps:$4 sm:$0xff]   ;;  %v4845_v41 = vld [vmem:[%s5195_s23 + $0x18c] ss:$16 sps:$4 sm:$0xff]   ;;  %v3988_v61 = vadd.f32 %v5380_v60, %v5365_v51 }
 0x10c   : > { %v4077_v44 = vpop.f32.mrf.mxu1  ;;  %2286 = vmatmul.mubr.bf16.gmra.mxu1 %v4816_v38  ;;  %v3989_v3 = vpop.f32.mrf.mxu0 }
 0x10d   : > { %2293 = vmatprep.mubr.bf16.mxu1 %v4824_v39  ;;  %v3982_v39 = vadd.f32 %v5356_v40, %v5351_v35 }
 0x10e   : > { %v4078_v47 = vpop.f32.mrf.mxu1  ;;  %v3990_v2 = vpop.f32.mrf.mxu0 }
 0x10f   : > { %v4079_v50 = vadd.f32 %v4078_v47, %v4077_v44  ;;  %v5390_v7 = vadd.f32 %v3990_v2, %v3989_v3 }
 0x110   : > { %v4080_v54 = vpop.f32.mrf.mxu1  ;;  %v5394_v11 = vpop.f32.mrf.mxu0 }
 0x111   : > { %v5375_v56 = vadd.f32 %v4079_v50, %v5310_v0 }
 0x112   : > { %v4081_v62 = vpop.f32.mrf.mxu1  ;;  %v3993_v20 = vpop.f32.mrf.mxu0 }
 0x113   : > { %v4082_v63 = vadd.f32 %v4081_v62, %v4080_v54  ;;  %v4852_v62 = vld [vmem:[%s5195_s23 + $0x1ac] ss:$16 sps:$4 sm:$0xff]  }
 0x114   : > { %v4083_v4 = vpop.f32.mrf.mxu1  ;;  %2294 = vmatmul.mubr.bf16.gmra.mxu1 %v4822_v55  ;;  %v3995_v24 = vpop.f32.mrf.mxu0 }
 0x115   : > { %v5385_v0 = vadd.f32 %v4082_v63, %v3970_v57  ;;  %2301 = vmatprep.mubr.bf16.mxu1 %v4831_v58  ;;  %v4843_v57 = vld [vmem:[%s5195_s23 + $0x188] ss:$16 sps:$4 sm:$0xff]  }
 0x116   : > { %v4084_v6 = vpop.f32.mrf.mxu1  ;;  %v3996_v27 = vpop.f32.mrf.mxu0 }
 0x117   : > { %v4085_v9 = vadd.f32 %v4084_v6, %v4083_v4  ;;  %v5411_v29 = vadd.f32 %v3996_v27, %v3995_v24 }
 0x118   : > { %v4086_v12 = vpop.f32.mrf.mxu1  ;;  %v5415_v32 = vpop.f32.mrf.mxu0 }
 0x119   : > { %v5398_v14 = vadd.f32 %v4085_v9, %v5324_v15 }
 0x11a   : > { %v4087_v22 = vpop.f32.mrf.mxu1  ;;  %v3999_v43 = vpop.f32.mrf.mxu0 }
 0x11b   : > { %v4088_v23 = vadd.f32 %v4087_v22, %v4086_v12  ;;  %v3994_v22 = vadd.f32 %v3993_v20, %v5394_v11 }
 0x11c   : > { %v4089_v26 = vpop.f32.mrf.mxu1  ;;  %2302 = vmatmul.mubr.bf16.gmra.mxu1 %v4829_v13  ;;  %v4001_v46 = vpop.f32.mrf.mxu0 }
 0x11d   : > { %v5406_v15 = vadd.f32 %v4088_v23, %v3976_v18  ;;  %2309 = vmatprep.mubr.bf16.mxu1 %v4838_v19  ;;  %v4850_v19 = vld [vmem:[%s5195_s23 + $0x1a8] ss:$16 sps:$4 sm:$0xff]   ;;  %v4859_v23 = vld [vmem:[%s5195_s23 + $0x1cc] ss:$16 sps:$4 sm:$0xff]  }
 0x11e   : > { %v4090_v25 = vpop.f32.mrf.mxu1  ;;  %v4002_v52 = vpop.f32.mrf.mxu0 }
 0x11f   : > { %v4091_v31 = vadd.f32 %v4090_v25, %v4089_v26 }
 0x120   : > { %v4092_v36 = vpop.f32.mrf.mxu1  ;;  %v4004_v54 = vpop.f32.mrf.mxu0 }
 0x121   : > { %v5419_v38 = vadd.f32 %v4091_v31, %v5347_v33  ;;  %v5426_v33 = vadd.f32 %v4002_v52, %v4001_v46  ;;  %v4000_v46 = vadd.f32 %v3999_v43, %v5415_v32  ;;  %v4864_v43 = vld [vmem:[%s5195_s23 + $0x1e8] ss:$16 sps:$4 sm:$0xff]  }
 0x122   : > { %v4093_v44 = vpop.f32.mrf.mxu1  ;;  %v4005_v63 = vpop.f32.mrf.mxu0 }
 0x123   : > { %v4094_v45 = vadd.f32 %v4093_v44, %v4092_v36  ;;  %v4857_v44 = vld [vmem:[%s5195_s23 + $0x1c8] ss:$16 sps:$4 sm:$0xff]  }
 0x124   : > { %v4095_v47 = vpop.f32.mrf.mxu1  ;;  %2310 = vmatmul.mubr.bf16.gmra.mxu1 %v4836_v37  ;;  %v4007_v2 = vpop.f32.mrf.mxu0 }
 0x125   : > { %v5424_v50 = vadd.f32 %v4094_v45, %v3982_v39  ;;  %2317 = vmatprep.mubr.bf16.mxu1 %v4845_v41 }
 0x126   : > { %v4096_v53 = vpop.f32.mrf.mxu1  ;;  %v4008_v9 = vpop.f32.mrf.mxu0 }
 0x127   : > { %v4097_v40 = vadd.f32 %v4096_v53, %v4095_v47  ;;  %v4009_v13 = vadd.f32 %v4008_v9, %v4007_v2  ;;  %v4866_v47 = vld [vmem:[%s5195_s23 + $0x1ec] ss:$16 sps:$4 sm:$0xff]   ;;  %s3419_s23 = sshll.u32 %s6076_s13, 2 }
 0x128   : > { %v4098_v55 = vpop.f32.mrf.mxu1  ;;  %v4010_v51 = vpop.f32.mrf.mxu0  ;;  %s5590_s21 = scalar_lea.vmem %s5995_s4, %s3419_s23  ;;  %s5882_s16 = scalar_lea.vmem %s6000_s9, %s3419_s23 }
 0x129   : > { %v5432_v58 = vadd.f32 %v4097_v40, %v5363_v48 }
 0x12a   : > { %v4099_v3 = vpop.f32.mrf.mxu1  ;;  %v4011_v24 = vpop.f32.mrf.mxu0 }
 0x12b   : > { %v4100_v4 = vadd.f32 %v4099_v3, %v4098_v55 }
 0x12c   : > { %v4101_v5 = vpop.f32.mrf.mxu1  ;;  %2318 = vmatmul.mubr.bf16.gmra.mxu1 %v4843_v57  ;;  %v4013_v17 = vpop.f32.mrf.mxu0 }
 0x12d   : > { %v5437_v6 = vadd.f32 %v4100_v4, %v3988_v61  ;;  %2325 = vmatprep.mubr.bf16.mxu1 %v4852_v62 }
 0x12e   : > { %v4102_v12 = vpop.f32.mrf.mxu1  ;;  %v4014_v36 = vpop.f32.mrf.mxu0 }
 0x12f   : > { %v4103_v18 = vadd.f32 %v4102_v12, %v4101_v5  ;;  %v4015_v39 = vadd.f32 %v4014_v36, %v4013_v17  ;;  %v4006_v12 = vadd.f32 %v4005_v63, %v4004_v54  ;;  %v4012_v54 = vadd.f32 %v4011_v24, %v4010_v51 }
 0x130   : > { %v4104_v60 = vpop.f32.mrf.mxu1  ;;  %v4016_v11 = vpop.f32.mrf.mxu0 }
 0x131   : > { %v5443_v21 = vadd.f32 %v4103_v18, %v5390_v7 }
 0x132   : > { %v4105_v26 = vpop.f32.mrf.mxu1  ;;  %v4017_v52 = vpop.f32.mrf.mxu0 }
 0x133   : > { %v4106_v27 = vadd.f32 %v4105_v26, %v4104_v60 }
 0x134   : > { %v4107_v25 = vpop.f32.mrf.mxu1  ;;  %2326 = vmatmul.mubr.bf16.gmra.mxu1 %v4850_v19  ;;  %v4019_v55 = vpop.f32.mrf.mxu0 }
 0x135   : > { %v5447_v31 = vadd.f32 %v4106_v27, %v3994_v22  ;;  %2333 = vmatprep.mubr.bf16.mxu1 %v4859_v23 }
 0x136   : > { %v4108_v37 = vpop.f32.mrf.mxu1  ;;  %v4020_v62 = vpop.f32.mrf.mxu0 }
 0x137   : > { %v4109_v41 = vadd.f32 %v4108_v37, %v4107_v25  ;;  %v4021_v4 = vadd.f32 %v4020_v62, %v4019_v55 }
 0x138   : > { %v4110_v20 = vpop.f32.mrf.mxu1  ;;  %v4022_v5 = vpop.f32.mrf.mxu0 }
 0x139   : > { %v5453_v45 = vadd.f32 %v4109_v41, %v5411_v29 }
 0x13a   : > { %v4111_v53 = vpop.f32.mrf.mxu1  ;;  %v4023_v18 = vpop.f32.mrf.mxu0 }
 0x13b   : > { %v4112_v40 = vadd.f32 %v4111_v53, %v4110_v20 }
 0x13c   : > { %v4113_v57 = vpop.f32.mrf.mxu1  ;;  %2334 = vmatmul.mubr.bf16.gmra.mxu1 %v4857_v44  ;;  %v4025_v22 = vpop.f32.mrf.mxu0 }
 0x13d   : > { %v5457_v61 = vadd.f32 %v4112_v40, %v4000_v46  ;;  %2341 = vmatprep.mubr.bf16.mxu1 %v4866_v47 }
 0x13e   : > { %v4114_v3 = vpop.f32.mrf.mxu1  ;;  %v4026_v27 = vpop.f32.mrf.mxu0 }
 0x13f   : > { %v4115_v2 = vadd.f32 %v4114_v3, %v4113_v57  ;;  %v4027_v25 = vadd.f32 %v4026_v27, %v4025_v22 }
 0x140   : > { %v4116_v32 = vpop.f32.mrf.mxu1  ;;  %v4028_v41 = vpop.f32.mrf.mxu0 }
 0x141   : > { %v5463_v9 = vadd.f32 %v4115_v2, %v5426_v33 }
 0x142   : > { %v4117_v60 = vpop.f32.mrf.mxu1  ;;  %v4029_v63 = vpop.f32.mrf.mxu0 }
 0x143   : > { %v4118_v19 = vadd.f32 %v4117_v60, %v4116_v32 }
 0x144   : > { %v4119_v23 = vpop.f32.mrf.mxu1  ;;  %2342 = vmatmul.mubr.bf16.gmra.mxu1 %v4864_v43  ;;  %v4031_v47 = vpop.f32.mrf.mxu0 }
 0x145   : > { %v5465_v26 = vadd.f32 %v4118_v19, %v4006_v12 }
 0x146   : > { %v4120_v17 = vpop.f32.mrf.mxu1  ;;  %v4032_v55 = vpop.f32.mrf.mxu0 }
 0x147   : > { %v4121_v37 = vadd.f32 %v4120_v17, %v4119_v23  ;;  %v4033_v62 = vadd.f32 %v4032_v55, %v4031_v47 }
 0x148   : > { %v4122_v20 = vpop.f32.mrf.mxu1  ;;  %v4034_v32 = vpop.f32.mrf.mxu0 }
 0x149   : > { %v5469_v33 = vadd.f32 %v4121_v37, %v4009_v13  ;;  %v4018_v13 = vadd.f32 %v4017_v52, %v4016_v11  ;;  %v4024_v11 = vadd.f32 %v4023_v18, %v4022_v5  ;;  %v4030_v18 = vadd.f32 %v4029_v63, %v4028_v41 }
 0x14a   : > { %v4123_v44 = vpop.f32.mrf.mxu1  ;;  %v4035_v51 = vpop.f32.mrf.mxu0 }
 0x14b   : > { %6019 = vst [vmem:[#allocation2_spill] sm:$0xff] %v5469_v33  ;;  %v4124_v46 = vadd.f32 %v4123_v44, %v4122_v20  ;;  %v4036_v63 = vadd.f32 %v4035_v51, %v4034_v32  ;;  %v3919_v33 = vld [vmem:[%s5590_s21 + $0x8] sm:$0xff]  }
 0x14c   : > { %v4125_v53 = vpop.f32.mrf.mxu1  ;;  %v5477_v19 = vpop.f32.mrf.mxu0 }
 0x14d   : > { %v5471_v40 = vadd.f32 %v4124_v46, %v4012_v54 }
 0x14e   : > { %v4126_v57 = vpop.f32.mrf.mxu1  ;;  %v5481_v27 = vpop.f32.mrf.mxu0 }
 0x14f   : > { %6020 = vst [vmem:[#allocation3_spill] sm:$0xff] %v5471_v40  ;;  %v4127_v2 = vadd.f32 %v4126_v57, %v4125_v53 }
 0x150   : > { %v4128_v43 = vpop.f32.mrf.mxu1  ;;  %v5485_v54 = vpop.f32.mrf.mxu0 }
 0x151   : > { %v5475_v12 = vadd.f32 %v4127_v2, %v4015_v39 }
 0x152   : > { %v4129_v24 = vpop.f32.mrf.mxu1  ;;  %v5489_v52 = vpop.f32.mrf.mxu0 }
 0x153   : > { %6021 = vst [vmem:[#allocation4_spill] sm:$0xff] %v5475_v12  ;;  %v4130_v60 = vadd.f32 %v4129_v24, %v4128_v43 }
 0x154   : > { %v4131_v22 = vpop.f32.mrf.mxu1  ;;  %v5491_v53 = vpop.f32.mrf.mxu0 }
 0x155   : > { %v5479_v23 = vadd.f32 %v4130_v60, %v4018_v13 }
 0x156   : > { %v4132_v17 = vpop.f32.mrf.mxu1  ;;  %v5495_v2 = vpop.f32.mrf.mxu0 }
 0x157   : > { %6022 = vst [vmem:[#allocation5_spill] sm:$0xff] %v5479_v23  ;;  %v4133_v20 = vadd.f32 %v4132_v17, %v4131_v22 }
 0x158   : > { %v4134_v39 = vpop.f32.mrf.mxu1  ;;  %v5499_v60 = vpop.f32.mrf.mxu0 }
 0x159   : > { %v5487_v44 = vadd.f32 %v4133_v20, %v4021_v4 }
 0x15a   : > { %v4135_v46 = vpop.f32.mrf.mxu1  ;;  %v5503_v22 = vpop.f32.mrf.mxu0 }
 0x15b   : > { %6023 = vst [vmem:[#allocation6_spill] sm:$0xff] %v5487_v44  ;;  %v4136_v47 = vadd.f32 %v4135_v46, %v4134_v39 }
 0x15c   : > { %v4137_v55 = vpop.f32.mrf.mxu1  ;;  %v5505_v39 = vpop.f32.mrf.mxu0 }
 0x15d   : > { %v5493_v57 = vadd.f32 %v4136_v47, %v4024_v11 }
 0x15e   : > { %v4138_v43 = vpop.f32.mrf.mxu1  ;;  %v5509_v47 = vpop.f32.mrf.mxu0 }
 0x15f   : > { %6024 = vst [vmem:[#allocation7_spill] sm:$0xff] %v5493_v57  ;;  %v4139_v24 = vadd.f32 %v4138_v43, %v4137_v55 }
 0x160   : > { %v4140_v4 = vpop.f32.mrf.mxu1  ;;  %v5513_v13 = vpop.f32.mrf.mxu0 }
 0x161   : > { %v5501_v5 = vadd.f32 %v4139_v24, %v4027_v25 }
 0x162   : > { %v4141_v17 = vpop.f32.mrf.mxu1  ;;  %v5517_v24 = vpop.f32.mrf.mxu0 }
 0x163   : > { %6025 = vst [vmem:[#allocation8_spill] sm:$0xff] %v5501_v5  ;;  %v4142_v20 = vadd.f32 %v4141_v17, %v4140_v4 }
 0x164   : > { %v4143_v11 = vpop.f32.mrf.mxu1  ;;  %v5519_v3 = vpop.f32.mrf.mxu0 }
 0x165   : > { %v5507_v46 = vadd.f32 %v4142_v20, %v4030_v18 }
 0x166   : > { %v4144_v37 = vpop.f32.mrf.mxu1  ;;  %v5523_v36 = vpop.f32.mrf.mxu0 }
 0x167   : > { %6026 = vst [vmem:[#allocation9_spill] sm:$0xff] %v5507_v46  ;;  %v4145_v43 = vadd.f32 %v4144_v37, %v4143_v11 }
 0x168   : > { %v4146_v25 = vpop.f32.mrf.mxu1  ;;  %v5527_v55 = vpop.f32.mrf.mxu0 }
 0x169   : > { %v5515_v41 = vadd.f32 %v4145_v43, %v4033_v62 }
 0x16a   : > { %v4147_v4 = vpop.f32.mrf.mxu1  ;;  %v5532_v51 = vpop.f32.mrf.mxu0 }
 0x16b   : > { %6027 = vst [vmem:[#allocation10_spill] sm:$0xff] %v5515_v41  ;;  %v4148_v17 = vadd.f32 %v4147_v4, %v4146_v25 }
 0x16c   : > { %v4149_v18 = vpop.f32.mrf.mxu1  ;;  %v5534_v4 = vpop.f32.mrf.mxu0 }
 0x16d   : > { %v5521_v20 = vadd.f32 %v4148_v17, %v4036_v63 }
 0x16e   : > { %v4150_v29 = vpop.f32.mrf.mxu1  ;;  %v5539_v7 = vpop.f32.mrf.mxu0 }
 0x16f   : > { %6028 = vst [vmem:[#allocation11_spill] sm:$0xff] %v5521_v20  ;;  %v4151_v11 = vadd.f32 %v4150_v29, %v4149_v18 }
 0x170   : > { %v4152_v62 = vpop.f32.mrf.mxu1  ;;  %v5543_v48 = vpop.f32.mrf.mxu0 }
 0x171   : > { %v5530_v32 = vadd.f32 %v4151_v11, %v5293_v49 }
 0x172   : > { %v4153_v43 = vpop.f32.mrf.mxu1 }
 0x173   : > { %6029 = vst [vmem:[#allocation12_spill] sm:$0xff] %v5530_v32  ;;  %v4154_v25 = vadd.f32 %v4153_v43, %v4152_v62  ;;  %v5548_v62 = vpop.f32.mrf.mxu0 }
 0x174   : > { %v4155_v63 = vpop.f32.mrf.mxu1 }
 0x175   : > { %v5537_v17 = vadd.f32 %v4154_v25, %v5308_v59  ;;  %v5550_v30 = vpop.f32.mrf.mxu0 }
 0x176   : > { %v4156_v37 = vpop.f32.mrf.mxu1 }
 0x177   : > { %6030 = vst [vmem:[#allocation13_spill] sm:$0xff] %v5537_v17  ;;  %v4157_v18 = vadd.f32 %v4156_v37, %v4155_v63  ;;  %v5555_v8 = vpop.f32.mrf.mxu0 }
 0x178   : > { %v4158_v49 = vpop.f32.mrf.mxu1 }
 0x179   : > { %v5546_v11 = vadd.f32 %v4157_v18, %v5312_v1  ;;  %v5559_v32 = vpop.f32.mrf.mxu0 }
 0x17a   : > { %v4159_v43 = vpop.f32.mrf.mxu1 }
 0x17b   : > { %6031 = vst [vmem:[#allocation14_spill] sm:$0xff] %v5546_v11  ;;  %v4160_v35 = vadd.f32 %v4159_v43, %v4158_v49  ;;  %v5564_v49 = vpop.f32.mrf.mxu0 }
 0x17c   : > { %v4161_v59 = vpop.f32.mrf.mxu1 }
 0x17d   : > { %v5553_v25 = vadd.f32 %v4160_v35, %v5322_v10  ;;  %v5566_v10 = vpop.f32.mrf.mxu0 }
 0x17e   : > { %v4162_v29 = vpop.f32.mrf.mxu1 }
 0x17f   : > { %6032 = vst [vmem:[#allocation15_spill] sm:$0xff] %v5553_v25  ;;  %v4163_v63 = vadd.f32 %v4162_v29, %v4161_v59  ;;  %v5571_v37 = vpop.f32.mrf.mxu0 }
 0x180   : > { %v4164_v1 = vpop.f32.mrf.mxu1 }
 0x181   : > { %v5562_v18 = vadd.f32 %v4163_v63, %v5326_v16  ;;  %v5575_v16 = vpop.f32.mrf.mxu0 }
 0x182   : > { %v4165_v43 = vpop.f32.mrf.mxu1 }
 0x183   : > { %6033 = vst [vmem:[#allocation16_spill] sm:$0xff] %v5562_v18  ;;  %v4166_v17 = vadd.f32 %v4165_v43, %v4164_v1  ;;  %v5581_v1 = vpop.f32.mrf.mxu0 }
 0x184   : > { %v4167_v35 = vpop.f32.mrf.mxu1 }
 0x185   : > { %v5569_v41 = vadd.f32 %v4166_v17, %v5345_v28  ;;  %v5583_v28 = vpop.f32.mrf.mxu0 }
 0x186   : > { %v4168_v29 = vpop.f32.mrf.mxu1 }
 0x187   : > { %6034 = vst [vmem:[#allocation17_spill] sm:$0xff] %v5569_v41  ;;  %v4169_v11 = vadd.f32 %v4168_v29, %v4167_v35  ;;  %v4191_v41 = vadd.f32 %v5481_v27, %v5477_v19 }
 0x188   : > { %v4170_v63 = vpop.f32.mrf.mxu1 }
 0x189   : > { %v5578_v25 = vadd.f32 %v4169_v11, %v5349_v34  ;;  %v5595_v34 = vpop.f32.mrf.mxu0 }
 0x18a   : > { %v4171_v43 = vpop.f32.mrf.mxu1 }
 0x18b   : > { %6035 = vst [vmem:[#allocation18_spill] sm:$0xff] %v5578_v25  ;;  %v4172_v20 = vadd.f32 %v4171_v43, %v4170_v63  ;;  %v3776_v43 = vld [vmem:[%s5590_s21] sm:$0xff]   ;;  %v5600_v59 = vpop.f32.mrf.mxu0 }
 0x18c   : > { %v4301_v17 = vpop.f32.mrf.mxu1  ;;  %6037 = vst [vmem:[#allocation20_spill] sm:$0xff] %v5600_v59  ;;  %v3777_v46 = vunpack.c.l.bf16 %v3776_v43  ;;  %v3778_v12 = vunpack.c.h.bf16 %v3776_v43 }
 0x18d   : > { %v5593_v35 = vadd.f32 %v4172_v20, %v5358_v42  ;;  %v5604_v5 = vpop.f32.mrf.mxu0  ;;  %v4194_v20 = vadd.f32 %v5489_v52, %v5485_v54  ;;  %v4197_v54 = vadd.f32 %v5495_v2, %v5491_v53 }
 0x18e   : > { %v4302_v11 = vpop.f32.mrf.mxu1  ;;  %6038 = vst [vmem:[#allocation21_spill] sm:$0xff] %v5604_v5 }
 0x18f   : > { %6036 = vst [vmem:[#allocation19_spill] sm:$0xff] %v5593_v35  ;;  %v4303_v63 = vadd.f32 %v4302_v11, %v4301_v17  ;;  %v5608_v29 = vpop.f32.mrf.mxu0 }
 0x190   : > { %v4304_v18 = vpop.f32.mrf.mxu1 }
 0x191   : > { %v2224_v44 = vadd.f32 %v4303_v63, %v4191_v41  ;;  %v5610_v25 = vpop.f32.mrf.mxu0  ;;  %v3782_v63 = vunpack.c.h.bf16 %v3919_v33 }
 0x192   : > { %v4305_v42 = vpop.f32.mrf.mxu1 }
 0x193   : > { %v4306_v57 = vadd.f32 %v4305_v42, %v4304_v18  ;;  %v2414_v23 = vmul.f32 %v3777_v46, %v2224_v44  ;;  %v5613_v5 = vpop.f32.mrf.mxu0  ;;  %v6039_v46 = vpack.c.bf16 %v5385_v0, %v5375_v56  ;;  %v4203_v0 = vadd.f32 %v5509_v47, %v5505_v39 }
 0x194   : > { %v4307_v17 = vpop.f32.mrf.mxu1 }
 0x195   : > { %v2227_v11 = vadd.f32 %v4306_v57, %v4194_v20  ;;  %v5617_v41 = vpop.f32.mrf.mxu0  ;;  %v3781_v57 = vunpack.c.l.bf16 %v3919_v33 }
 0x196   : > { %v4308_v35 = vpop.f32.mrf.mxu1 }
 0x197   : > { %v2415_v19 = vmul.f32 %v3778_v12, %v2227_v11  ;;  %v4309_v27 = vadd.f32 %v4308_v35, %v4307_v17  ;;  %v2447_v40 = vpack.c.bf16 %v2227_v11, %v2224_v44  ;;  %v4200_v12 = vadd.f32 %v5503_v22, %v5499_v60  ;;  %v5624_v53 = vpop.f32.mrf.mxu0  ;;  %v3920_v17 = vld [vmem:[%s5590_s21 + $0x10] sm:$0xff]  }
 0x198   : > { %v4310_v59 = vpop.f32.mrf.mxu1  ;;  %v3785_v33 = vunpack.c.l.bf16 %v3920_v17 }
 0x199   : > { %2725 = vmatprep.mubr.bf16.mxu0 %v2447_v40  ;;  %v2448_v52 = vpack.c.bf16 %v2415_v19, %v2414_v23  ;;  %v2232_v44 = vadd.f32 %v4309_v27, %v4197_v54  ;;  %v5627_v56 = vpop.f32.mrf.mxu0  ;;  %v4206_v27 = vadd.f32 %v5517_v24, %v5513_v13 }
 0x19a   : > { %v4311_v18 = vpop.f32.mrf.mxu1  ;;  %2726 = vmatmul.mubr.bf16.vlgmr.msra.gmra.mxu0 %v6039_v46 }
 0x19b   : > { %v4312_v35 = vadd.f32 %v4311_v18, %v4310_v59  ;;  %4549 = vmatprep.mubr.bf16.mxu1 %v2448_v52  ;;  %v2416_v2 = vmul.f32 %v3781_v57, %v2232_v44  ;;  %v6040_v59 = vpack.c.bf16 %v5406_v15, %v5398_v14  ;;  %v3786_v57 = vunpack.c.h.bf16 %v3920_v17  ;;  %v5636_v46 = vpop.f32.mrf.mxu0 }
 0x19c   : > { %v4313_v43 = vpop.f32.mrf.mxu1  ;;  %v4209_v15 = vadd.f32 %v5523_v36, %v5519_v3 }
 0x19d   : > { %v2235_v40 = vadd.f32 %v4312_v35, %v4200_v12  ;;  %v5639_v14 = vpop.f32.mrf.mxu0 }
 0x19e   : > { %v4314_v23 = vpop.f32.mrf.mxu1 }
 0x19f   : > { %v2417_v42 = vmul.f32 %v3782_v63, %v2235_v40  ;;  %v4315_v20 = vadd.f32 %v4314_v23, %v4313_v43  ;;  %v2450_v11 = vpack.c.bf16 %v2235_v40, %v2232_v44  ;;  %v3921_v63 = vld [vmem:[%s5590_s21 + $0x18] sm:$0xff]  }
 0x1a0   : > { %v4316_v19 = vpop.f32.mrf.mxu1  ;;  %v3789_v24 = vunpack.c.l.bf16 %v3921_v63 }
 0x1a1   : > { %v2451_v60 = vpack.c.bf16 %v2417_v42, %v2416_v2  ;;  %2733 = vmatprep.mubr.bf16.mxu0 %v2450_v11  ;;  %v2240_v54 = vadd.f32 %v4315_v20, %v4203_v0  ;;  %v6041_v2 = vpack.c.bf16 %v5424_v50, %v5419_v38  ;;  %v4212_v42 = vadd.f32 %v5532_v51, %v5527_v55  ;;  %v5648_v0 = vpop.f32.mrf.mxu0 }
 0x1a2   : > { %v4317_v22 = vpop.f32.mrf.mxu1  ;;  %2734 = vmatmul.mubr.bf16.gmra.mxu0 %v6040_v59  ;;  %v3790_v11 = vunpack.c.h.bf16 %v3921_v63  ;;  %v3922_v59 = vld [vmem:[%s5590_s21 + $0x20] sm:$0xff]   ;;  %v4215_v50 = vadd.f32 %v5539_v7, %v5534_v4 }
 0x1a3   : > { %v4318_v52 = vadd.f32 %v4317_v22, %v4316_v19  ;;  %4550 = vmatmul.mubr.bf16.vlgmr.msra.gmra.mxu1 %v2451_v60  ;;  %v2418_v12 = vmul.f32 %v3785_v33, %v2240_v54  ;;  %v5651_v38 = vpop.f32.mrf.mxu0  ;;  %v3793_v51 = vunpack.c.l.bf16 %v3922_v59 }
 0x1a4   : > { %v4319_v18 = vpop.f32.mrf.mxu1 }
 0x1a5   : > { %v2243_v39 = vadd.f32 %v4318_v52, %v4206_v27 }
 0x1a6   : > { %v4320_v47 = vpop.f32.mrf.mxu1 }
 0x1a7   : > { %v2419_v44 = vmul.f32 %v3786_v57, %v2243_v39  ;;  %v4321_v35 = vadd.f32 %v4320_v47, %v4319_v18  ;;  %v2453_v43 = vpack.c.bf16 %v2243_v39, %v2240_v54  ;;  %v6042_v57 = vpack.c.bf16 %v5437_v6, %v5432_v58 }
 0x1a8   : > { %v4322_v40 = vpop.f32.mrf.mxu1  ;;  %v4218_v18 = vadd.f32 %v5548_v62, %v5543_v48  ;;  %v4221_v6 = vadd.f32 %v5555_v8, %v5550_v30 }
 0x1a9   : > { %2741 = vmatprep.mubr.bf16.mxu0 %v2453_v43  ;;  %v2454_v13 = vpack.c.bf16 %v2419_v44, %v2418_v12  ;;  %v2248_v20 = vadd.f32 %v4321_v35, %v4209_v15  ;;  %v3794_v12 = vunpack.c.h.bf16 %v3922_v59  ;;  %v5660_v35 = vpop.f32.mrf.mxu0  ;;  %v3923_v15 = vld [vmem:[%s5590_s21 + $0x28] sm:$0xff]  }
 0x1aa   : > { %v4323_v23 = vpop.f32.mrf.mxu1  ;;  %2742 = vmatmul.mubr.bf16.gmra.mxu0 %v6041_v2  ;;  %v3797_v62 = vunpack.c.l.bf16 %v3923_v15  ;;  %v6043_v2 = vpack.c.bf16 %v5447_v31, %v5443_v21  ;;  %v4227_v31 = vadd.f32 %v5571_v37, %v5566_v10 }
 0x1ab   : > { %v4324_v17 = vadd.f32 %v4323_v23, %v4322_v40  ;;  %4553 = vmatprep.mubr.bf16.mxu1 %v2454_v13  ;;  %v2420_v60 = vmul.f32 %v3789_v24, %v2248_v20  ;;  %v5663_v58 = vpop.f32.mrf.mxu0 }
 0x1ac   : > { %v4325_v19 = vpop.f32.mrf.mxu1 }
 0x1ad   : > { %v2251_v36 = vadd.f32 %v4324_v17, %v4212_v42  ;;  %v4224_v42 = vadd.f32 %v5564_v49, %v5559_v32 }
 0x1ae   : > { %v4326_v3 = vpop.f32.mrf.mxu1 }
 0x1af   : > { %v2421_v33 = vmul.f32 %v3790_v11, %v2251_v36  ;;  %v4327_v22 = vadd.f32 %v4326_v3, %v4325_v19  ;;  %v2456_v27 = vpack.c.bf16 %v2251_v36, %v2248_v20  ;;  %v3798_v11 = vunpack.c.h.bf16 %v3923_v15  ;;  %v5672_v36 = vpop.f32.mrf.mxu0  ;;  %v6046_v15 = vld [vmem:[#allocation20_spill] sm:$0xff] }
 0x1b0   : > { %v4328_v54 = vpop.f32.mrf.mxu1 }
 0x1b1   : > { %v2457_v55 = vpack.c.bf16 %v2421_v33, %v2420_v60  ;;  %2749 = vmatprep.mubr.bf16.mxu0 %v2456_v27  ;;  %v2256_v39 = vadd.f32 %v4327_v22, %v4215_v50  ;;  %v3924_v22 = vld [vmem:[%s5590_s21 + $0x30] sm:$0xff]   ;;  %v5675_v21 = vpop.f32.mrf.mxu0  ;;  %v6044_v50 = vpack.c.bf16 %v5457_v61, %v5453_v45  ;;  %v4233_v61 = vadd.f32 %v5595_v34, %v5583_v28 }
 0x1b2   : > { %v4329_v52 = vpop.f32.mrf.mxu1  ;;  %2750 = vmatmul.mubr.bf16.gmra.mxu0 %v6042_v57  ;;  %v3801_v49 = vunpack.c.l.bf16 %v3924_v22  ;;  %v3802_v57 = vunpack.c.h.bf16 %v3924_v22  ;;  %v6049_v22 = vld [vmem:[#allocation2_spill] sm:$0xff] }
 0x1b3   : > { %v4330_v47 = vadd.f32 %v4329_v52, %v4328_v54  ;;  %4554 = vmatmul.mubr.bf16.gmra.mxu1 %v2457_v55  ;;  %v2422_v63 = vmul.f32 %v3793_v51, %v2256_v39  ;;  %v4230_v55 = vadd.f32 %v5581_v1, %v5575_v16 }
 0x1b4   : > { %v4331_v44 = vpop.f32.mrf.mxu1 }
 0x1b5   : > { %v2259_v7 = vadd.f32 %v4330_v47, %v4218_v18 }
 0x1b6   : > { %v4332_v4 = vpop.f32.mrf.mxu1 }
 0x1b7   : > { %v2423_v43 = vmul.f32 %v3794_v12, %v2259_v7  ;;  %v4333_v40 = vadd.f32 %v4332_v4, %v4331_v44  ;;  %v2459_v13 = vpack.c.bf16 %v2259_v7, %v2256_v39  ;;  %v5684_v39 = vpop.f32.mrf.mxu0  ;;  %v3925_v7 = vld [vmem:[%s5590_s21 + $0x38] sm:$0xff]  }
 0x1b8   : > { %v4334_v24 = vpop.f32.mrf.mxu1  ;;  %v3805_v1 = vunpack.c.l.bf16 %v3925_v7 }
 0x1b9   : > { %2757 = vmatprep.mubr.bf16.mxu0 %v2459_v13  ;;  %v2460_v48 = vpack.c.bf16 %v2423_v43, %v2422_v63  ;;  %v2264_v20 = vadd.f32 %v4333_v40, %v4221_v6  ;;  %v5687_v45 = vpop.f32.mrf.mxu0  ;;  %v6045_v40 = vpack.c.bf16 %v5465_v26, %v5463_v9  ;;  %v6047_v13 = vld [vmem:[#allocation21_spill] sm:$0xff]  ;;  %v4239_v26 = vadd.f32 %v5610_v25, %v5608_v29 }
 0x1ba   : > { %v4335_v23 = vpop.f32.mrf.mxu1  ;;  %2758 = vmatmul.mubr.bf16.gmra.mxu0 %v6043_v2 }
 0x1bb   : > { %v4336_v17 = vadd.f32 %v4335_v23, %v4334_v24  ;;  %4557 = vmatprep.mubr.bf16.mxu1 %v2460_v48  ;;  %v2424_v3 = vmul.f32 %v3797_v62, %v2264_v20  ;;  %v4236_v24 = vadd.f32 %v6047_v13, %v6046_v15  ;;  %v3806_v62 = vunpack.c.h.bf16 %v3925_v7  ;;  %v5696_v2 = vpop.f32.mrf.mxu0  ;;  %v6052_v7 = vld [vmem:[#allocation4_spill] sm:$0xff] }
 0x1bc   : > { %v4337_v19 = vpop.f32.mrf.mxu1 }
 0x1bd   : > { %v2267_v8 = vadd.f32 %v4336_v17, %v4224_v42  ;;  %v5699_v9 = vpop.f32.mrf.mxu0 }
 0x1be   : > { %v4338_v30 = vpop.f32.mrf.mxu1 }
 0x1bf   : > { %v2425_v60 = vmul.f32 %v3798_v11, %v2267_v8  ;;  %v4339_v33 = vadd.f32 %v4338_v30, %v4337_v19  ;;  %v2462_v59 = vpack.c.bf16 %v2267_v8, %v2264_v20  ;;  %v3926_v11 = vld [vmem:[%s5590_s21 + $0x40] sm:$0xff]  }
 0x1c0   : > { %v4340_v27 = vpop.f32.mrf.mxu1 }
 0x1c1   : > { %v2463_v32 = vpack.c.bf16 %v2425_v60, %v2424_v3  ;;  %2765 = vmatprep.mubr.bf16.mxu0 %v2462_v59  ;;  %v2272_v51 = vadd.f32 %v4339_v33, %v4227_v31  ;;  %v3809_v3 = vunpack.c.l.bf16 %v3926_v11  ;;  %v6048_v33 = vld [vmem:[#allocation3_spill] sm:$0xff] }
 0x1c2   : > { %v4341_v54 = vpop.f32.mrf.mxu1  ;;  %2766 = vmatmul.mubr.bf16.gmra.mxu0 %v6044_v50  ;;  %v6050_v59 = vpack.c.bf16 %v6048_v33, %v6049_v22  ;;  %v5708_v50 = vpop.f32.mrf.mxu0 }
 0x1c3   : > { %v4342_v52 = vadd.f32 %v4341_v54, %v4340_v27  ;;  %4558 = vmatmul.mubr.bf16.gmra.mxu1 %v2463_v32  ;;  %v2426_v47 = vmul.f32 %v3801_v49, %v2272_v51  ;;  %v4242_v27 = vadd.f32 %v5617_v41, %v5613_v5  ;;  %v3810_v49 = vunpack.c.h.bf16 %v3926_v11 }
 0x1c4   : > { %v4343_v18 = vpop.f32.mrf.mxu1  ;;  %v4245_v5 = vadd.f32 %v5627_v56, %v5624_v53  ;;  %v4254_v11 = vadd.f32 %v5663_v58, %v5660_v35 }
 0x1c5   : > { %v2275_v37 = vadd.f32 %v4342_v52, %v4230_v55 }
 0x1c6   : > { %v4344_v10 = vpop.f32.mrf.mxu1 }
 0x1c7   : > { %v2427_v12 = vmul.f32 %v3802_v57, %v2275_v37  ;;  %v4345_v44 = vadd.f32 %v4344_v10, %v4343_v18  ;;  %v2465_v4 = vpack.c.bf16 %v2275_v37, %v2272_v51  ;;  %v3927_v57 = vld [vmem:[%s5590_s21 + $0x48] sm:$0xff]   ;;  %v5711_v10 = vpop.f32.mrf.mxu0 }
 0x1c8   : > { %v4346_v63 = vpop.f32.mrf.mxu1 }
 0x1c9   : > { %2773 = vmatprep.mubr.bf16.mxu0 %v2465_v4  ;;  %v2466_v16 = vpack.c.bf16 %v2427_v12, %v2426_v47  ;;  %v2280_v6 = vadd.f32 %v4345_v44, %v4233_v61  ;;  %v3813_v47 = vunpack.c.l.bf16 %v3927_v57  ;;  %v6051_v44 = vld [vmem:[#allocation5_spill] sm:$0xff] }
 0x1ca   : > { %v4347_v43 = vpop.f32.mrf.mxu1  ;;  %2774 = vmatmul.mubr.bf16.gmra.mxu0 %v6045_v40  ;;  %v6053_v4 = vpack.c.bf16 %v6051_v44, %v6052_v7  ;;  %v5720_v40 = vpop.f32.mrf.mxu0  ;;  %v3930_v44 = vld [vmem:[%s5590_s21 + $0x60] sm:$0xff]  }
 0x1cb   : > { %v4348_v48 = vadd.f32 %v4347_v43, %v4346_v63  ;;  %4561 = vmatprep.mubr.bf16.mxu1 %v2466_v16  ;;  %v2428_v42 = vmul.f32 %v3805_v1, %v2280_v6  ;;  %v4248_v63 = vadd.f32 %v5639_v14, %v5636_v46  ;;  %v3814_v1 = vunpack.c.h.bf16 %v3927_v57 }
 0x1cc   : > { %v4349_v23 = vpop.f32.mrf.mxu1  ;;  %v4251_v46 = vadd.f32 %v5651_v38, %v5648_v0 }
 0x1cd   : > { %v2283_v28 = vadd.f32 %v4348_v48, %v4236_v24 }
 0x1ce   : > { %v4350_v34 = vpop.f32.mrf.mxu1 }
 0x1cf   : > { %v2429_v20 = vmul.f32 %v3806_v62, %v2283_v28  ;;  %v4351_v17 = vadd.f32 %v4350_v34, %v4349_v23  ;;  %v2468_v19 = vpack.c.bf16 %v2283_v28, %v2280_v6  ;;  %v3928_v6 = vld [vmem:[%s5590_s21 + $0x50] sm:$0xff]   ;;  %v5723_v23 = vpop.f32.mrf.mxu0 }
 0x1d0   : > { %v4352_v8 = vpop.f32.mrf.mxu1  ;;  %v3817_v28 = vunpack.c.l.bf16 %v3928_v6 }
 0x1d1   : > { %v2469_v30 = vpack.c.bf16 %v2429_v20, %v2428_v42  ;;  %2781 = vmatprep.mubr.bf16.mxu0 %v2468_v19  ;;  %v2288_v31 = vadd.f32 %v4351_v17, %v4239_v26  ;;  %v6054_v42 = vld [vmem:[#allocation7_spill] sm:$0xff]  ;;  %v6055_v20 = vld [vmem:[#allocation6_spill] sm:$0xff]  ;;  %v3818_v26 = vunpack.c.h.bf16 %v3928_v6 }
 0x1d2   : > { %v4353_v60 = vpop.f32.mrf.mxu1  ;;  %2782 = vmatmul.mubr.bf16.gmra.mxu0 %v6050_v59  ;;  %v6056_v17 = vpack.c.bf16 %v6054_v42, %v6055_v20  ;;  %v3929_v59 = vld [vmem:[%s5590_s21 + $0x58] sm:$0xff]  }
 0x1d3   : > { %v4354_v32 = vadd.f32 %v4353_v60, %v4352_v8  ;;  %4562 = vmatmul.mubr.bf16.gmra.mxu1 %v2469_v30  ;;  %v2430_v55 = vmul.f32 %v3809_v3, %v2288_v31  ;;  %v4270_v3 = vpop.f32.mrf.mxu0  ;;  %v3821_v58 = vunpack.c.l.bf16 %v3929_v59 }
 0x1d4   : > { %v4355_v54 = vpop.f32.mrf.mxu1 }
 0x1d5   : > { %v2291_v25 = vadd.f32 %v4354_v32, %v4242_v27  ;;  %v4271_v32 = vpop.f32.mrf.mxu0 }
 0x1d6   : > { %v4356_v29 = vpop.f32.mrf.mxu1 }
 0x1d7   : > { %v2431_v51 = vmul.f32 %v3810_v49, %v2291_v25  ;;  %v4357_v52 = vadd.f32 %v4356_v29, %v4355_v54  ;;  %v2471_v18 = vpack.c.bf16 %v2291_v25, %v2288_v31  ;;  %v4257_v49 = vadd.f32 %v5675_v21, %v5672_v36  ;;  %v6057_v25 = vld [vmem:[#allocation9_spill] sm:$0xff]  ;;  %v6058_v29 = vld [vmem:[#allocation8_spill] sm:$0xff] }
 0x1d8   : > { %v4358_v37 = vpop.f32.mrf.mxu1 }
 0x1d9   : > { %2789 = vmatprep.mubr.bf16.mxu0 %v2471_v18  ;;  %v2472_v41 = vpack.c.bf16 %v2431_v51, %v2430_v55  ;;  %v2296_v61 = vadd.f32 %v4357_v52, %v4245_v5  ;;  %v6059_v55 = vpack.c.bf16 %v6057_v25, %v6058_v29  ;;  %v4260_v51 = vadd.f32 %v5687_v45, %v5684_v39  ;;  %v4273_v5 = vpop.f32.mrf.mxu0 }
 0x1da   : > { %v4359_v12 = vpop.f32.mrf.mxu1  ;;  %2790 = vmatmul.mubr.bf16.gmra.mxu0 %v6053_v4  ;;  %v3822_v18 = vunpack.c.h.bf16 %v3929_v59  ;;  %v3825_v39 = vunpack.c.l.bf16 %v3930_v44 }
 0x1db   : > { %v4360_v16 = vadd.f32 %v4359_v12, %v4358_v37  ;;  %4565 = vmatprep.mubr.bf16.mxu1 %v2472_v41  ;;  %v2432_v15 = vmul.f32 %v3813_v47, %v2296_v61 }
 0x1dc   : > { %v4361_v43 = vpop.f32.mrf.mxu1 }
 0x1dd   : > { %v2299_v53 = vadd.f32 %v4360_v16, %v4248_v63  ;;  %v4274_v63 = vpop.f32.mrf.mxu0 }
 0x1de   : > { %v4362_v56 = vpop.f32.mrf.mxu1  ;;  %v4275_v25 = vadd.f32 %v4274_v63, %v4273_v5 }
 0x1df   : > { %v2433_v13 = vmul.f32 %v3814_v1, %v2299_v53  ;;  %v4363_v24 = vadd.f32 %v4362_v56, %v4361_v43  ;;  %v2474_v48 = vpack.c.bf16 %v2299_v53, %v2296_v61  ;;  %v4263_v61 = vadd.f32 %v5699_v9, %v5696_v2  ;;  %v6060_v1 = vld [vmem:[#allocation11_spill] sm:$0xff]  ;;  %v6061_v43 = vld [vmem:[#allocation10_spill] sm:$0xff] }
 0x1e0   : > { %v4364_v62 = vpop.f32.mrf.mxu1  ;;  %v6062_v53 = vpack.c.bf16 %v6060_v1, %v6061_v43  ;;  %v4266_v56 = vadd.f32 %v5711_v10, %v5708_v50 }
 0x1e1   : > { %v2475_v14 = vpack.c.bf16 %v2433_v13, %v2432_v15  ;;  %2797 = vmatprep.mubr.bf16.mxu0 %v2474_v48  ;;  %v2304_v19 = vadd.f32 %v4363_v24, %v4251_v46  ;;  %v3826_v24 = vunpack.c.h.bf16 %v3930_v44  ;;  %v4276_v48 = vpop.f32.mrf.mxu0 }
 0x1e2   : > { %v4365_v34 = vpop.f32.mrf.mxu1  ;;  %2798 = vmatmul.mubr.bf16.gmra.mxu0 %v6056_v17  ;;  %v4269_v17 = vadd.f32 %v5723_v23, %v5720_v40 }
 0x1e3   : > { %v4366_v8 = vadd.f32 %v4365_v34, %v4364_v62  ;;  %4566 = vmatmul.mubr.bf16.gmra.mxu1 %v2475_v14  ;;  %v2434_v38 = vmul.f32 %v3817_v28, %v2304_v19  ;;  %v3931_v28 = vld [vmem:[%s5590_s21 + $0x68] sm:$0xff]   ;;  %v4277_v20 = vpop.f32.mrf.mxu0 }
 0x1e4   : > { %v4367_v30 = vpop.f32.mrf.mxu1  ;;  %v3829_v10 = vunpack.c.l.bf16 %v3931_v28 }
 0x1e5   : > { %v2307_v60 = vadd.f32 %v4366_v8, %v4254_v11  ;;  %v6064_v8 = vld [vmem:[#allocation12_spill] sm:$0xff] }
 0x1e6   : > { %v4368_v0 = vpop.f32.mrf.mxu1 }
 0x1e7   : > { %v2435_v33 = vmul.f32 %v3818_v26, %v2307_v60  ;;  %v4369_v22 = vadd.f32 %v4368_v0, %v4367_v30  ;;  %v2477_v27 = vpack.c.bf16 %v2307_v60, %v2304_v19  ;;  %v6063_v19 = vld [vmem:[#allocation13_spill] sm:$0xff]  ;;  %v4272_v30 = vadd.f32 %v4271_v32, %v4270_v3 }
 0x1e8   : > { %v4370_v31 = vpop.f32.mrf.mxu1  ;;  %v6065_v26 = vpack.c.bf16 %v6063_v19, %v6064_v8  ;;  %v5776_v19 = vld [vmem:[%s5997_s6] ss:$0 sm:$0xff] }
 0x1e9   : > { %2805 = vmatprep.mubr.bf16.mxu0 %v2477_v27  ;;  %v2478_v35 = vpack.c.bf16 %v2435_v33, %v2434_v38  ;;  %v2312_v52 = vadd.f32 %v4369_v22, %v4257_v49  ;;  %v3830_v38 = vunpack.c.h.bf16 %v3931_v28  ;;  %v4279_v22 = vpop.f32.mrf.mxu0  ;;  %v3932_v49 = vld [vmem:[%s5590_s21 + $0x70] sm:$0xff]   ;;  %v6072_v28 = vld [vmem:[#allocation19_spill] sm:$0xff] }
 0x1ea   : > { %v4371_v54 = vpop.f32.mrf.mxu1  ;;  %2806 = vmatmul.mubr.bf16.gmra.mxu0 %v6059_v55  ;;  %v3833_v3 = vunpack.c.l.bf16 %v3932_v49  ;;  %v6066_v55 = vld [vmem:[#allocation15_spill] sm:$0xff] }
 0x1eb   : > { %v4372_v57 = vadd.f32 %v4371_v54, %v4370_v31  ;;  %4569 = vmatprep.mubr.bf16.mxu1 %v2478_v35  ;;  %v2436_v21 = vmul.f32 %v3821_v58, %v2312_v52  ;;  %v4280_v54 = vpop.f32.mrf.mxu0 }
 0x1ec   : > { %v4373_v37 = vpop.f32.mrf.mxu1 }
 0x1ed   : > { %v2315_v41 = vadd.f32 %v4372_v57, %v4260_v51  ;;  %v6067_v51 = vld [vmem:[#allocation14_spill] sm:$0xff]  ;;  %v4278_v57 = vadd.f32 %v4277_v20, %v4276_v48 }
 0x1ee   : > { %v4374_v36 = vpop.f32.mrf.mxu1 }
 0x1ef   : > { %v2437_v47 = vmul.f32 %v3822_v18, %v2315_v41  ;;  %v4375_v12 = vadd.f32 %v4374_v36, %v4373_v37  ;;  %v2480_v7 = vpack.c.bf16 %v2315_v41, %v2312_v52  ;;  %v6068_v52 = vpack.c.bf16 %v6066_v55, %v6067_v51  ;;  %v4282_v36 = vpop.f32.mrf.mxu0  ;;  %v5814_v55 = vld [vmem:[%s5771_s28 + $0x78] sm:$0xff]  ;;  %v5817_v51 = vld [vmem:[%s5771_s28 + $0x68] sm:$0xff] }
 0x1f0   : > { %v4376_v4 = vpop.f32.mrf.mxu1  ;;  %v3834_v41 = vunpack.c.h.bf16 %v3932_v49  ;;  %v5790_v49 = vld [vmem:[%s5771_s28 + $0x38] sm:$0xff] }
 0x1f1   : > { %v2481_v16 = vpack.c.bf16 %v2437_v47, %v2436_v21  ;;  %2813 = vmatprep.mubr.bf16.mxu0 %v2480_v7  ;;  %v2320_v15 = vadd.f32 %v4375_v12, %v4263_v61  ;;  %v4283_v61 = vpop.f32.mrf.mxu0 }
 0x1f2   : > { %v4377_v45 = vpop.f32.mrf.mxu1  ;;  %2814 = vmatmul.mubr.bf16.gmra.mxu0 %v6062_v53  ;;  %v6069_v53 = vld [vmem:[#allocation17_spill] sm:$0xff] }
 0x1f3   : > { %v4378_v13 = vadd.f32 %v4377_v45, %v4376_v4  ;;  %4570 = vmatmul.mubr.bf16.gmra.mxu1 %v2481_v16  ;;  %v2438_v9 = vmul.f32 %v3825_v39, %v2320_v15  ;;  %v3933_v4 = vld [vmem:[%s5590_s21 + $0x78] sm:$0xff]   ;;  %v4281_v39 = vadd.f32 %v4280_v54, %v4279_v22  ;;  %v3017_v22 = vld [vmem:[%s5771_s28 + $0x10] sm:$0xff]  ;;  %v5799_v54 = vld [vmem:[%s5771_s28 + $0x40] sm:$0xff] }
 0x1f4   : > { %v4379_v6 = vpop.f32.mrf.mxu1  ;;  %v3837_v1 = vunpack.c.l.bf16 %v3933_v4  ;;  %v3838_v48 = vunpack.c.h.bf16 %v3933_v4  ;;  %v5850_v4 = vld [vmem:[%s5771_s28 + $0xd8] sm:$0xff] }
 0x1f5   : > { %v2323_v62 = vadd.f32 %v4378_v13, %v4266_v56  ;;  %v6070_v56 = vld [vmem:[#allocation16_spill] sm:$0xff]  ;;  %v4284_v13 = vadd.f32 %v4283_v61, %v4282_v36  ;;  %v5835_v36 = vld [vmem:[%s5771_s28 + $0xa0] sm:$0xff] }
 0x1f6   : > { %v4380_v2 = vpop.f32.mrf.mxu1  ;;  %v5856_v61 = vld [vmem:[%s5771_s28 + $0xf0] sm:$0xff] }
 0x1f7   : > { %v2439_v46 = vmul.f32 %v3826_v24, %v2323_v62  ;;  %v4381_v14 = vadd.f32 %v4380_v2, %v4379_v6  ;;  %v2483_v34 = vpack.c.bf16 %v2323_v62, %v2320_v15  ;;  %v6071_v15 = vpack.c.bf16 %v6069_v53, %v6070_v56 }
 0x1f8   : > { %v4382_v42 = vpop.f32.mrf.mxu1 }
 0x1f9   : > { %2821 = vmatprep.mubr.bf16.mxu0 %v2483_v34  ;;  %v2484_v50 = vpack.c.bf16 %v2439_v46, %v2438_v9  ;;  %v2328_v60 = vadd.f32 %v4381_v14, %v4269_v17  ;;  %v6073_v34 = vld [vmem:[#allocation18_spill] sm:$0xff] }
 0x1fa   : > { %v4383_v11 = vpop.f32.mrf.mxu1  ;;  %2822 = vmatmul.mubr.bf16.gmra.mxu0 %v6065_v26 }
 0x1fb   : > { %v4384_v0 = vadd.f32 %v4383_v11, %v4382_v42  ;;  %4573 = vmatprep.mubr.bf16.mxu1 %v2484_v50  ;;  %v2440_v31 = vmul.f32 %v3829_v10, %v2328_v60  ;;  %v6074_v42 = vpack.c.bf16 %v6072_v28, %v6073_v34 }
 0x1fc   : > { %v4385_v33 = vpop.f32.mrf.mxu1 }
 0x1fd   : > { %v2331_v59 = vadd.f32 %v4384_v0, %v4272_v30 }
 0x1fe   : > { %v4386_v27 = vpop.f32.mrf.mxu1 }
 0x1ff   : > { %v2441_v40 = vmul.f32 %v3830_v38, %v2331_v59  ;;  %v4387_v23 = vadd.f32 %v4386_v27, %v4385_v33  ;;  %v2486_v35 = vpack.c.bf16 %v2331_v59, %v2328_v60  ;;  %v3015_v38 = vld [vmem:[%s5771_s28] sm:$0xff]  ;;  %v3018_v27 = vld [vmem:[%s5771_s28 + $0x18] sm:$0xff] }
 0x200   : > { %v4388_v58 = vpop.f32.mrf.mxu1 }
 0x201   : > { %v2487_v29 = vpack.c.bf16 %v2441_v40, %v2440_v31  ;;  %2829 = vmatprep.mubr.bf16.mxu0 %v2486_v35  ;;  %v2336_v18 = vadd.f32 %v4387_v23, %v4275_v25  ;;  %v3016_v31 = vld [vmem:[%s5771_s28 + $0x8] sm:$0xff]  ;;  %v5784_v40 = vld [vmem:[%s5771_s28 + $0x30] sm:$0xff]  ;;  %v5787_v23 = vld [vmem:[%s5771_s28 + $0x20] sm:$0xff] }
 0x202   : > { %v4389_v32 = vpop.f32.mrf.mxu1  ;;  %2830 = vmatmul.mubr.bf16.gmra.mxu0 %v6068_v52  ;;  %v5793_v35 = vld [vmem:[%s5771_s28 + $0x28] sm:$0xff]  ;;  %v5802_v25 = vld [vmem:[%s5771_s28 + $0x58] sm:$0xff]  ;;  %v5820_v52 = vld [vmem:[%s5771_s28 + $0x90] sm:$0xff] }
 0x203   : > { %v4390_v37 = vadd.f32 %v4389_v32, %v4388_v58  ;;  %4574 = vmatmul.mubr.bf16.gmra.mxu1 %v2487_v29  ;;  %v2442_v44 = vmul.f32 %v3833_v3, %v2336_v18  ;;  %v5796_v58 = vld [vmem:[%s5771_s28 + $0x50] sm:$0xff]  ;;  %v5805_v29 = vld [vmem:[%s5771_s28 + $0x48] sm:$0xff]  ;;  %v5811_v32 = vld [vmem:[%s5771_s28 + $0x60] sm:$0xff] }
 0x204   : > { %v4391_v21 = vpop.f32.mrf.mxu1  ;;  %v5808_v3 = vld [vmem:[%s5771_s28 + $0x70] sm:$0xff] }
 0x205   : > { %v2339_v47 = vadd.f32 %v4390_v37, %v4278_v57  ;;  %v5823_v57 = vld [vmem:[%s5771_s28 + $0x80] sm:$0xff]  ;;  %v5829_v37 = vld [vmem:[%s5771_s28 + $0x88] sm:$0xff] }
 0x206   : > { %v4392_v12 = vpop.f32.mrf.mxu1 }
 0x207   : > { %v2443_v5 = vmul.f32 %v3834_v41, %v2339_v47  ;;  %v4393_v7 = vadd.f32 %v4392_v12, %v4391_v21  ;;  %v2489_v63 = vpack.c.bf16 %v2339_v47, %v2336_v18  ;;  %v5826_v18 = vld [vmem:[%s5771_s28 + $0x98] sm:$0xff]  ;;  %v5832_v41 = vld [vmem:[%s5771_s28 + $0xb0] sm:$0xff]  ;;  %v5841_v47 = vld [vmem:[%s5771_s28 + $0xa8] sm:$0xff] }
 0x208   : > { %v4394_v16 = vpop.f32.mrf.mxu1  ;;  %v5838_v21 = vld [vmem:[%s5771_s28 + $0xb8] sm:$0xff]  ;;  %v5844_v12 = vld [vmem:[%s5771_s28 + $0xd0] sm:$0xff] }
 0x209   : > { %2837 = vmatprep.mubr.bf16.mxu0 %v2489_v63  ;;  %v2490_v45 = vpack.c.bf16 %v2443_v5, %v2442_v44  ;;  %v2344_v24 = vadd.f32 %v4393_v7, %v4281_v39  ;;  %v5847_v44 = vld [vmem:[%s5771_s28 + $0xc0] sm:$0xff]  ;;  %v5853_v63 = vld [vmem:[%s5771_s28 + $0xc8] sm:$0xff] }
 0x20a   : > { %v4395_v43 = vpop.f32.mrf.mxu1  ;;  %2838 = vmatmul.mubr.bf16.gmra.mxu0 %v6071_v15 }
 0x20b   : > { %v4396_v6 = vadd.f32 %v4395_v43, %v4394_v16  ;;  %4577 = vmatprep.mubr.bf16.mxu1 %v2490_v45  ;;  %v2444_v2 = vmul.f32 %v3837_v1, %v2344_v24  ;;  %v5867_v45 = vld [vmem:[%s5771_s28 + $0xe0] sm:$0xff]  ;;  %v5870_v1 = vld [vmem:[%s5771_s28 + $0xf8] sm:$0xff]  ;;  %v5873_v43 = vld [vmem:[%s5771_s28 + $0xe8] sm:$0xff] }
 0x20d   : > { %v2347_v62 = vadd.f32 %v4396_v6, %v4284_v13 }
 0x20f   : > { %v2445_v9 = vmul.f32 %v3838_v48, %v2347_v62  ;;  %v2492_v46 = vpack.c.bf16 %v2347_v62, %v2344_v24 }
 0x211   : > { %v2493_v14 = vpack.c.bf16 %v2445_v9, %v2444_v2  ;;  %2845 = vmatprep.mubr.bf16.mxu0 %v2492_v46 }
 0x212   : > { %2846 = vmatmul.mubr.bf16.gmra.mxu0 %v6074_v42 }
 0x213   : > { %4578 = vmatmul.mubr.bf16.gmra.mxu1 %v2493_v14 }
 0x25a   : > { %v4413_v20 = vpop.f32.mrf.mxu0 }
 0x25c   : > { %v4414_v17 = vpop.f32.mrf.mxu0 }
 0x25d   : > { %v4415_v10 = vadd.f32 %v4414_v17, %v4413_v20 }
 0x25e   : > { %v4416_v50 = vpop.f32.mrf.mxu0 }
 0x25f   : > { %v2728_v0 = vadd.f32 %v4415_v10, %v5776_v19 }
 0x260   : > { %v4417_v11 = vpop.f32.mrf.mxu0 }
 0x261   : > { %v4418_v30 = vadd.f32 %v4417_v11, %v4416_v50 }
 0x262   : > { %v4419_v8 = vpop.f32.mrf.mxu0 }
 0x263   : > { %v4551_v26 = vpop.f32.mrf.mxu1  ;;  %v2731_v15 = vadd.f32 %v4418_v30, %v5776_v19 }
 0x264   : > { %v4420_v60 = vpop.f32.mrf.mxu0 }
 0x265   : > { %v4421_v33 = vadd.f32 %v4420_v60, %v4419_v8  ;;  %v2888_v59 = vpop.f32.mrf.mxu1 }
 0x266   : > { %v2889_v5 = vadd.f32 %v2888_v59, %v2728_v0  ;;  %v4422_v7 = vpop.f32.mrf.mxu0 }
 0x267   : > { %v2736_v16 = vadd.f32 %v4421_v33, %v5776_v19  ;;  %v4552_v39 = vpop.f32.mrf.mxu1 }
 0x268   : > { %v3047_v53 = vadd.f32 %v3015_v38, %v2889_v5  ;;  %v4423_v56 = vpop.f32.mrf.mxu0 }
 0x269   : > { %v2897_v13 = vadd.f32 %v4551_v26, %v2736_v16  ;;  %v4424_v24 = vadd.f32 %v4423_v56, %v4422_v7  ;;  %v2891_v6 = vpop.f32.mrf.mxu1 }
 0x26a   : > { %v2892_v48 = vadd.f32 %v2891_v6, %v2731_v15  ;;  %v4425_v62 = vpop.f32.mrf.mxu0  ;;  %3079 = vst [vmem:[%s5863_s11] sm:$0xff] %v3047_v53 }
 0x26b   : > { %v3049_v2 = vadd.f32 %v3017_v22, %v2897_v13  ;;  %v2739_v9 = vadd.f32 %v4424_v24, %v5776_v19 }
 0x26c   : > { %v3048_v46 = vadd.f32 %v3016_v31, %v2892_v48  ;;  %v3842_v14 = vpack.c.bf16 %v2892_v48, %v2889_v5  ;;  %v4426_v28 = vpop.f32.mrf.mxu0 }
 0x26d   : > { %v2900_v34 = vadd.f32 %v4552_v39, %v2739_v9  ;;  %3081 = vst [vmem:[%s5863_s11 + $0x10] sm:$0xff] %v3049_v2  ;;  %v4427_v50 = vadd.f32 %v4426_v28, %v4425_v62 }
 0x26e   : > { %3843 = vst [vmem:[%s5882_s16] sm:$0xff] %v3842_v14   ;;  %v4428_v42 = vpop.f32.mrf.mxu0  ;;  %3080 = vst [vmem:[%s5863_s11 + $0x8] sm:$0xff] %v3048_v46 }
 0x26f   : > { %v3050_v20 = vadd.f32 %v3018_v27, %v2900_v34  ;;  %v3847_v17 = vpack.c.bf16 %v2900_v34, %v2897_v13  ;;  %v2744_v60 = vadd.f32 %v4427_v50, %v5776_v19 }
 0x270   : > { %v4429_v10 = vpop.f32.mrf.mxu0 }
 0x271   : > { %3934 = vst [vmem:[%s5882_s16 + $0x8] sm:$0xff] %v3847_v17   ;;  %3082 = vst [vmem:[%s5863_s11 + $0x18] sm:$0xff] %v3050_v20  ;;  %v4430_v26 = vadd.f32 %v4429_v10, %v4428_v42 }
 0x272   : > { %v4431_v11 = vpop.f32.mrf.mxu0 }
 0x273   : > { %v4555_v8 = vpop.f32.mrf.mxu1  ;;  %v2747_v7 = vadd.f32 %v4430_v26, %v5776_v19 }
 0x274   : > { %v4432_v30 = vpop.f32.mrf.mxu0 }
 0x275   : > { %v4433_v0 = vadd.f32 %v4432_v30, %v4431_v11  ;;  %v2904_v38 = vpop.f32.mrf.mxu1 }
 0x276   : > { %v2905_v33 = vadd.f32 %v2904_v38, %v2744_v60  ;;  %v4434_v22 = vpop.f32.mrf.mxu0 }
 0x277   : > { %v2752_v59 = vadd.f32 %v4433_v0, %v5776_v19  ;;  %v4556_v31 = vpop.f32.mrf.mxu1 }
 0x278   : > { %v3051_v27 = vadd.f32 %v5787_v23, %v2905_v33  ;;  %v4435_v5 = vpop.f32.mrf.mxu0 }
 0x279   : > { %v2913_v16 = vadd.f32 %v4555_v8, %v2752_v59  ;;  %v4436_v39 = vadd.f32 %v4435_v5, %v4434_v22  ;;  %v2907_v53 = vpop.f32.mrf.mxu1 }
 0x27a   : > { %v2908_v56 = vadd.f32 %v2907_v53, %v2747_v7  ;;  %v4437_v15 = vpop.f32.mrf.mxu0  ;;  %3083 = vst [vmem:[%s5863_s11 + $0x20] sm:$0xff] %v3051_v27 }
 0x27b   : > { %v3053_v13 = vadd.f32 %v5784_v40, %v2913_v16  ;;  %v2755_v24 = vadd.f32 %v4436_v39, %v5776_v19 }
 0x27c   : > { %v3052_v6 = vadd.f32 %v5793_v35, %v2908_v56  ;;  %v3852_v23 = vpack.c.bf16 %v2908_v56, %v2905_v33  ;;  %v4438_v48 = vpop.f32.mrf.mxu0 }
 0x27d   : > { %v2916_v62 = vadd.f32 %v4556_v31, %v2755_v24  ;;  %3085 = vst [vmem:[%s5863_s11 + $0x30] sm:$0xff] %v3053_v13  ;;  %v4439_v14 = vadd.f32 %v4438_v48, %v4437_v15 }
 0x27e   : > { %3935 = vst [vmem:[%s5882_s16 + $0x10] sm:$0xff] %v3852_v23   ;;  %v4440_v2 = vpop.f32.mrf.mxu0  ;;  %3084 = vst [vmem:[%s5863_s11 + $0x28] sm:$0xff] %v3052_v6 }
 0x27f   : > { %v3054_v9 = vadd.f32 %v5790_v49, %v2916_v62  ;;  %v3857_v46 = vpack.c.bf16 %v2916_v62, %v2913_v16  ;;  %v2760_v35 = vadd.f32 %v4439_v14, %v5776_v19 }
 0x280   : > { %v4441_v28 = vpop.f32.mrf.mxu0 }
 0x281   : > { %3936 = vst [vmem:[%s5882_s16 + $0x18] sm:$0xff] %v3857_v46   ;;  %3086 = vst [vmem:[%s5863_s11 + $0x38] sm:$0xff] %v3054_v9  ;;  %v4442_v42 = vadd.f32 %v4441_v28, %v4440_v2 }
 0x282   : > { %v4443_v34 = vpop.f32.mrf.mxu0 }
 0x283   : > { %v4559_v40 = vpop.f32.mrf.mxu1  ;;  %v2763_v60 = vadd.f32 %v4442_v42, %v5776_v19 }
 0x284   : > { %v4444_v20 = vpop.f32.mrf.mxu0 }
 0x285   : > { %v4445_v17 = vadd.f32 %v4444_v20, %v4443_v34  ;;  %v2920_v50 = vpop.f32.mrf.mxu1 }
 0x286   : > { %v2921_v10 = vadd.f32 %v2920_v50, %v2760_v35  ;;  %v4446_v11 = vpop.f32.mrf.mxu0 }
 0x287   : > { %v2768_v8 = vadd.f32 %v4445_v17, %v5776_v19  ;;  %v4560_v26 = vpop.f32.mrf.mxu1 }
 0x288   : > { %v3055_v49 = vadd.f32 %v5799_v54, %v2921_v10  ;;  %v4447_v30 = vpop.f32.mrf.mxu0 }
 0x289   : > { %v2929_v0 = vadd.f32 %v4559_v40, %v2768_v8  ;;  %v4448_v38 = vadd.f32 %v4447_v30, %v4446_v11  ;;  %v2923_v33 = vpop.f32.mrf.mxu1 }
 0x28a   : > { %v2924_v22 = vadd.f32 %v2923_v33, %v2763_v60  ;;  %v4449_v59 = vpop.f32.mrf.mxu0  ;;  %3087 = vst [vmem:[%s5863_s11 + $0x40] sm:$0xff] %v3055_v49 }
 0x28b   : > { %v3057_v31 = vadd.f32 %v5796_v58, %v2929_v0  ;;  %v2771_v27 = vadd.f32 %v4448_v38, %v5776_v19 }
 0x28c   : > { %v3056_v5 = vadd.f32 %v5805_v29, %v2924_v22  ;;  %v3862_v54 = vpack.c.bf16 %v2924_v22, %v2921_v10  ;;  %v4450_v7 = vpop.f32.mrf.mxu0 }
 0x28d   : > { %v2932_v16 = vadd.f32 %v4560_v26, %v2771_v27  ;;  %3089 = vst [vmem:[%s5863_s11 + $0x50] sm:$0xff] %v3057_v31  ;;  %v4451_v15 = vadd.f32 %v4450_v7, %v4449_v59 }
 0x28e   : > { %3937 = vst [vmem:[%s5882_s16 + $0x20] sm:$0xff] %v3862_v54   ;;  %v4452_v39 = vpop.f32.mrf.mxu0  ;;  %3088 = vst [vmem:[%s5863_s11 + $0x48] sm:$0xff] %v3056_v5 }
 0x28f   : > { %v3058_v53 = vadd.f32 %v5802_v25, %v2932_v16  ;;  %v3867_v56 = vpack.c.bf16 %v2932_v16, %v2929_v0  ;;  %v2776_v29 = vadd.f32 %v4451_v15, %v5776_v19 }
 0x290   : > { %v4453_v13 = vpop.f32.mrf.mxu0 }
 0x291   : > { %3938 = vst [vmem:[%s5882_s16 + $0x28] sm:$0xff] %v3867_v56   ;;  %3090 = vst [vmem:[%s5863_s11 + $0x58] sm:$0xff] %v3058_v53  ;;  %v4454_v6 = vadd.f32 %v4453_v13, %v4452_v39 }
 0x292   : > { %v4455_v24 = vpop.f32.mrf.mxu0 }
 0x293   : > { %v4563_v58 = vpop.f32.mrf.mxu1  ;;  %v2779_v34 = vadd.f32 %v4454_v6, %v5776_v19 }
 0x294   : > { %v4456_v23 = vpop.f32.mrf.mxu0 }
 0x295   : > { %v4457_v48 = vadd.f32 %v4456_v23, %v4455_v24  ;;  %v2936_v62 = vpop.f32.mrf.mxu1 }
 0x296   : > { %v2937_v2 = vadd.f32 %v2936_v62, %v2776_v29  ;;  %v4458_v9 = vpop.f32.mrf.mxu0 }
 0x297   : > { %v2784_v46 = vadd.f32 %v4457_v48, %v5776_v19  ;;  %v4564_v14 = vpop.f32.mrf.mxu1 }
 0x298   : > { %v3059_v25 = vadd.f32 %v5811_v32, %v2937_v2  ;;  %v4459_v28 = vpop.f32.mrf.mxu0 }
 0x299   : > { %v2945_v40 = vadd.f32 %v4563_v58, %v2784_v46  ;;  %v4460_v42 = vadd.f32 %v4459_v28, %v4458_v9  ;;  %v2939_v20 = vpop.f32.mrf.mxu1 }
 0x29a   : > { %v2940_v35 = vadd.f32 %v2939_v20, %v2779_v34  ;;  %v4461_v17 = vpop.f32.mrf.mxu0  ;;  %3091 = vst [vmem:[%s5863_s11 + $0x60] sm:$0xff] %v3059_v25 }
 0x29b   : > { %v3061_v50 = vadd.f32 %v5808_v3, %v2945_v40  ;;  %v2787_v10 = vadd.f32 %v4460_v42, %v5776_v19 }
 0x29c   : > { %v3060_v11 = vadd.f32 %v5817_v51, %v2940_v35  ;;  %v3872_v32 = vpack.c.bf16 %v2940_v35, %v2937_v2  ;;  %v4462_v8 = vpop.f32.mrf.mxu0 }
 0x29d   : > { %v2948_v26 = vadd.f32 %v4564_v14, %v2787_v10  ;;  %3093 = vst [vmem:[%s5863_s11 + $0x70] sm:$0xff] %v3061_v50  ;;  %v4463_v0 = vadd.f32 %v4462_v8, %v4461_v17 }
 0x29e   : > { %3939 = vst [vmem:[%s5882_s16 + $0x30] sm:$0xff] %v3872_v32   ;;  %v4464_v49 = vpop.f32.mrf.mxu0  ;;  %3092 = vst [vmem:[%s5863_s11 + $0x68] sm:$0xff] %v3060_v11 }
 0x29f   : > { %v3062_v30 = vadd.f32 %v5814_v55, %v2948_v26  ;;  %v3877_v60 = vpack.c.bf16 %v2948_v26, %v2945_v40  ;;  %v2792_v51 = vadd.f32 %v4463_v0, %v5776_v19 }
 0x2a0   : > { %v4465_v38 = vpop.f32.mrf.mxu0 }
 0x2a1   : > { %3940 = vst [vmem:[%s5882_s16 + $0x38] sm:$0xff] %v3877_v60   ;;  %3094 = vst [vmem:[%s5863_s11 + $0x78] sm:$0xff] %v3062_v30  ;;  %v4466_v22 = vadd.f32 %v4465_v38, %v4464_v49 }
 0x2a2   : > { %v4467_v33 = vpop.f32.mrf.mxu0 }
 0x2a3   : > { %v4567_v3 = vpop.f32.mrf.mxu1  ;;  %v2795_v53 = vadd.f32 %v4466_v22, %v5776_v19 }
 0x2a4   : > { %v4468_v59 = vpop.f32.mrf.mxu0 }
 0x2a5   : > { %v4469_v31 = vadd.f32 %v4468_v59, %v4467_v33  ;;  %v2952_v27 = vpop.f32.mrf.mxu1 }
 0x2a6   : > { %v2953_v5 = vadd.f32 %v2952_v27, %v2792_v51  ;;  %v4470_v54 = vpop.f32.mrf.mxu0 }
 0x2a7   : > { %v2800_v7 = vadd.f32 %v4469_v31, %v5776_v19  ;;  %v4568_v16 = vpop.f32.mrf.mxu1 }
 0x2a8   : > { %v3063_v55 = vadd.f32 %v5823_v57, %v2953_v5  ;;  %v4471_v39 = vpop.f32.mrf.mxu0 }
 0x2a9   : > { %v2961_v56 = vadd.f32 %v4567_v3, %v2800_v7  ;;  %v4472_v15 = vadd.f32 %v4471_v39, %v4470_v54  ;;  %v2955_v13 = vpop.f32.mrf.mxu1 }
 0x2aa   : > { %v2956_v24 = vadd.f32 %v2955_v13, %v2795_v53  ;;  %v4473_v58 = vpop.f32.mrf.mxu0  ;;  %3095 = vst [vmem:[%s5863_s11 + $0x80] sm:$0xff] %v3063_v55 }
 0x2ab   : > { %v3065_v6 = vadd.f32 %v5820_v52, %v2961_v56  ;;  %v2803_v23 = vadd.f32 %v4472_v15, %v5776_v19 }
 0x2ac   : > { %v3064_v29 = vadd.f32 %v5829_v37, %v2956_v24  ;;  %v3882_v57 = vpack.c.bf16 %v2956_v24, %v2953_v5  ;;  %v4474_v48 = vpop.f32.mrf.mxu0 }
 0x2ad   : > { %v2964_v62 = vadd.f32 %v4568_v16, %v2803_v23  ;;  %3097 = vst [vmem:[%s5863_s11 + $0x90] sm:$0xff] %v3065_v6  ;;  %v4475_v14 = vadd.f32 %v4474_v48, %v4473_v58 }
 0x2ae   : > { %3941 = vst [vmem:[%s5882_s16 + $0x40] sm:$0xff] %v3882_v57   ;;  %v4476_v2 = vpop.f32.mrf.mxu0  ;;  %3096 = vst [vmem:[%s5863_s11 + $0x88] sm:$0xff] %v3064_v29 }
 0x2af   : > { %v3066_v9 = vadd.f32 %v5826_v18, %v2964_v62  ;;  %v3887_v46 = vpack.c.bf16 %v2964_v62, %v2961_v56  ;;  %v2808_v37 = vadd.f32 %v4475_v14, %v5776_v19 }
 0x2b0   : > { %v4477_v25 = vpop.f32.mrf.mxu0 }
 0x2b1   : > { %3942 = vst [vmem:[%s5882_s16 + $0x48] sm:$0xff] %v3887_v46   ;;  %3098 = vst [vmem:[%s5863_s11 + $0x98] sm:$0xff] %v3066_v9  ;;  %v4478_v34 = vadd.f32 %v4477_v25, %v4476_v2 }
 0x2b2   : > { %v4479_v28 = vpop.f32.mrf.mxu0 }
 0x2b3   : > { %v4571_v52 = vpop.f32.mrf.mxu1  ;;  %v2811_v32 = vadd.f32 %v4478_v34, %v5776_v19 }
 0x2b4   : > { %v4480_v40 = vpop.f32.mrf.mxu0 }
 0x2b5   : > { %v4481_v42 = vadd.f32 %v4480_v40, %v4479_v28  ;;  %v2968_v20 = vpop.f32.mrf.mxu1 }
 0x2b6   : > { %v2969_v35 = vadd.f32 %v2968_v20, %v2808_v37  ;;  %v4482_v17 = vpop.f32.mrf.mxu0 }
 0x2b7   : > { %v2816_v50 = vadd.f32 %v4481_v42, %v5776_v19  ;;  %v4572_v10 = vpop.f32.mrf.mxu1 }
 0x2b8   : > { %v3067_v18 = vadd.f32 %v5835_v36, %v2969_v35  ;;  %v4483_v11 = vpop.f32.mrf.mxu0 }
 0x2b9   : > { %v2977_v8 = vadd.f32 %v4571_v52, %v2816_v50  ;;  %v4484_v26 = vadd.f32 %v4483_v11, %v4482_v17  ;;  %v2971_v49 = vpop.f32.mrf.mxu1 }
 0x2ba   : > { %v2972_v30 = vadd.f32 %v2971_v49, %v2811_v32  ;;  %v4485_v60 = vpop.f32.mrf.mxu0  ;;  %3099 = vst [vmem:[%s5863_s11 + $0xa0] sm:$0xff] %v3067_v18 }
 0x2bb   : > { %v3069_v0 = vadd.f32 %v5832_v41, %v2977_v8  ;;  %v2819_v38 = vadd.f32 %v4484_v26, %v5776_v19 }
 0x2bc   : > { %v3068_v33 = vadd.f32 %v5841_v47, %v2972_v30  ;;  %v3892_v36 = vpack.c.bf16 %v2972_v30, %v2969_v35  ;;  %v4486_v3 = vpop.f32.mrf.mxu0 }
 0x2bd   : > { %v2980_v22 = vadd.f32 %v4572_v10, %v2819_v38  ;;  %3101 = vst [vmem:[%s5863_s11 + $0xb0] sm:$0xff] %v3069_v0  ;;  %v4487_v27 = vadd.f32 %v4486_v3, %v4485_v60 }
 0x2be   : > { %3943 = vst [vmem:[%s5882_s16 + $0x50] sm:$0xff] %v3892_v36   ;;  %v4488_v59 = vpop.f32.mrf.mxu0  ;;  %3100 = vst [vmem:[%s5863_s11 + $0xa8] sm:$0xff] %v3068_v33 }
 0x2bf   : > { %v3070_v51 = vadd.f32 %v5838_v21, %v2980_v22  ;;  %v3897_v31 = vpack.c.bf16 %v2980_v22, %v2977_v8  ;;  %v2824_v47 = vadd.f32 %v4487_v27, %v5776_v19 }
 0x2c0   : > { %v4489_v5 = vpop.f32.mrf.mxu0 }
 0x2c1   : > { %3944 = vst [vmem:[%s5882_s16 + $0x58] sm:$0xff] %v3897_v31   ;;  %3102 = vst [vmem:[%s5863_s11 + $0xb8] sm:$0xff] %v3070_v51  ;;  %v4490_v7 = vadd.f32 %v4489_v5, %v4488_v59 }
 0x2c2   : > { %v4491_v54 = vpop.f32.mrf.mxu0 }
 0x2c3   : > { %v4575_v41 = vpop.f32.mrf.mxu1  ;;  %v2827_v58 = vadd.f32 %v4490_v7, %v5776_v19 }
 0x2c4   : > { %v4492_v16 = vpop.f32.mrf.mxu0 }
 0x2c5   : > { %v4493_v55 = vadd.f32 %v4492_v16, %v4491_v54  ;;  %v2984_v39 = vpop.f32.mrf.mxu1 }
 0x2c6   : > { %v2985_v53 = vadd.f32 %v2984_v39, %v2824_v47  ;;  %v4494_v56 = vpop.f32.mrf.mxu0 }
 0x2c7   : > { %v2832_v15 = vadd.f32 %v4493_v55, %v5776_v19  ;;  %v4576_v13 = vpop.f32.mrf.mxu1 }
 0x2c8   : > { %v3071_v21 = vadd.f32 %v5847_v44, %v2985_v53  ;;  %v4495_v24 = vpop.f32.mrf.mxu0 }
 0x2c9   : > { %v2993_v6 = vadd.f32 %v4575_v41, %v2832_v15  ;;  %v4496_v23 = vadd.f32 %v4495_v24, %v4494_v56  ;;  %v2987_v29 = vpop.f32.mrf.mxu1 }
 0x2ca   : > { %v2988_v57 = vadd.f32 %v2987_v29, %v2827_v58  ;;  %v4497_v48 = vpop.f32.mrf.mxu0  ;;  %3103 = vst [vmem:[%s5863_s11 + $0xc0] sm:$0xff] %v3071_v21 }
 0x2cb   : > { %v3073_v62 = vadd.f32 %v5844_v12, %v2993_v6  ;;  %v2835_v2 = vadd.f32 %v4496_v23, %v5776_v19 }
 0x2cc   : > { %v3072_v9 = vadd.f32 %v5853_v63, %v2988_v57  ;;  %v3902_v44 = vpack.c.bf16 %v2988_v57, %v2985_v53  ;;  %v4498_v46 = vpop.f32.mrf.mxu0 }
 0x2cd   : > { %v2996_v14 = vadd.f32 %v4576_v13, %v2835_v2  ;;  %3105 = vst [vmem:[%s5863_s11 + $0xd0] sm:$0xff] %v3073_v62  ;;  %v4499_v34 = vadd.f32 %v4498_v46, %v4497_v48 }
 0x2ce   : > { %3945 = vst [vmem:[%s5882_s16 + $0x60] sm:$0xff] %v3902_v44   ;;  %v4500_v25 = vpop.f32.mrf.mxu0  ;;  %3104 = vst [vmem:[%s5863_s11 + $0xc8] sm:$0xff] %v3072_v9 }
 0x2cf   : > { %v3074_v28 = vadd.f32 %v5850_v4, %v2996_v14  ;;  %v3907_v52 = vpack.c.bf16 %v2996_v14, %v2993_v6  ;;  %v2840_v63 = vadd.f32 %v4499_v34, %v5776_v19 }
 0x2d0   : > { %v4501_v40 = vpop.f32.mrf.mxu0 }
 0x2d1   : > { %3946 = vst [vmem:[%s5882_s16 + $0x68] sm:$0xff] %v3907_v52   ;;  %3106 = vst [vmem:[%s5863_s11 + $0xd8] sm:$0xff] %v3074_v28  ;;  %v4502_v42 = vadd.f32 %v4501_v40, %v4500_v25 }
 0x2d2   : > { %v4503_v37 = vpop.f32.mrf.mxu0 }
 0x2d3   : > { %v4579_v12 = vpop.f32.mrf.mxu1  ;;  %v2843_v8 = vadd.f32 %v4502_v42, %v5776_v19 }
 0x2d4   : > { %v4504_v20 = vpop.f32.mrf.mxu0 }
 0x2d5   : > { %v4505_v35 = vadd.f32 %v4504_v20, %v4503_v37  ;;  %v3000_v17 = vpop.f32.mrf.mxu1 }
 0x2d6   : > { %v3001_v50 = vadd.f32 %v3000_v17, %v2840_v63  ;;  %v4506_v10 = vpop.f32.mrf.mxu0 }
 0x2d7   : > { %v2848_v18 = vadd.f32 %v4505_v35, %v5776_v19  ;;  %v4580_v4 = vpop.f32.mrf.mxu1 }
 0x2d8   : > { %v3075_v11 = vadd.f32 %v5867_v45, %v3001_v50  ;;  %v4507_v32 = vpop.f32.mrf.mxu0 }
 0x2d9   : > { %v3009_v26 = vadd.f32 %v4579_v12, %v2848_v18  ;;  %v4508_v49 = vadd.f32 %v4507_v32, %v4506_v10  ;;  %v3003_v30 = vpop.f32.mrf.mxu1 }
 0x2da   : > { %v3004_v60 = vadd.f32 %v3003_v30, %v2843_v8  ;;  %3107 = vst [vmem:[%s5863_s11 + $0xe0] sm:$0xff] %v3075_v11 }
 0x2db   : > { %v3077_v0 = vadd.f32 %v5856_v61, %v3009_v26  ;;  %v2851_v38 = vadd.f32 %v4508_v49, %v5776_v19 }
 0x2dc   : > { %v3076_v33 = vadd.f32 %v5873_v43, %v3004_v60  ;;  %v3912_v36 = vpack.c.bf16 %v3004_v60, %v3001_v50 }
 0x2dd   : > { %v3012_v3 = vadd.f32 %v4580_v4, %v2851_v38  ;;  %3109 = vst [vmem:[%s5863_s11 + $0xf0] sm:$0xff] %v3077_v0 }
 0x2de   : > { %3108 = vst [vmem:[%s5863_s11 + $0xe8] sm:$0xff] %v3076_v33  ;;  %3947 = vst [vmem:[%s5882_s16 + $0x70] sm:$0xff] %v3912_v36  }
 0x2df   : > { %v3078_v45 = vadd.f32 %v5870_v1, %v3012_v3  ;;  %v3917_v22 = vpack.c.bf16 %v3012_v3, %v3009_v26 }
 0x2e1   : > { %3948 = vst [vmem:[%s5882_s16 + $0x78] sm:$0xff] %v3917_v22   ;;  %3110 = vst [vmem:[%s5863_s11 + $0xf8] sm:$0xff] %v3078_v45 }
 0x2e2 PF: > { %s20_s30 = sadd.s32 1, %s4891_s30  }
 0x2e3   : > { %p17_p4 = scmp.ge.s32.totalorder %s20_s30, 4  }
 0x2e5   :  { %19 = sbr.rel (!%p17_p4) target bundleno = 1 (0x1), region = 106 }

// kernel: hypergraph_convolution.5
= control target key start
LH: loop header
LB: loop body
LE: loop exit
PB: predicated region body
PF: predicated region fallthrough
CT: control target
= control target key end

     0   :  { %s3220_s15 = smov 0   ;;  %s3876_s0 = inlined_call_operand.vmem [shape: bf16[1024,512], index: 0, kind: input, shape index: {}]   ;;  %s3877_s1 = inlined_call_operand.vmem [shape: bf16[512,128], index: 1, kind: input, shape index: {}]   ;;  %s3878_s2 = inlined_call_operand.vmem [shape: f32[1024,128], index: 2, kind: input, shape index: {}, may-alias: {2,3}]   ;;  %s3879_s3 = inlined_call_operand.vmem [shape: f32[1024,128], index: 3, kind: output, shape index: {0}, may-alias: {2,3}]   ;;  %s3880_s4 = inlined_call_operand.vmem [shape: bf16[1024,128], index: 4, kind: output, shape index: {1}]  }
   0x1 LB: > { %s2457_s16 = sadd.s32 4294967295, %s3192_s15   ;;  %p2461_p0 = scmp.ge.s32.totalorder %s3192_s15, 1  ;;  %s3192_s15 = sphi %s3220_s15, %s15_s15  }
   0x2   : > { %p178_p1 = scmp.lt.s32.totalorder %s3192_s15, 3 }
   0x4   : > { %p179_p2 = pnand %p2461_p0, %p178_p1 }
   0x6   : > { %182 = sbr.rel (%p179_p2) target bundleno = 526 (0x20e), region = 32 }
   0xb   : > { %v2962_v0 = vld [vmem:[%s3877_s1 + $0x38] sm:$0xff]   ;;  %v3194_v1 = vmov 0   ;;  %v2964_v3 = vld [vmem:[%s3877_s1 + $0x30] sm:$0xff]   ;;  %v2966_v5 = vld [vmem:[%s3877_s1 + $0x28] sm:$0xff]   ;;  %s2462_s11 = sshll.u32 %s2457_s16, 6 }
   0xc   : > { %1265 = vmatprep.subr.bf16.mxu0 %v3194_v1  ;;  %1554 = vmatprep.subr.bf16.mxu1 %v3194_v1  ;;  %v2963_v2 = vld [vmem:[%s3877_s1 + $0xb8] sm:$0xff]   ;;  %v2965_v4 = vld [vmem:[%s3877_s1 + $0xb0] sm:$0xff]   ;;  %v2967_v6 = vld [vmem:[%s3877_s1 + $0xa8] sm:$0xff]   ;;  %p216_p3 = scmp.lt.s32.totalorder %s2462_s11, 127 }
   0xd   : > { %1266 = vmatpush1.bf16.msra.mxu0 %v2962_v0  ;;  %1555 = vmatpush1.bf16.msra.mxu1 %v2963_v2  ;;  %v2968_v7 = vld [vmem:[%s3877_s1 + $0x20] sm:$0xff]   ;;  %v2970_v9 = vld [vmem:[%s3877_s1 + $0x18] sm:$0xff]   ;;  %v2972_v11 = vld [vmem:[%s3877_s1 + $0x10] sm:$0xff]  }
   0xe   : > { %1267 = vmatprep.subr.bf16.mxu0 %v3194_v1  ;;  %1556 = vmatprep.subr.bf16.mxu1 %v3194_v1  ;;  %v2969_v8 = vld [vmem:[%s3877_s1 + $0xa0] sm:$0xff]   ;;  %v2971_v10 = vld [vmem:[%s3877_s1 + $0x98] sm:$0xff]   ;;  %v2973_v12 = vld [vmem:[%s3877_s1 + $0x90] sm:$0xff]   ;;  %s3914_s11 = smov (!%p216_p3, %s2462_s11), 127 }
   0xf   : > { %v2974_v13 = vld [vmem:[%s3877_s1 + $0x8] sm:$0xff]   ;;  %v2976_v15 = vld [vmem:[%s3877_s1] sm:$0xff]   ;;  %s2697_s25 = sshll.u32 %s3914_s11, 4  ;;  %v2978_v17 = vld [vmem:[%s3877_s1 + $0x78] sm:$0xff]   ;;  %s2466_s13 = sshll.u32 %s3914_s11, 3 }
  0x10   : > { %v2975_v14 = vld [vmem:[%s3877_s1 + $0x88] sm:$0xff]   ;;  %v2977_v16 = vld [vmem:[%s3877_s1 + $0x80] sm:$0xff]   ;;  %s3303_s30 = scalar_lea.vmem %s3876_s0, %s2697_s25  ;;  %v2979_v18 = vld [vmem:[%s3877_s1 + $0xf8] sm:$0xff]   ;;  %s3471_s18 = scalar_lea.vmem %s3878_s2, %s2466_s13 }
  0x11   : > { %1268 = vmatpush1.bf16.msra.mxu0 %v2964_v3  ;;  %1557 = vmatpush1.bf16.msra.mxu1 %v2965_v4  ;;  %v2996_v19 = vld [vmem:[%s3303_s30 + $0x4] ss:$16 sps:$4 sm:$0xff]   ;;  %v2999_v21 = vld [vmem:[%s3303_s30 + $0xc] ss:$16 sps:$4 sm:$0xff]   ;;  %v2994_v35 = vld [vmem:[%s3303_s30] ss:$16 sps:$4 sm:$0xff]   ;;  %s3670_s20 = scalar_lea.vmem %s3879_s3, %s2466_s13 }
  0x12   : > { %1269 = vmatprep.subr.bf16.mxu0 %v3194_v1  ;;  %1558 = vmatprep.subr.bf16.mxu1 %v3194_v1  ;;  %v2980_v20 = vld [vmem:[%s3877_s1 + $0x70] sm:$0xff]   ;;  %v2982_v23 = vld [vmem:[%s3877_s1 + $0x68] sm:$0xff]   ;;  %v2984_v25 = vld [vmem:[%s3877_s1 + $0x60] sm:$0xff]   ;;  %s2470_s21 = sshll.u32 %s3914_s11, 2 }
  0x13   : > { %v2981_v22 = vld [vmem:[%s3877_s1 + $0xf0] sm:$0xff]   ;;  %1297 = vmatprep.mubr.bf16.mxu0 %v2996_v19  ;;  %1586 = vmatprep.mubr.bf16.mxu1 %v2999_v21  ;;  %v2983_v24 = vld [vmem:[%s3877_s1 + $0xe8] sm:$0xff]   ;;  %v2985_v26 = vld [vmem:[%s3877_s1 + $0xe0] sm:$0xff]   ;;  %s3691_s24 = scalar_lea.vmem %s3880_s4, %s2470_s21 }
  0x14   : > { %v2986_v27 = vld [vmem:[%s3877_s1 + $0x58] sm:$0xff]   ;;  %v2988_v29 = vld [vmem:[%s3877_s1 + $0x50] sm:$0xff]   ;;  %v2990_v31 = vld [vmem:[%s3877_s1 + $0x48] sm:$0xff]  }
  0x15   : > { %1270 = vmatpush1.bf16.msra.mxu0 %v2966_v5  ;;  %1559 = vmatpush1.bf16.msra.mxu1 %v2967_v6  ;;  %v2987_v28 = vld [vmem:[%s3877_s1 + $0xd8] sm:$0xff]   ;;  %v2989_v30 = vld [vmem:[%s3877_s1 + $0xd0] sm:$0xff]   ;;  %v2991_v32 = vld [vmem:[%s3877_s1 + $0xc8] sm:$0xff]  }
  0x16   : > { %1271 = vmatprep.subr.bf16.mxu0 %v3194_v1  ;;  %1560 = vmatprep.subr.bf16.mxu1 %v3194_v1  ;;  %v2992_v33 = vld [vmem:[%s3877_s1 + $0x40] sm:$0xff]   ;;  %v2997_v36 = vld [vmem:[%s3303_s30 + $0x8] ss:$16 sps:$4 sm:$0xff]   ;;  %v3002_v38 = vld [vmem:[%s3303_s30 + $0x2c] ss:$16 sps:$4 sm:$0xff]  }
  0x17   : > { %v2993_v34 = vld [vmem:[%s3877_s1 + $0xc0] sm:$0xff]   ;;  %v3005_v40 = vld [vmem:[%s3303_s30 + $0x28] ss:$16 sps:$4 sm:$0xff]   ;;  %v3008_v42 = vld [vmem:[%s3303_s30 + $0x4c] ss:$16 sps:$4 sm:$0xff]  }
  0x18   : > { %v3000_v37 = vld [vmem:[%s3303_s30 + $0x24] ss:$16 sps:$4 sm:$0xff]   ;;  %v3004_v39 = vld [vmem:[%s3303_s30 + $0x20] ss:$16 sps:$4 sm:$0xff]   ;;  %v3011_v44 = vld [vmem:[%s3303_s30 + $0x48] ss:$16 sps:$4 sm:$0xff]  }
  0x19   : > { %1272 = vmatpush1.bf16.msra.mxu0 %v2968_v7  ;;  %1561 = vmatpush1.bf16.msra.mxu1 %v2969_v8  ;;  %v3006_v41 = vld [vmem:[%s3303_s30 + $0x44] ss:$16 sps:$4 sm:$0xff]   ;;  %v3010_v43 = vld [vmem:[%s3303_s30 + $0x40] ss:$16 sps:$4 sm:$0xff]   ;;  %v3014_v46 = vld [vmem:[%s3303_s30 + $0x6c] ss:$16 sps:$4 sm:$0xff]  }
  0x1a   : > { %1273 = vmatprep.subr.bf16.mxu0 %v3194_v1  ;;  %1562 = vmatprep.subr.bf16.mxu1 %v3194_v1  ;;  %v3012_v45 = vld [vmem:[%s3303_s30 + $0x64] ss:$16 sps:$4 sm:$0xff]   ;;  %v3016_v47 = vld [vmem:[%s3303_s30 + $0x60] ss:$16 sps:$4 sm:$0xff]   ;;  %v3017_v48 = vld [vmem:[%s3303_s30 + $0x68] ss:$16 sps:$4 sm:$0xff]  }
  0x1b   : > { %v3018_v49 = vld [vmem:[%s3303_s30 + $0x84] ss:$16 sps:$4 sm:$0xff]   ;;  %v3020_v50 = vld [vmem:[%s3303_s30 + $0x8c] ss:$16 sps:$4 sm:$0xff]   ;;  %v3022_v51 = vld [vmem:[%s3303_s30 + $0x80] ss:$16 sps:$4 sm:$0xff]  }
  0x1c   : > { %v3023_v52 = vld [vmem:[%s3303_s30 + $0x88] ss:$16 sps:$4 sm:$0xff]   ;;  %v3024_v53 = vld [vmem:[%s3303_s30 + $0xa4] ss:$16 sps:$4 sm:$0xff]   ;;  %v3026_v54 = vld [vmem:[%s3303_s30 + $0xac] ss:$16 sps:$4 sm:$0xff]  }
  0x1d   : > { %1274 = vmatpush1.bf16.msra.mxu0 %v2970_v9  ;;  %1563 = vmatpush1.bf16.msra.mxu1 %v2971_v10  ;;  %v3028_v55 = vld [vmem:[%s3303_s30 + $0xa0] ss:$16 sps:$4 sm:$0xff]   ;;  %v3029_v56 = vld [vmem:[%s3303_s30 + $0xa8] ss:$16 sps:$4 sm:$0xff]   ;;  %v3030_v57 = vld [vmem:[%s3303_s30 + $0xc4] ss:$16 sps:$4 sm:$0xff]  }
  0x1e   : > { %1275 = vmatprep.subr.bf16.mxu0 %v3194_v1  ;;  %1564 = vmatprep.subr.bf16.mxu1 %v3194_v1  ;;  %v3032_v58 = vld [vmem:[%s3303_s30 + $0xcc] ss:$16 sps:$4 sm:$0xff]   ;;  %v3034_v59 = vld [vmem:[%s3303_s30 + $0xc0] ss:$16 sps:$4 sm:$0xff]   ;;  %v3035_v60 = vld [vmem:[%s3303_s30 + $0xc8] ss:$16 sps:$4 sm:$0xff]  }
  0x1f   : > { %v3036_v61 = vld [vmem:[%s3303_s30 + $0xe4] ss:$16 sps:$4 sm:$0xff]   ;;  %v3038_v62 = vld [vmem:[%s3303_s30 + $0xec] ss:$16 sps:$4 sm:$0xff]   ;;  %v3040_v63 = vld [vmem:[%s3303_s30 + $0xe0] ss:$16 sps:$4 sm:$0xff]  }
  0x20   : > { %v3041_v0 = vld [vmem:[%s3303_s30 + $0xe8] ss:$16 sps:$4 sm:$0xff]   ;;  %v3044_v2 = vld [vmem:[%s3303_s30 + $0x10c] ss:$16 sps:$4 sm:$0xff]   ;;  %v3046_v3 = vld [vmem:[%s3303_s30 + $0x100] ss:$16 sps:$4 sm:$0xff]  }
  0x21   : > { %1276 = vmatpush1.bf16.msra.mxu0 %v2972_v11  ;;  %1565 = vmatpush1.bf16.msra.mxu1 %v2973_v12  ;;  %v3047_v4 = vld [vmem:[%s3303_s30 + $0x108] ss:$16 sps:$4 sm:$0xff]   ;;  %v3048_v5 = vld [vmem:[%s3303_s30 + $0x124] ss:$16 sps:$4 sm:$0xff]   ;;  %v3050_v6 = vld [vmem:[%s3303_s30 + $0x12c] ss:$16 sps:$4 sm:$0xff]  }
  0x22   : > { %1277 = vmatprep.subr.bf16.mxu0 %v3194_v1  ;;  %1566 = vmatprep.subr.bf16.mxu1 %v3194_v1  ;;  %v3052_v7 = vld [vmem:[%s3303_s30 + $0x120] ss:$16 sps:$4 sm:$0xff]   ;;  %v3053_v8 = vld [vmem:[%s3303_s30 + $0x128] ss:$16 sps:$4 sm:$0xff]   ;;  %v3054_v9 = vld [vmem:[%s3303_s30 + $0x144] ss:$16 sps:$4 sm:$0xff]  }
  0x23   : > { %v3056_v10 = vld [vmem:[%s3303_s30 + $0x14c] ss:$16 sps:$4 sm:$0xff]   ;;  %v3058_v11 = vld [vmem:[%s3303_s30 + $0x140] ss:$16 sps:$4 sm:$0xff]   ;;  %v3059_v12 = vld [vmem:[%s3303_s30 + $0x148] ss:$16 sps:$4 sm:$0xff]  }
  0x24   : > { %v3070_v19 = vld [vmem:[%s3303_s30 + $0x180] ss:$16 sps:$4 sm:$0xff]   ;;  %v3072_v21 = vld [vmem:[%s3303_s30 + $0x1a4] ss:$16 sps:$4 sm:$0xff]  }
  0x25   : > { %1278 = vmatpush1.bf16.msra.mxu0 %v2974_v13  ;;  %1567 = vmatpush1.bf16.msra.mxu1 %v2975_v14  ;;  %v3060_v13 = vld [vmem:[%s3303_s30 + $0x164] ss:$16 sps:$4 sm:$0xff]   ;;  %v3062_v14 = vld [vmem:[%s3303_s30 + $0x16c] ss:$16 sps:$4 sm:$0xff]  }
  0x26   : > { %1279 = vmatprep.subr.bf16.mxu0 %v3194_v1  ;;  %1568 = vmatprep.subr.bf16.mxu1 %v3194_v1 }
  0x29   : > { %1280 = vmatpush1.bf16.msra.mxu0 %v2976_v15  ;;  %1569 = vmatpush1.bf16.msra.mxu1 %v2977_v16  ;;  %v3064_v15 = vld [vmem:[%s3303_s30 + $0x160] ss:$16 sps:$4 sm:$0xff]   ;;  %v3065_v16 = vld [vmem:[%s3303_s30 + $0x168] ss:$16 sps:$4 sm:$0xff]  }
  0x2a   : > { %1281 = vmatprep.subr.bf16.mxu0 %v3194_v1  ;;  %1570 = vmatprep.subr.bf16.mxu1 %v3194_v1 }
  0x2d   : > { %1282 = vmatpush2.bf16.msra.mxu0 %v2978_v17  ;;  %1571 = vmatpush2.bf16.msra.mxu1 %v2979_v18  ;;  %v3066_v17 = vld [vmem:[%s3303_s30 + $0x184] ss:$16 sps:$4 sm:$0xff]   ;;  %v3068_v18 = vld [vmem:[%s3303_s30 + $0x18c] ss:$16 sps:$4 sm:$0xff]  }
  0x2e   : > { %1283 = vmatprep.subr.bf16.mxu0 %v3194_v1  ;;  %1572 = vmatprep.subr.bf16.mxu1 %v3194_v1 }
  0x31   : > { %1284 = vmatpush2.bf16.msra.mxu0 %v2980_v20  ;;  %1573 = vmatpush2.bf16.msra.mxu1 %v2981_v22  ;;  %v3071_v20 = vld [vmem:[%s3303_s30 + $0x188] ss:$16 sps:$4 sm:$0xff]   ;;  %v3074_v22 = vld [vmem:[%s3303_s30 + $0x1ac] ss:$16 sps:$4 sm:$0xff]  }
  0x32   : > { %1285 = vmatprep.subr.bf16.mxu0 %v3194_v1  ;;  %1574 = vmatprep.subr.bf16.mxu1 %v3194_v1 }
  0x35   : > { %1286 = vmatpush2.bf16.msra.mxu0 %v2982_v23  ;;  %1575 = vmatpush2.bf16.msra.mxu1 %v2983_v24  ;;  %v3076_v23 = vld [vmem:[%s3303_s30 + $0x1a0] ss:$16 sps:$4 sm:$0xff]   ;;  %v3077_v24 = vld [vmem:[%s3303_s30 + $0x1a8] ss:$16 sps:$4 sm:$0xff]  }
  0x36   : > { %1287 = vmatprep.subr.bf16.mxu0 %v3194_v1  ;;  %1576 = vmatprep.subr.bf16.mxu1 %v3194_v1 }
  0x39   : > { %1288 = vmatpush2.bf16.msra.mxu0 %v2984_v25  ;;  %1577 = vmatpush2.bf16.msra.mxu1 %v2985_v26  ;;  %v3078_v25 = vld [vmem:[%s3303_s30 + $0x1c4] ss:$16 sps:$4 sm:$0xff]   ;;  %v3080_v26 = vld [vmem:[%s3303_s30 + $0x1cc] ss:$16 sps:$4 sm:$0xff]  }
  0x3a   : > { %1289 = vmatprep.subr.bf16.mxu0 %v3194_v1  ;;  %1578 = vmatprep.subr.bf16.mxu1 %v3194_v1 }
  0x3d   : > { %1290 = vmatpush2.bf16.msra.mxu0 %v2986_v27  ;;  %1579 = vmatpush2.bf16.msra.mxu1 %v2987_v28  ;;  %v3082_v27 = vld [vmem:[%s3303_s30 + $0x1c0] ss:$16 sps:$4 sm:$0xff]   ;;  %v3083_v28 = vld [vmem:[%s3303_s30 + $0x1c8] ss:$16 sps:$4 sm:$0xff]  }
  0x3e   : > { %1291 = vmatprep.subr.bf16.mxu0 %v3194_v1  ;;  %1580 = vmatprep.subr.bf16.mxu1 %v3194_v1 }
  0x41   : > { %1292 = vmatpush2.bf16.msra.mxu0 %v2988_v29  ;;  %1581 = vmatpush2.bf16.msra.mxu1 %v2989_v30  ;;  %v3084_v29 = vld [vmem:[%s3303_s30 + $0x1e4] ss:$16 sps:$4 sm:$0xff]   ;;  %v3086_v30 = vld [vmem:[%s3303_s30 + $0x1ec] ss:$16 sps:$4 sm:$0xff]  }
  0x42   : > { %1293 = vmatprep.subr.bf16.mxu0 %v3194_v1  ;;  %1582 = vmatprep.subr.bf16.mxu1 %v3194_v1 }
  0x45   : > { %1294 = vmatpush2.bf16.msra.mxu0 %v2990_v31  ;;  %1583 = vmatpush2.bf16.msra.mxu1 %v2991_v32  ;;  %v3088_v31 = vld [vmem:[%s3303_s30 + $0x1e0] ss:$16 sps:$4 sm:$0xff]   ;;  %v3089_v32 = vld [vmem:[%s3303_s30 + $0x1e8] ss:$16 sps:$4 sm:$0xff]  }
  0x46   : > { %1295 = vmatprep.subr.bf16.mxu0 %v3194_v1  ;;  %1584 = vmatprep.subr.bf16.mxu1 %v3194_v1  ;;  %v3042_v1 = vld [vmem:[%s3303_s30 + $0x104] ss:$16 sps:$4 sm:$0xff]  }
  0x49   : > { %1296 = vmatpush2.bf16.msra.mxu0 %v2992_v33  ;;  %1585 = vmatpush2.bf16.msra.mxu1 %v2993_v34  ;;  %v3090_v33 = vld [vmem:[%s3303_s30 + $0x204] ss:$16 sps:$4 sm:$0xff]   ;;  %v3092_v34 = vld [vmem:[%s3303_s30 + $0x20c] ss:$16 sps:$4 sm:$0xff]  }
  0x4c   : > { %1298 = vmatmul.mubr.bf16.vlgmr.msra.gmra.mxu0 %v2994_v35  ;;  %1587 = vmatmul.mubr.bf16.vlgmr.msra.gmra.mxu1 %v2997_v36  ;;  %v3094_v35 = vld [vmem:[%s3303_s30 + $0x200] ss:$16 sps:$4 sm:$0xff]   ;;  %v3095_v36 = vld [vmem:[%s3303_s30 + $0x208] ss:$16 sps:$4 sm:$0xff]  }
  0x4d   : > { %1305 = vmatprep.mubr.bf16.mxu0 %v3000_v37  ;;  %1594 = vmatprep.mubr.bf16.mxu1 %v3002_v38  ;;  %v3096_v37 = vld [vmem:[%s3303_s30 + $0x224] ss:$16 sps:$4 sm:$0xff]   ;;  %v3098_v38 = vld [vmem:[%s3303_s30 + $0x22c] ss:$16 sps:$4 sm:$0xff]  }
  0x54   : > { %1306 = vmatmul.mubr.bf16.gmra.mxu0 %v3004_v39  ;;  %1595 = vmatmul.mubr.bf16.gmra.mxu1 %v3005_v40  ;;  %v3100_v39 = vld [vmem:[%s3303_s30 + $0x220] ss:$16 sps:$4 sm:$0xff]   ;;  %v3101_v40 = vld [vmem:[%s3303_s30 + $0x228] ss:$16 sps:$4 sm:$0xff]  }
  0x55   : > { %1313 = vmatprep.mubr.bf16.mxu0 %v3006_v41  ;;  %1602 = vmatprep.mubr.bf16.mxu1 %v3008_v42  ;;  %v3102_v41 = vld [vmem:[%s3303_s30 + $0x244] ss:$16 sps:$4 sm:$0xff]   ;;  %v3104_v42 = vld [vmem:[%s3303_s30 + $0x24c] ss:$16 sps:$4 sm:$0xff]  }
  0x5c   : > { %1314 = vmatmul.mubr.bf16.gmra.mxu0 %v3010_v43  ;;  %1603 = vmatmul.mubr.bf16.gmra.mxu1 %v3011_v44  ;;  %v3106_v43 = vld [vmem:[%s3303_s30 + $0x240] ss:$16 sps:$4 sm:$0xff]   ;;  %v3107_v44 = vld [vmem:[%s3303_s30 + $0x248] ss:$16 sps:$4 sm:$0xff]  }
  0x5d   : > { %1321 = vmatprep.mubr.bf16.mxu0 %v3012_v45  ;;  %1610 = vmatprep.mubr.bf16.mxu1 %v3014_v46  ;;  %v3108_v45 = vld [vmem:[%s3303_s30 + $0x264] ss:$16 sps:$4 sm:$0xff]   ;;  %v3110_v46 = vld [vmem:[%s3303_s30 + $0x26c] ss:$16 sps:$4 sm:$0xff]  }
  0x64   : > { %1322 = vmatmul.mubr.bf16.gmra.mxu0 %v3016_v47  ;;  %1611 = vmatmul.mubr.bf16.gmra.mxu1 %v3017_v48  ;;  %v3112_v47 = vld [vmem:[%s3303_s30 + $0x260] ss:$16 sps:$4 sm:$0xff]   ;;  %v3113_v48 = vld [vmem:[%s3303_s30 + $0x268] ss:$16 sps:$4 sm:$0xff]  }
  0x65   : > { %1329 = vmatprep.mubr.bf16.mxu0 %v3018_v49  ;;  %1618 = vmatprep.mubr.bf16.mxu1 %v3020_v50  ;;  %v3114_v49 = vld [vmem:[%s3303_s30 + $0x284] ss:$16 sps:$4 sm:$0xff]   ;;  %v3116_v50 = vld [vmem:[%s3303_s30 + $0x28c] ss:$16 sps:$4 sm:$0xff]  }
  0x6c   : > { %1330 = vmatmul.mubr.bf16.gmra.mxu0 %v3022_v51  ;;  %1619 = vmatmul.mubr.bf16.gmra.mxu1 %v3023_v52  ;;  %v3118_v51 = vld [vmem:[%s3303_s30 + $0x280] ss:$16 sps:$4 sm:$0xff]   ;;  %v3119_v52 = vld [vmem:[%s3303_s30 + $0x288] ss:$16 sps:$4 sm:$0xff]  }
  0x6d   : > { %1337 = vmatprep.mubr.bf16.mxu0 %v3024_v53  ;;  %1626 = vmatprep.mubr.bf16.mxu1 %v3026_v54  ;;  %v3120_v53 = vld [vmem:[%s3303_s30 + $0x2a4] ss:$16 sps:$4 sm:$0xff]   ;;  %v3122_v54 = vld [vmem:[%s3303_s30 + $0x2ac] ss:$16 sps:$4 sm:$0xff]  }
  0x74   : > { %1338 = vmatmul.mubr.bf16.gmra.mxu0 %v3028_v55  ;;  %1627 = vmatmul.mubr.bf16.gmra.mxu1 %v3029_v56  ;;  %v3124_v55 = vld [vmem:[%s3303_s30 + $0x2a0] ss:$16 sps:$4 sm:$0xff]   ;;  %v3125_v56 = vld [vmem:[%s3303_s30 + $0x2a8] ss:$16 sps:$4 sm:$0xff]  }
  0x75   : > { %1345 = vmatprep.mubr.bf16.mxu0 %v3030_v57  ;;  %1634 = vmatprep.mubr.bf16.mxu1 %v3032_v58  ;;  %v3126_v57 = vld [vmem:[%s3303_s30 + $0x2c4] ss:$16 sps:$4 sm:$0xff]   ;;  %v3128_v58 = vld [vmem:[%s3303_s30 + $0x2cc] ss:$16 sps:$4 sm:$0xff]  }
  0x7c   : > { %1346 = vmatmul.mubr.bf16.gmra.mxu0 %v3034_v59  ;;  %1635 = vmatmul.mubr.bf16.gmra.mxu1 %v3035_v60  ;;  %v3130_v59 = vld [vmem:[%s3303_s30 + $0x2c0] ss:$16 sps:$4 sm:$0xff]   ;;  %v3131_v60 = vld [vmem:[%s3303_s30 + $0x2c8] ss:$16 sps:$4 sm:$0xff]  }
  0x7d   : > { %1353 = vmatprep.mubr.bf16.mxu0 %v3036_v61  ;;  %1642 = vmatprep.mubr.bf16.mxu1 %v3038_v62  ;;  %v3132_v61 = vld [vmem:[%s3303_s30 + $0x2e4] ss:$16 sps:$4 sm:$0xff]   ;;  %v3134_v62 = vld [vmem:[%s3303_s30 + $0x2ec] ss:$16 sps:$4 sm:$0xff]  }
  0x84   : > { %1354 = vmatmul.mubr.bf16.gmra.mxu0 %v3040_v63  ;;  %1643 = vmatmul.mubr.bf16.gmra.mxu1 %v3041_v0  ;;  %v3136_v63 = vld [vmem:[%s3303_s30 + $0x2e0] ss:$16 sps:$4 sm:$0xff]   ;;  %v3137_v0 = vld [vmem:[%s3303_s30 + $0x2e8] ss:$16 sps:$4 sm:$0xff]  }
  0x85   : > { %1361 = vmatprep.mubr.bf16.mxu0 %v3042_v1  ;;  %1650 = vmatprep.mubr.bf16.mxu1 %v3044_v2  ;;  %v3138_v1 = vld [vmem:[%s3303_s30 + $0x304] ss:$16 sps:$4 sm:$0xff]   ;;  %v3140_v2 = vld [vmem:[%s3303_s30 + $0x30c] ss:$16 sps:$4 sm:$0xff]  }
  0x8c   : > { %1362 = vmatmul.mubr.bf16.gmra.mxu0 %v3046_v3  ;;  %1651 = vmatmul.mubr.bf16.gmra.mxu1 %v3047_v4  ;;  %v3142_v3 = vld [vmem:[%s3303_s30 + $0x300] ss:$16 sps:$4 sm:$0xff]   ;;  %v3143_v4 = vld [vmem:[%s3303_s30 + $0x308] ss:$16 sps:$4 sm:$0xff]  }
  0x8d   : > { %1369 = vmatprep.mubr.bf16.mxu0 %v3048_v5  ;;  %1658 = vmatprep.mubr.bf16.mxu1 %v3050_v6  ;;  %v3144_v5 = vld [vmem:[%s3303_s30 + $0x324] ss:$16 sps:$4 sm:$0xff]   ;;  %v3476_v6 = vld [vmem:[%s3303_s30 + $0x32c] ss:$16 sps:$4 sm:$0xff]  }
  0x94   : > { %1370 = vmatmul.mubr.bf16.gmra.mxu0 %v3052_v7  ;;  %1659 = vmatmul.mubr.bf16.gmra.mxu1 %v3053_v8  ;;  %v3481_v8 = vld [vmem:[%s3471_s18] sm:$0xff] }
  0x95   : > { %1377 = vmatprep.mubr.bf16.mxu0 %v3054_v9  ;;  %1666 = vmatprep.mubr.bf16.mxu1 %v3056_v10  ;;  %v3484_v10 = vld [vmem:[%s3471_s18 + $0x8] sm:$0xff] }
  0x9c   : > { %1378 = vmatmul.mubr.bf16.gmra.mxu0 %v3058_v11  ;;  %1667 = vmatmul.mubr.bf16.gmra.mxu1 %v3059_v12  ;;  %v3487_v11 = vld [vmem:[%s3471_s18 + $0x10] sm:$0xff]  ;;  %v3490_v12 = vld [vmem:[%s3471_s18 + $0x18] sm:$0xff] }
  0x9d   : > { %1385 = vmatprep.mubr.bf16.mxu0 %v3060_v13  ;;  %1674 = vmatprep.mubr.bf16.mxu1 %v3062_v14  ;;  %v3493_v13 = vld [vmem:[%s3471_s18 + $0x20] sm:$0xff]  ;;  %v3496_v14 = vld [vmem:[%s3471_s18 + $0x28] sm:$0xff] }
  0xa4   : > { %1386 = vmatmul.mubr.bf16.gmra.mxu0 %v3064_v15  ;;  %1675 = vmatmul.mubr.bf16.gmra.mxu1 %v3065_v16  ;;  %v3499_v15 = vld [vmem:[%s3471_s18 + $0x30] sm:$0xff]  ;;  %v3502_v16 = vld [vmem:[%s3471_s18 + $0x38] sm:$0xff] }
  0xa5   : > { %1393 = vmatprep.mubr.bf16.mxu0 %v3066_v17  ;;  %1682 = vmatprep.mubr.bf16.mxu1 %v3068_v18  ;;  %v3505_v17 = vld [vmem:[%s3471_s18 + $0x40] sm:$0xff]  ;;  %v3508_v18 = vld [vmem:[%s3471_s18 + $0x48] sm:$0xff] }
  0xac   : > { %1394 = vmatmul.mubr.bf16.gmra.mxu0 %v3070_v19  ;;  %1683 = vmatmul.mubr.bf16.gmra.mxu1 %v3071_v20  ;;  %v3511_v19 = vld [vmem:[%s3471_s18 + $0x50] sm:$0xff]  ;;  %v3514_v20 = vld [vmem:[%s3471_s18 + $0x58] sm:$0xff] }
  0xad   : > { %1401 = vmatprep.mubr.bf16.mxu0 %v3072_v21  ;;  %1690 = vmatprep.mubr.bf16.mxu1 %v3074_v22  ;;  %v3517_v21 = vld [vmem:[%s3471_s18 + $0x60] sm:$0xff]  ;;  %v3520_v22 = vld [vmem:[%s3471_s18 + $0x68] sm:$0xff] }
  0xb4   : > { %1402 = vmatmul.mubr.bf16.gmra.mxu0 %v3076_v23  ;;  %1691 = vmatmul.mubr.bf16.gmra.mxu1 %v3077_v24  ;;  %v3523_v23 = vld [vmem:[%s3471_s18 + $0x70] sm:$0xff]  ;;  %v3526_v24 = vld [vmem:[%s3471_s18 + $0x78] sm:$0xff] }
  0xb5   : > { %1409 = vmatprep.mubr.bf16.mxu0 %v3078_v25  ;;  %1698 = vmatprep.mubr.bf16.mxu1 %v3080_v26  ;;  %v3529_v25 = vld [vmem:[%s3471_s18 + $0x80] sm:$0xff]  ;;  %v3532_v26 = vld [vmem:[%s3471_s18 + $0x88] sm:$0xff] }
  0xbc   : > { %1410 = vmatmul.mubr.bf16.gmra.mxu0 %v3082_v27  ;;  %1699 = vmatmul.mubr.bf16.gmra.mxu1 %v3083_v28  ;;  %v3535_v27 = vld [vmem:[%s3471_s18 + $0x90] sm:$0xff]  ;;  %v3538_v28 = vld [vmem:[%s3471_s18 + $0x98] sm:$0xff] }
  0xbd   : > { %1417 = vmatprep.mubr.bf16.mxu0 %v3084_v29  ;;  %1706 = vmatprep.mubr.bf16.mxu1 %v3086_v30  ;;  %v3541_v29 = vld [vmem:[%s3471_s18 + $0xa0] sm:$0xff]  ;;  %v3544_v30 = vld [vmem:[%s3471_s18 + $0xa8] sm:$0xff] }
  0xc4   : > { %1418 = vmatmul.mubr.bf16.gmra.mxu0 %v3088_v31  ;;  %1707 = vmatmul.mubr.bf16.gmra.mxu1 %v3089_v32  ;;  %v3547_v31 = vld [vmem:[%s3471_s18 + $0xb0] sm:$0xff]  ;;  %v3550_v32 = vld [vmem:[%s3471_s18 + $0xb8] sm:$0xff] }
  0xc5   : > { %1425 = vmatprep.mubr.bf16.mxu0 %v3090_v33  ;;  %1714 = vmatprep.mubr.bf16.mxu1 %v3092_v34  ;;  %v3553_v33 = vld [vmem:[%s3471_s18 + $0xc0] sm:$0xff]  ;;  %v3556_v34 = vld [vmem:[%s3471_s18 + $0xc8] sm:$0xff] }
  0xcc   : > { %1426 = vmatmul.mubr.bf16.gmra.mxu0 %v3094_v35  ;;  %1715 = vmatmul.mubr.bf16.gmra.mxu1 %v3095_v36  ;;  %v3559_v35 = vld [vmem:[%s3471_s18 + $0xd0] sm:$0xff]  ;;  %v3562_v36 = vld [vmem:[%s3471_s18 + $0xd8] sm:$0xff] }
  0xcd   : > { %1433 = vmatprep.mubr.bf16.mxu0 %v3096_v37  ;;  %1722 = vmatprep.mubr.bf16.mxu1 %v3098_v38  ;;  %v3565_v37 = vld [vmem:[%s3471_s18 + $0xe0] sm:$0xff]  ;;  %v3568_v38 = vld [vmem:[%s3471_s18 + $0xe8] sm:$0xff] }
  0xd4   : > { %1434 = vmatmul.mubr.bf16.gmra.mxu0 %v3100_v39  ;;  %1723 = vmatmul.mubr.bf16.gmra.mxu1 %v3101_v40  ;;  %v3571_v39 = vld [vmem:[%s3471_s18 + $0xf0] sm:$0xff]  ;;  %v3574_v40 = vld [vmem:[%s3471_s18 + $0xf8] sm:$0xff] }
  0xd5   : > { %1441 = vmatprep.mubr.bf16.mxu0 %v3102_v41  ;;  %1730 = vmatprep.mubr.bf16.mxu1 %v3104_v42  ;;  %v3577_v41 = vld [vmem:[%s3471_s18 + $0x100] sm:$0xff]  ;;  %v3580_v42 = vld [vmem:[%s3471_s18 + $0x108] sm:$0xff] }
  0xdc   : > { %1442 = vmatmul.mubr.bf16.gmra.mxu0 %v3106_v43  ;;  %1731 = vmatmul.mubr.bf16.gmra.mxu1 %v3107_v44  ;;  %v3583_v43 = vld [vmem:[%s3471_s18 + $0x110] sm:$0xff]  ;;  %v3586_v44 = vld [vmem:[%s3471_s18 + $0x118] sm:$0xff] }
  0xdd   : > { %1449 = vmatprep.mubr.bf16.mxu0 %v3108_v45  ;;  %1738 = vmatprep.mubr.bf16.mxu1 %v3110_v46  ;;  %v3589_v45 = vld [vmem:[%s3471_s18 + $0x120] sm:$0xff]  ;;  %v3592_v46 = vld [vmem:[%s3471_s18 + $0x128] sm:$0xff] }
  0xe4   : > { %1450 = vmatmul.mubr.bf16.gmra.mxu0 %v3112_v47  ;;  %1739 = vmatmul.mubr.bf16.gmra.mxu1 %v3113_v48  ;;  %v3595_v47 = vld [vmem:[%s3471_s18 + $0x130] sm:$0xff]  ;;  %v3598_v48 = vld [vmem:[%s3471_s18 + $0x138] sm:$0xff] }
  0xe5   : > { %1457 = vmatprep.mubr.bf16.mxu0 %v3114_v49  ;;  %1746 = vmatprep.mubr.bf16.mxu1 %v3116_v50  ;;  %v3601_v49 = vld [vmem:[%s3471_s18 + $0x140] sm:$0xff]  ;;  %v3604_v50 = vld [vmem:[%s3471_s18 + $0x148] sm:$0xff] }
  0xec   : > { %1458 = vmatmul.mubr.bf16.gmra.mxu0 %v3118_v51  ;;  %1747 = vmatmul.mubr.bf16.gmra.mxu1 %v3119_v52  ;;  %v3607_v51 = vld [vmem:[%s3471_s18 + $0x150] sm:$0xff]  ;;  %v3610_v52 = vld [vmem:[%s3471_s18 + $0x158] sm:$0xff] }
  0xed   : > { %1465 = vmatprep.mubr.bf16.mxu0 %v3120_v53  ;;  %1754 = vmatprep.mubr.bf16.mxu1 %v3122_v54  ;;  %v3613_v53 = vld [vmem:[%s3471_s18 + $0x160] sm:$0xff]  ;;  %v3616_v54 = vld [vmem:[%s3471_s18 + $0x168] sm:$0xff] }
  0xf4   : > { %1466 = vmatmul.mubr.bf16.gmra.mxu0 %v3124_v55  ;;  %1755 = vmatmul.mubr.bf16.gmra.mxu1 %v3125_v56  ;;  %v3619_v55 = vld [vmem:[%s3471_s18 + $0x170] sm:$0xff]  ;;  %v3622_v56 = vld [vmem:[%s3471_s18 + $0x178] sm:$0xff] }
  0xf5   : > { %1473 = vmatprep.mubr.bf16.mxu0 %v3126_v57  ;;  %1762 = vmatprep.mubr.bf16.mxu1 %v3128_v58  ;;  %v3625_v57 = vld [vmem:[%s3471_s18 + $0x180] sm:$0xff]  ;;  %v3628_v58 = vld [vmem:[%s3471_s18 + $0x188] sm:$0xff] }
  0xf6   : > { %3881 = vst [vmem:[#allocation2_spill] sm:$0xff] %v3625_v57  ;;  %3882 = vst [vmem:[#allocation3_spill] sm:$0xff] %v3628_v58  ;;  %v3156_v58 = vld [vmem:[%s3303_s30 + $0x364] ss:$16 sps:$4 sm:$0xff]   ;;  %v3158_v57 = vld [vmem:[%s3303_s30 + $0x36c] ss:$16 sps:$4 sm:$0xff]  }
  0xfc   : > { %1474 = vmatmul.mubr.bf16.gmra.mxu0 %v3130_v59  ;;  %1763 = vmatmul.mubr.bf16.gmra.mxu1 %v3131_v60  ;;  %v3631_v59 = vld [vmem:[%s3471_s18 + $0x190] sm:$0xff]  ;;  %v3634_v60 = vld [vmem:[%s3471_s18 + $0x198] sm:$0xff] }
  0xfd   : > { %1481 = vmatprep.mubr.bf16.mxu0 %v3132_v61  ;;  %1770 = vmatprep.mubr.bf16.mxu1 %v3134_v62  ;;  %3883 = vst [vmem:[#allocation4_spill] sm:$0xff] %v3631_v59  ;;  %3884 = vst [vmem:[#allocation5_spill] sm:$0xff] %v3634_v60  ;;  %v3637_v61 = vld [vmem:[%s3471_s18 + $0x1a0] sm:$0xff]  ;;  %v3640_v62 = vld [vmem:[%s3471_s18 + $0x1a8] sm:$0xff] }
  0xfe   : > { %3885 = vst [vmem:[#allocation6_spill] sm:$0xff] %v3637_v61  ;;  %3886 = vst [vmem:[#allocation7_spill] sm:$0xff] %v3640_v62  ;;  %v3660_v62 = vld [vmem:[%s3471_s18 + $0x1d8] sm:$0xff] }
  0xff   : > { %3892 = vst [vmem:[#allocation13_spill] sm:$0xff] %v3660_v62  ;;  %v3152_v59 = vld [vmem:[%s3303_s30 + $0x34c] ss:$16 sps:$4 sm:$0xff]  }
 0x104   : > { %1482 = vmatmul.mubr.bf16.gmra.mxu0 %v3136_v63  ;;  %1771 = vmatmul.mubr.bf16.gmra.mxu1 %v3137_v0  ;;  %v3643_v63 = vld [vmem:[%s3471_s18 + $0x1b0] sm:$0xff]  ;;  %v3646_v0 = vld [vmem:[%s3471_s18 + $0x1b8] sm:$0xff] }
 0x105   : > { %1489 = vmatprep.mubr.bf16.mxu0 %v3138_v1  ;;  %1778 = vmatprep.mubr.bf16.mxu1 %v3140_v2  ;;  %3887 = vst [vmem:[#allocation8_spill] sm:$0xff] %v3643_v63  ;;  %3888 = vst [vmem:[#allocation9_spill] sm:$0xff] %v3646_v0  ;;  %v3649_v1 = vld [vmem:[%s3471_s18 + $0x1c0] sm:$0xff]  ;;  %v3652_v2 = vld [vmem:[%s3471_s18 + $0x1c8] sm:$0xff] }
 0x106   : > { %3889 = vst [vmem:[#allocation10_spill] sm:$0xff] %v3649_v1  ;;  %3890 = vst [vmem:[#allocation11_spill] sm:$0xff] %v3652_v2  ;;  %v3663_v63 = vld [vmem:[%s3471_s18 + $0x1e0] sm:$0xff]  ;;  %v3149_v1 = vld [vmem:[%s3303_s30 + $0x328] ss:$16 sps:$4 sm:$0xff]  }
 0x107   : > { %3893 = vst [vmem:[#allocation14_spill] sm:$0xff] %v3663_v63  ;;  %v3148_v2 = vld [vmem:[%s3303_s30 + $0x320] ss:$16 sps:$4 sm:$0xff]   ;;  %v3150_v0 = vld [vmem:[%s3303_s30 + $0x344] ss:$16 sps:$4 sm:$0xff]  }
 0x10c   : > { %v3478_v7 = vpop.f32.mrf.mxu0  ;;  %1490 = vmatmul.mubr.bf16.gmra.mxu0 %v3142_v3  ;;  %v1588_v9 = vpop.f32.mrf.mxu1  ;;  %1779 = vmatmul.mubr.bf16.gmra.mxu1 %v3143_v4 }
 0x10d   : > { %1497 = vmatprep.mubr.bf16.mxu0 %v3144_v5  ;;  %v1589_v3 = vadd.f32 %v1588_v9, %v3478_v7  ;;  %1786 = vmatprep.mubr.bf16.mxu1 %v3476_v6  ;;  %v3657_v5 = vld [vmem:[%s3471_s18 + $0x1d0] sm:$0xff]  ;;  %v3673_v9 = vld [vmem:[%s3471_s18 + $0x1e8] sm:$0xff]  ;;  %v3679_v6 = vld [vmem:[%s3471_s18 + $0x1f8] sm:$0xff] }
 0x10e   : > { %v1301_v4 = vpop.f32.mrf.mxu0  ;;  %3891 = vst [vmem:[#allocation12_spill] sm:$0xff] %v3657_v5  ;;  %v1590_v7 = vpop.f32.mrf.mxu1  ;;  %3894 = vst [vmem:[#allocation15_spill] sm:$0xff] %v3673_v9 }
 0x10f   : > { %v3676_v4 = vld [vmem:[%s3471_s18 + $0x1f0] sm:$0xff]  ;;  %3896 = vst [vmem:[#allocation17_spill] sm:$0xff] %v3679_v6  ;;  %v1907_v5 = vadd.f32 %v3481_v8, %v1589_v3 }
 0x110   : > { %3895 = vst [vmem:[#allocation16_spill] sm:$0xff] %v3676_v4  ;;  %v1302_v62 = vpop.f32.mrf.mxu0  ;;  %v1591_v63 = vpop.f32.mrf.mxu1 }
 0x111   : > { %v1592_v61 = vadd.f32 %v1591_v63, %v1302_v62  ;;  %1971 = vst [vmem:[%s3670_s20] sm:$0xff] %v1907_v5 }
 0x112   : > { %v1304_v60 = vpop.f32.mrf.mxu0  ;;  %v1593_v7 = vpop.f32.mrf.mxu1 }
 0x113   : > { %v1908_v8 = vadd.f32 %v3484_v10, %v1592_v61  ;;  %v2765_v6 = vpack.c.bf16 %v1592_v61, %v1589_v3  ;;  %v3154_v10 = vld [vmem:[%s3303_s30 + $0x340] ss:$16 sps:$4 sm:$0xff]   ;;  %v3155_v3 = vld [vmem:[%s3303_s30 + $0x348] ss:$16 sps:$4 sm:$0xff]  }
 0x114   : > { %v1307_v4 = vpop.f32.mrf.mxu0  ;;  %1498 = vmatmul.mubr.bf16.gmra.mxu0 %v3148_v2  ;;  %v1596_v62 = vpop.f32.mrf.mxu1  ;;  %1787 = vmatmul.mubr.bf16.gmra.mxu1 %v3149_v1 }
 0x115   : > { %1505 = vmatprep.mubr.bf16.mxu0 %v3150_v0  ;;  %2766 = vst [vmem:[%s3691_s24] sm:$0xff] %v2765_v6   ;;  %v1597_v60 = vadd.f32 %v1596_v62, %v1307_v4  ;;  %1794 = vmatprep.mubr.bf16.mxu1 %v3152_v59  ;;  %1972 = vst [vmem:[%s3670_s20 + $0x8] sm:$0xff] %v1908_v8 }
 0x116   : > { %v1309_v63 = vpop.f32.mrf.mxu0  ;;  %v1598_v5 = vpop.f32.mrf.mxu1 }
 0x117   : > { %v1909_v7 = vadd.f32 %v3487_v11, %v1597_v60 }
 0x118   : > { %v1310_v9 = vpop.f32.mrf.mxu0  ;;  %v1599_v61 = vpop.f32.mrf.mxu1 }
 0x119   : > { %v1600_v2 = vadd.f32 %v1599_v61, %v1310_v9  ;;  %1973 = vst [vmem:[%s3670_s20 + $0x10] sm:$0xff] %v1909_v7  ;;  %v3161_v7 = vld [vmem:[%s3303_s30 + $0x368] ss:$16 sps:$4 sm:$0xff]   ;;  %v3164_v61 = vld [vmem:[%s3303_s30 + $0x384] ss:$16 sps:$4 sm:$0xff]  }
 0x11a   : > { %v1312_v1 = vpop.f32.mrf.mxu0  ;;  %v1601_v0 = vpop.f32.mrf.mxu1 }
 0x11b   : > { %v1910_v4 = vadd.f32 %v3490_v12, %v1600_v2  ;;  %v2770_v59 = vpack.c.bf16 %v1600_v2, %v1597_v60  ;;  %v3160_v12 = vld [vmem:[%s3303_s30 + $0x360] ss:$16 sps:$4 sm:$0xff]   ;;  %v3167_v2 = vld [vmem:[%s3303_s30 + $0x38c] ss:$16 sps:$4 sm:$0xff]  }
 0x11c   : > { %v1315_v6 = vpop.f32.mrf.mxu0  ;;  %1506 = vmatmul.mubr.bf16.gmra.mxu0 %v3154_v10  ;;  %v1604_v11 = vpop.f32.mrf.mxu1  ;;  %1795 = vmatmul.mubr.bf16.gmra.mxu1 %v3155_v3 }
 0x11d   : > { %1513 = vmatprep.mubr.bf16.mxu0 %v3156_v58  ;;  %2922 = vst [vmem:[%s3691_s24 + $0x8] sm:$0xff] %v2770_v59   ;;  %v1605_v9 = vadd.f32 %v1604_v11, %v1315_v6  ;;  %1802 = vmatprep.mubr.bf16.mxu1 %v3158_v57  ;;  %1974 = vst [vmem:[%s3670_s20 + $0x18] sm:$0xff] %v1910_v4 }
 0x11e   : > { %v1317_v8 = vpop.f32.mrf.mxu0  ;;  %v1606_v62 = vpop.f32.mrf.mxu1 }
 0x11f   : > { %v1911_v63 = vadd.f32 %v3493_v13, %v1605_v9  ;;  %v3165_v62 = vld [vmem:[%s3303_s30 + $0x388] ss:$16 sps:$4 sm:$0xff]  }
 0x120   : > { %v1318_v5 = vpop.f32.mrf.mxu0  ;;  %v1607_v60 = vpop.f32.mrf.mxu1 }
 0x121   : > { %v1608_v10 = vadd.f32 %v1607_v60, %v1318_v5  ;;  %1975 = vst [vmem:[%s3670_s20 + $0x20] sm:$0xff] %v1911_v63  ;;  %v3170_v63 = vld [vmem:[%s3303_s30 + $0x3a4] ss:$16 sps:$4 sm:$0xff]   ;;  %v3173_v60 = vld [vmem:[%s3303_s30 + $0x3ac] ss:$16 sps:$4 sm:$0xff]  }
 0x122   : > { %v1320_v3 = vpop.f32.mrf.mxu0  ;;  %v1609_v58 = vpop.f32.mrf.mxu1 }
 0x123   : > { %v1912_v1 = vadd.f32 %v3496_v14, %v1608_v10  ;;  %v2775_v57 = vpack.c.bf16 %v1608_v10, %v1605_v9  ;;  %v3162_v14 = vld [vmem:[%s3303_s30 + $0x380] ss:$16 sps:$4 sm:$0xff]  }
 0x124   : > { %v1323_v0 = vpop.f32.mrf.mxu0  ;;  %1514 = vmatmul.mubr.bf16.gmra.mxu0 %v3160_v12  ;;  %v1612_v13 = vpop.f32.mrf.mxu1  ;;  %1803 = vmatmul.mubr.bf16.gmra.mxu1 %v3161_v7 }
 0x125   : > { %1521 = vmatprep.mubr.bf16.mxu0 %v3164_v61  ;;  %2923 = vst [vmem:[%s3691_s24 + $0x10] sm:$0xff] %v2775_v57   ;;  %v1613_v4 = vadd.f32 %v1612_v13, %v1323_v0  ;;  %1810 = vmatprep.mubr.bf16.mxu1 %v3167_v2  ;;  %1976 = vst [vmem:[%s3670_s20 + $0x28] sm:$0xff] %v1912_v1 }
 0x126   : > { %v1325_v59 = vpop.f32.mrf.mxu0  ;;  %v1614_v6 = vpop.f32.mrf.mxu1 }
 0x127   : > { %v1913_v11 = vadd.f32 %v3499_v15, %v1613_v4  ;;  %v3176_v59 = vld [vmem:[%s3303_s30 + $0x3c4] ss:$16 sps:$4 sm:$0xff]  }
 0x128   : > { %v1326_v8 = vpop.f32.mrf.mxu0  ;;  %v1615_v9 = vpop.f32.mrf.mxu1 }
 0x129   : > { %v1616_v5 = vadd.f32 %v1615_v9, %v1326_v8  ;;  %1977 = vst [vmem:[%s3670_s20 + $0x30] sm:$0xff] %v1913_v11  ;;  %v3179_v8 = vld [vmem:[%s3303_s30 + $0x3cc] ss:$16 sps:$4 sm:$0xff]  }
 0x12a   : > { %v1328_v12 = vpop.f32.mrf.mxu0  ;;  %v1617_v7 = vpop.f32.mrf.mxu1 }
 0x12b   : > { %v1914_v61 = vadd.f32 %v3502_v16, %v1616_v5  ;;  %v2780_v10 = vpack.c.bf16 %v1616_v5, %v1613_v4  ;;  %v3168_v16 = vld [vmem:[%s3303_s30 + $0x3a0] ss:$16 sps:$4 sm:$0xff]   ;;  %v3171_v4 = vld [vmem:[%s3303_s30 + $0x3a8] ss:$16 sps:$4 sm:$0xff]  }
 0x12c   : > { %v1331_v3 = vpop.f32.mrf.mxu0  ;;  %1522 = vmatmul.mubr.bf16.gmra.mxu0 %v3162_v14  ;;  %v1620_v15 = vpop.f32.mrf.mxu1  ;;  %1811 = vmatmul.mubr.bf16.gmra.mxu1 %v3165_v62 }
 0x12d   : > { %1529 = vmatprep.mubr.bf16.mxu0 %v3170_v63  ;;  %2924 = vst [vmem:[%s3691_s24 + $0x18] sm:$0xff] %v2780_v10   ;;  %v1621_v2 = vadd.f32 %v1620_v15, %v1331_v3  ;;  %1818 = vmatprep.mubr.bf16.mxu1 %v3173_v60  ;;  %1978 = vst [vmem:[%s3670_s20 + $0x38] sm:$0xff] %v1914_v61  ;;  %v3177_v3 = vld [vmem:[%s3303_s30 + $0x3c8] ss:$16 sps:$4 sm:$0xff]   ;;  %v3182_v15 = vld [vmem:[%s3303_s30 + $0x3e4] ss:$16 sps:$4 sm:$0xff]  }
 0x12e   : > { %v1333_v58 = vpop.f32.mrf.mxu0  ;;  %v1622_v1 = vpop.f32.mrf.mxu1 }
 0x12f   : > { %v1915_v57 = vadd.f32 %v3505_v17, %v1621_v2  ;;  %v3185_v1 = vld [vmem:[%s3303_s30 + $0x3ec] ss:$16 sps:$4 sm:$0xff]  }
 0x130   : > { %v1334_v0 = vpop.f32.mrf.mxu0  ;;  %v1623_v13 = vpop.f32.mrf.mxu1 }
 0x131   : > { %v1624_v6 = vadd.f32 %v1623_v13, %v1334_v0  ;;  %1979 = vst [vmem:[%s3670_s20 + $0x40] sm:$0xff] %v1915_v57 }
 0x132   : > { %v1336_v11 = vpop.f32.mrf.mxu0  ;;  %v1625_v14 = vpop.f32.mrf.mxu1 }
 0x133   : > { %v1916_v9 = vadd.f32 %v3508_v18, %v1624_v6  ;;  %v2785_v62 = vpack.c.bf16 %v1624_v6, %v1621_v2  ;;  %v3174_v18 = vld [vmem:[%s3303_s30 + $0x3c0] ss:$16 sps:$4 sm:$0xff]  }
 0x134   : > { %v1339_v63 = vpop.f32.mrf.mxu0  ;;  %1530 = vmatmul.mubr.bf16.gmra.mxu0 %v3168_v16  ;;  %v1628_v17 = vpop.f32.mrf.mxu1  ;;  %1819 = vmatmul.mubr.bf16.gmra.mxu1 %v3171_v4  ;;  %v3180_v14 = vld [vmem:[%s3303_s30 + $0x3e0] ss:$16 sps:$4 sm:$0xff]  }
 0x135   : > { %1537 = vmatprep.mubr.bf16.mxu0 %v3176_v59  ;;  %2925 = vst [vmem:[%s3691_s24 + $0x20] sm:$0xff] %v2785_v62   ;;  %v1629_v5 = vadd.f32 %v1628_v17, %v1339_v63  ;;  %1826 = vmatprep.mubr.bf16.mxu1 %v3179_v8  ;;  %1980 = vst [vmem:[%s3670_s20 + $0x48] sm:$0xff] %v1916_v9  ;;  %v3183_v9 = vld [vmem:[%s3303_s30 + $0x3e8] ss:$16 sps:$4 sm:$0xff]  }
 0x136   : > { %v1341_v12 = vpop.f32.mrf.mxu0  ;;  %v1630_v60 = vpop.f32.mrf.mxu1 }
 0x137   : > { %v1917_v7 = vadd.f32 %v3511_v19, %v1629_v5 }
 0x138   : > { %v1342_v61 = vpop.f32.mrf.mxu0  ;;  %v1631_v10 = vpop.f32.mrf.mxu1 }
 0x139   : > { %v1632_v2 = vadd.f32 %v1631_v10, %v1342_v61  ;;  %1981 = vst [vmem:[%s3670_s20 + $0x50] sm:$0xff] %v1917_v7 }
 0x13a   : > { %v1344_v58 = vpop.f32.mrf.mxu0  ;;  %v1633_v57 = vpop.f32.mrf.mxu1 }
 0x13b   : > { %v1918_v0 = vadd.f32 %v3514_v20, %v1632_v2  ;;  %v2790_v16 = vpack.c.bf16 %v1632_v2, %v1629_v5 }
 0x13c   : > { %v1347_v13 = vpop.f32.mrf.mxu0  ;;  %1538 = vmatmul.mubr.bf16.gmra.mxu0 %v3174_v18  ;;  %v1636_v19 = vpop.f32.mrf.mxu1  ;;  %1827 = vmatmul.mubr.bf16.gmra.mxu1 %v3177_v3 }
 0x13d   : > { %1545 = vmatprep.mubr.bf16.mxu0 %v3182_v15  ;;  %2926 = vst [vmem:[%s3691_s24 + $0x28] sm:$0xff] %v2790_v16   ;;  %v1637_v4 = vadd.f32 %v1636_v19, %v1347_v13  ;;  %1834 = vmatprep.mubr.bf16.mxu1 %v3185_v1  ;;  %1982 = vst [vmem:[%s3670_s20 + $0x58] sm:$0xff] %v1918_v0 }
 0x13e   : > { %v1349_v59 = vpop.f32.mrf.mxu0  ;;  %v1638_v6 = vpop.f32.mrf.mxu1 }
 0x13f   : > { %v1919_v11 = vadd.f32 %v3517_v21, %v1637_v4 }
 0x140   : > { %v1350_v8 = vpop.f32.mrf.mxu0  ;;  %v1639_v20 = vpop.f32.mrf.mxu1 }
 0x141   : > { %v1640_v62 = vadd.f32 %v1639_v20, %v1350_v8  ;;  %1983 = vst [vmem:[%s3670_s20 + $0x60] sm:$0xff] %v1919_v11 }
 0x142   : > { %v1352_v63 = vpop.f32.mrf.mxu0  ;;  %v1641_v17 = vpop.f32.mrf.mxu1 }
 0x143   : > { %v1920_v5 = vadd.f32 %v3520_v22, %v1640_v62  ;;  %v2795_v12 = vpack.c.bf16 %v1640_v62, %v1637_v4 }
 0x144   : > { %v1355_v60 = vpop.f32.mrf.mxu0  ;;  %1546 = vmatmul.mubr.bf16.gmra.mxu0 %v3180_v14  ;;  %v1644_v7 = vpop.f32.mrf.mxu1  ;;  %1835 = vmatmul.mubr.bf16.gmra.mxu1 %v3183_v9 }
 0x145   : > { %2927 = vst [vmem:[%s3691_s24 + $0x30] sm:$0xff] %v2795_v12   ;;  %v1645_v21 = vadd.f32 %v1644_v7, %v1355_v60  ;;  %1984 = vst [vmem:[%s3670_s20 + $0x68] sm:$0xff] %v1920_v5 }
 0x146   : > { %v1357_v61 = vpop.f32.mrf.mxu0  ;;  %v1646_v18 = vpop.f32.mrf.mxu1 }
 0x147   : > { %v1921_v10 = vadd.f32 %v3523_v23, %v1645_v21 }
 0x148   : > { %v1358_v3 = vpop.f32.mrf.mxu0  ;;  %v1647_v15 = vpop.f32.mrf.mxu1 }
 0x149   : > { %v1648_v2 = vadd.f32 %v1647_v15, %v1358_v3  ;;  %1985 = vst [vmem:[%s3670_s20 + $0x70] sm:$0xff] %v1921_v10 }
 0x14a   : > { %v1360_v58 = vpop.f32.mrf.mxu0  ;;  %v1649_v22 = vpop.f32.mrf.mxu1 }
 0x14b   : > { %v1922_v1 = vadd.f32 %v3526_v24, %v1648_v2  ;;  %v2800_v57 = vpack.c.bf16 %v1648_v2, %v1645_v21 }
 0x14c   : > { %v1363_v0 = vpop.f32.mrf.mxu0  ;;  %v1652_v16 = vpop.f32.mrf.mxu1 }
 0x14d   : > { %2928 = vst [vmem:[%s3691_s24 + $0x38] sm:$0xff] %v2800_v57   ;;  %v1653_v13 = vadd.f32 %v1652_v16, %v1363_v0  ;;  %1986 = vst [vmem:[%s3670_s20 + $0x78] sm:$0xff] %v1922_v1 }
 0x14e   : > { %v1365_v19 = vpop.f32.mrf.mxu0  ;;  %v1654_v4 = vpop.f32.mrf.mxu1 }
 0x14f   : > { %v1923_v23 = vadd.f32 %v3529_v25, %v1653_v13 }
 0x150   : > { %v1366_v59 = vpop.f32.mrf.mxu0  ;;  %v1655_v6 = vpop.f32.mrf.mxu1 }
 0x151   : > { %v1656_v11 = vadd.f32 %v1655_v6, %v1366_v59  ;;  %1987 = vst [vmem:[%s3670_s20 + $0x80] sm:$0xff] %v1923_v23 }
 0x152   : > { %v1368_v8 = vpop.f32.mrf.mxu0  ;;  %v1657_v14 = vpop.f32.mrf.mxu1 }
 0x153   : > { %v1924_v24 = vadd.f32 %v3532_v26, %v1656_v11  ;;  %v2805_v20 = vpack.c.bf16 %v1656_v11, %v1653_v13 }
 0x154   : > { %v1371_v9 = vpop.f32.mrf.mxu0  ;;  %v1660_v62 = vpop.f32.mrf.mxu1 }
 0x155   : > { %2929 = vst [vmem:[%s3691_s24 + $0x40] sm:$0xff] %v2805_v20   ;;  %v1661_v63 = vadd.f32 %v1660_v62, %v1371_v9  ;;  %1988 = vst [vmem:[%s3670_s20 + $0x88] sm:$0xff] %v1924_v24 }
 0x156   : > { %v1373_v17 = vpop.f32.mrf.mxu0  ;;  %v1662_v5 = vpop.f32.mrf.mxu1 }
 0x157   : > { %v1925_v25 = vadd.f32 %v3535_v27, %v1661_v63 }
 0x158   : > { %v1374_v12 = vpop.f32.mrf.mxu0  ;;  %v1663_v60 = vpop.f32.mrf.mxu1 }
 0x159   : > { %v1664_v7 = vadd.f32 %v1663_v60, %v1374_v12  ;;  %1989 = vst [vmem:[%s3670_s20 + $0x90] sm:$0xff] %v1925_v25 }
 0x15a   : > { %v1376_v21 = vpop.f32.mrf.mxu0  ;;  %v1665_v61 = vpop.f32.mrf.mxu1 }
 0x15b   : > { %v1926_v26 = vadd.f32 %v3538_v28, %v1664_v7  ;;  %v2810_v18 = vpack.c.bf16 %v1664_v7, %v1661_v63 }
 0x15c   : > { %v1379_v10 = vpop.f32.mrf.mxu0  ;;  %v1668_v3 = vpop.f32.mrf.mxu1 }
 0x15d   : > { %2930 = vst [vmem:[%s3691_s24 + $0x48] sm:$0xff] %v2810_v18   ;;  %v1669_v15 = vadd.f32 %v1668_v3, %v1379_v10  ;;  %1990 = vst [vmem:[%s3670_s20 + $0x98] sm:$0xff] %v1926_v26 }
 0x15e   : > { %v1381_v2 = vpop.f32.mrf.mxu0  ;;  %v1670_v58 = vpop.f32.mrf.mxu1 }
 0x15f   : > { %v1927_v27 = vadd.f32 %v3541_v29, %v1669_v15 }
 0x160   : > { %v1382_v22 = vpop.f32.mrf.mxu0  ;;  %v1671_v1 = vpop.f32.mrf.mxu1 }
 0x161   : > { %v1672_v57 = vadd.f32 %v1671_v1, %v1382_v22  ;;  %1991 = vst [vmem:[%s3670_s20 + $0xa0] sm:$0xff] %v1927_v27 }
 0x162   : > { %v1384_v0 = vpop.f32.mrf.mxu0  ;;  %v1673_v16 = vpop.f32.mrf.mxu1 }
 0x163   : > { %v1928_v28 = vadd.f32 %v3544_v30, %v1672_v57  ;;  %v2815_v13 = vpack.c.bf16 %v1672_v57, %v1669_v15 }
 0x164   : > { %v1387_v19 = vpop.f32.mrf.mxu0  ;;  %v1676_v4 = vpop.f32.mrf.mxu1 }
 0x165   : > { %2931 = vst [vmem:[%s3691_s24 + $0x50] sm:$0xff] %v2815_v13   ;;  %v1677_v23 = vadd.f32 %v1676_v4, %v1387_v19  ;;  %1992 = vst [vmem:[%s3670_s20 + $0xa8] sm:$0xff] %v1928_v28 }
 0x166   : > { %v1389_v59 = vpop.f32.mrf.mxu0  ;;  %v1678_v6 = vpop.f32.mrf.mxu1 }
 0x167   : > { %v1929_v29 = vadd.f32 %v3547_v31, %v1677_v23 }
 0x168   : > { %v1390_v11 = vpop.f32.mrf.mxu0  ;;  %v1679_v8 = vpop.f32.mrf.mxu1 }
 0x169   : > { %v1680_v14 = vadd.f32 %v1679_v8, %v1390_v11  ;;  %1993 = vst [vmem:[%s3670_s20 + $0xb0] sm:$0xff] %v1929_v29 }
 0x16a   : > { %v1392_v24 = vpop.f32.mrf.mxu0  ;;  %v1681_v20 = vpop.f32.mrf.mxu1 }
 0x16b   : > { %v1930_v30 = vadd.f32 %v3550_v32, %v1680_v14  ;;  %v2820_v9 = vpack.c.bf16 %v1680_v14, %v1677_v23 }
 0x16c   : > { %v1395_v62 = vpop.f32.mrf.mxu0  ;;  %v1684_v63 = vpop.f32.mrf.mxu1 }
 0x16d   : > { %2932 = vst [vmem:[%s3691_s24 + $0x58] sm:$0xff] %v2820_v9   ;;  %v1685_v17 = vadd.f32 %v1684_v63, %v1395_v62  ;;  %1994 = vst [vmem:[%s3670_s20 + $0xb8] sm:$0xff] %v1930_v30 }
 0x16e   : > { %v1397_v5 = vpop.f32.mrf.mxu0  ;;  %v1686_v25 = vpop.f32.mrf.mxu1 }
 0x16f   : > { %v1931_v31 = vadd.f32 %v3553_v33, %v1685_v17 }
 0x170   : > { %v1398_v12 = vpop.f32.mrf.mxu0  ;;  %v1687_v60 = vpop.f32.mrf.mxu1 }
 0x171   : > { %v1688_v7 = vadd.f32 %v1687_v60, %v1398_v12  ;;  %1995 = vst [vmem:[%s3670_s20 + $0xc0] sm:$0xff] %v1931_v31 }
 0x172   : > { %v1400_v21 = vpop.f32.mrf.mxu0  ;;  %v1689_v61 = vpop.f32.mrf.mxu1 }
 0x173   : > { %v1932_v32 = vadd.f32 %v3556_v34, %v1688_v7  ;;  %v2825_v26 = vpack.c.bf16 %v1688_v7, %v1685_v17 }
 0x174   : > { %v1403_v18 = vpop.f32.mrf.mxu0  ;;  %v1692_v10 = vpop.f32.mrf.mxu1 }
 0x175   : > { %2933 = vst [vmem:[%s3691_s24 + $0x60] sm:$0xff] %v2825_v26   ;;  %v1693_v3 = vadd.f32 %v1692_v10, %v1403_v18  ;;  %1996 = vst [vmem:[%s3670_s20 + $0xc8] sm:$0xff] %v1932_v32 }
 0x176   : > { %v1405_v15 = vpop.f32.mrf.mxu0  ;;  %v1694_v2 = vpop.f32.mrf.mxu1 }
 0x177   : > { %v1933_v33 = vadd.f32 %v3559_v35, %v1693_v3 }
 0x178   : > { %v1406_v58 = vpop.f32.mrf.mxu0  ;;  %v1695_v27 = vpop.f32.mrf.mxu1 }
 0x179   : > { %v1696_v22 = vadd.f32 %v1695_v27, %v1406_v58  ;;  %1997 = vst [vmem:[%s3670_s20 + $0xd0] sm:$0xff] %v1933_v33 }
 0x17a   : > { %v1408_v1 = vpop.f32.mrf.mxu0  ;;  %v1697_v57 = vpop.f32.mrf.mxu1 }
 0x17b   : > { %v1934_v34 = vadd.f32 %v3562_v36, %v1696_v22  ;;  %v2830_v0 = vpack.c.bf16 %v1696_v22, %v1693_v3 }
 0x17c   : > { %v1411_v16 = vpop.f32.mrf.mxu0  ;;  %v1700_v28 = vpop.f32.mrf.mxu1 }
 0x17d   : > { %2934 = vst [vmem:[%s3691_s24 + $0x68] sm:$0xff] %v2830_v0   ;;  %v1701_v13 = vadd.f32 %v1700_v28, %v1411_v16  ;;  %1998 = vst [vmem:[%s3670_s20 + $0xd8] sm:$0xff] %v1934_v34 }
 0x17e   : > { %v1413_v19 = vpop.f32.mrf.mxu0  ;;  %v1702_v4 = vpop.f32.mrf.mxu1 }
 0x17f   : > { %v1935_v35 = vadd.f32 %v3565_v37, %v1701_v13 }
 0x180   : > { %v1414_v23 = vpop.f32.mrf.mxu0  ;;  %v1703_v59 = vpop.f32.mrf.mxu1 }
 0x181   : > { %v1704_v6 = vadd.f32 %v1703_v59, %v1414_v23  ;;  %1999 = vst [vmem:[%s3670_s20 + $0xe0] sm:$0xff] %v1935_v35 }
 0x182   : > { %v1416_v29 = vpop.f32.mrf.mxu0  ;;  %v1705_v11 = vpop.f32.mrf.mxu1 }
 0x183   : > { %v1936_v36 = vadd.f32 %v3568_v38, %v1704_v6  ;;  %v2835_v8 = vpack.c.bf16 %v1704_v6, %v1701_v13 }
 0x184   : > { %v1419_v14 = vpop.f32.mrf.mxu0  ;;  %v1708_v24 = vpop.f32.mrf.mxu1 }
 0x185   : > { %2935 = vst [vmem:[%s3691_s24 + $0x70] sm:$0xff] %v2835_v8   ;;  %v1709_v20 = vadd.f32 %v1708_v24, %v1419_v14  ;;  %2000 = vst [vmem:[%s3670_s20 + $0xe8] sm:$0xff] %v1936_v36 }
 0x186   : > { %v1421_v30 = vpop.f32.mrf.mxu0  ;;  %v1710_v9 = vpop.f32.mrf.mxu1 }
 0x187   : > { %v1937_v37 = vadd.f32 %v3571_v39, %v1709_v20 }
 0x188   : > { %v1422_v62 = vpop.f32.mrf.mxu0  ;;  %v1711_v63 = vpop.f32.mrf.mxu1 }
 0x189   : > { %v1712_v17 = vadd.f32 %v1711_v63, %v1422_v62  ;;  %2001 = vst [vmem:[%s3670_s20 + $0xf0] sm:$0xff] %v1937_v37 }
 0x18a   : > { %v1424_v5 = vpop.f32.mrf.mxu0  ;;  %v1713_v25 = vpop.f32.mrf.mxu1 }
 0x18b   : > { %v1938_v38 = vadd.f32 %v3574_v40, %v1712_v17  ;;  %v2840_v31 = vpack.c.bf16 %v1712_v17, %v1709_v20 }
 0x18c   : > { %v1427_v12 = vpop.f32.mrf.mxu0  ;;  %v1716_v60 = vpop.f32.mrf.mxu1 }
 0x18d   : > { %2936 = vst [vmem:[%s3691_s24 + $0x78] sm:$0xff] %v2840_v31   ;;  %v1717_v7 = vadd.f32 %v1716_v60, %v1427_v12  ;;  %2002 = vst [vmem:[%s3670_s20 + $0xf8] sm:$0xff] %v1938_v38 }
 0x18e   : > { %v1429_v21 = vpop.f32.mrf.mxu0  ;;  %v1718_v61 = vpop.f32.mrf.mxu1 }
 0x18f   : > { %v1939_v39 = vadd.f32 %v3577_v41, %v1717_v7 }
 0x190   : > { %v1430_v32 = vpop.f32.mrf.mxu0  ;;  %v1719_v26 = vpop.f32.mrf.mxu1 }
 0x191   : > { %v1720_v18 = vadd.f32 %v1719_v26, %v1430_v32  ;;  %2003 = vst [vmem:[%s3670_s20 + $0x100] sm:$0xff] %v1939_v39 }
 0x192   : > { %v1432_v10 = vpop.f32.mrf.mxu0  ;;  %v1721_v3 = vpop.f32.mrf.mxu1 }
 0x193   : > { %v1940_v40 = vadd.f32 %v3580_v42, %v1720_v18  ;;  %v2845_v15 = vpack.c.bf16 %v1720_v18, %v1717_v7 }
 0x194   : > { %v1435_v2 = vpop.f32.mrf.mxu0  ;;  %v1724_v33 = vpop.f32.mrf.mxu1 }
 0x195   : > { %2937 = vst [vmem:[%s3691_s24 + $0x80] sm:$0xff] %v2845_v15   ;;  %v1725_v58 = vadd.f32 %v1724_v33, %v1435_v2  ;;  %2004 = vst [vmem:[%s3670_s20 + $0x108] sm:$0xff] %v1940_v40 }
 0x196   : > { %v1437_v27 = vpop.f32.mrf.mxu0  ;;  %v1726_v22 = vpop.f32.mrf.mxu1 }
 0x197   : > { %v1941_v41 = vadd.f32 %v3583_v43, %v1725_v58 }
 0x198   : > { %v1438_v1 = vpop.f32.mrf.mxu0  ;;  %v1727_v57 = vpop.f32.mrf.mxu1 }
 0x199   : > { %v1728_v34 = vadd.f32 %v1727_v57, %v1438_v1  ;;  %2005 = vst [vmem:[%s3670_s20 + $0x110] sm:$0xff] %v1941_v41 }
 0x19a   : > { %v1440_v0 = vpop.f32.mrf.mxu0  ;;  %v1729_v16 = vpop.f32.mrf.mxu1 }
 0x19b   : > { %v1942_v42 = vadd.f32 %v3586_v44, %v1728_v34  ;;  %v2850_v28 = vpack.c.bf16 %v1728_v34, %v1725_v58 }
 0x19c   : > { %v1443_v13 = vpop.f32.mrf.mxu0  ;;  %v1732_v19 = vpop.f32.mrf.mxu1 }
 0x19d   : > { %2938 = vst [vmem:[%s3691_s24 + $0x88] sm:$0xff] %v2850_v28   ;;  %v1733_v4 = vadd.f32 %v1732_v19, %v1443_v13  ;;  %2006 = vst [vmem:[%s3670_s20 + $0x118] sm:$0xff] %v1942_v42 }
 0x19e   : > { %v1445_v35 = vpop.f32.mrf.mxu0  ;;  %v1734_v23 = vpop.f32.mrf.mxu1 }
 0x19f   : > { %v1943_v43 = vadd.f32 %v3589_v45, %v1733_v4 }
 0x1a0   : > { %v1446_v59 = vpop.f32.mrf.mxu0  ;;  %v1735_v6 = vpop.f32.mrf.mxu1 }
 0x1a1   : > { %v1736_v29 = vadd.f32 %v1735_v6, %v1446_v59  ;;  %2007 = vst [vmem:[%s3670_s20 + $0x120] sm:$0xff] %v1943_v43 }
 0x1a2   : > { %v1448_v11 = vpop.f32.mrf.mxu0  ;;  %v1737_v36 = vpop.f32.mrf.mxu1 }
 0x1a3   : > { %v1944_v44 = vadd.f32 %v3592_v46, %v1736_v29  ;;  %v2855_v8 = vpack.c.bf16 %v1736_v29, %v1733_v4 }
 0x1a4   : > { %v1451_v14 = vpop.f32.mrf.mxu0  ;;  %v1740_v24 = vpop.f32.mrf.mxu1 }
 0x1a5   : > { %2939 = vst [vmem:[%s3691_s24 + $0x90] sm:$0xff] %v2855_v8   ;;  %v1741_v20 = vadd.f32 %v1740_v24, %v1451_v14  ;;  %2008 = vst [vmem:[%s3670_s20 + $0x128] sm:$0xff] %v1944_v44 }
 0x1a6   : > { %v1453_v30 = vpop.f32.mrf.mxu0  ;;  %v1742_v9 = vpop.f32.mrf.mxu1 }
 0x1a7   : > { %v1945_v45 = vadd.f32 %v3595_v47, %v1741_v20 }
 0x1a8   : > { %v1454_v37 = vpop.f32.mrf.mxu0  ;;  %v1743_v62 = vpop.f32.mrf.mxu1 }
 0x1a9   : > { %v1744_v63 = vadd.f32 %v1743_v62, %v1454_v37  ;;  %2009 = vst [vmem:[%s3670_s20 + $0x130] sm:$0xff] %v1945_v45 }
 0x1aa   : > { %v1456_v17 = vpop.f32.mrf.mxu0  ;;  %v1745_v5 = vpop.f32.mrf.mxu1 }
 0x1ab   : > { %v1946_v46 = vadd.f32 %v3598_v48, %v1744_v63  ;;  %v2860_v25 = vpack.c.bf16 %v1744_v63, %v1741_v20 }
 0x1ac   : > { %v1459_v38 = vpop.f32.mrf.mxu0  ;;  %v1748_v31 = vpop.f32.mrf.mxu1 }
 0x1ad   : > { %2940 = vst [vmem:[%s3691_s24 + $0x98] sm:$0xff] %v2860_v25   ;;  %v1749_v12 = vadd.f32 %v1748_v31, %v1459_v38  ;;  %2010 = vst [vmem:[%s3670_s20 + $0x138] sm:$0xff] %v1946_v46 }
 0x1ae   : > { %v1461_v60 = vpop.f32.mrf.mxu0  ;;  %v1750_v7 = vpop.f32.mrf.mxu1 }
 0x1af   : > { %v1947_v47 = vadd.f32 %v3601_v49, %v1749_v12 }
 0x1b0   : > { %v1462_v21 = vpop.f32.mrf.mxu0  ;;  %v1751_v61 = vpop.f32.mrf.mxu1 }
 0x1b1   : > { %v1752_v39 = vadd.f32 %v1751_v61, %v1462_v21  ;;  %2011 = vst [vmem:[%s3670_s20 + $0x140] sm:$0xff] %v1947_v47 }
 0x1b2   : > { %v1464_v32 = vpop.f32.mrf.mxu0  ;;  %v1753_v26 = vpop.f32.mrf.mxu1 }
 0x1b3   : > { %v1948_v48 = vadd.f32 %v3604_v50, %v1752_v39  ;;  %v2865_v18 = vpack.c.bf16 %v1752_v39, %v1749_v12  ;;  %v3899_v39 = vld [vmem:[#allocation4_spill] sm:$0xff] }
 0x1b4   : > { %v1467_v10 = vpop.f32.mrf.mxu0  ;;  %v1756_v3 = vpop.f32.mrf.mxu1 }
 0x1b5   : > { %2941 = vst [vmem:[%s3691_s24 + $0xa0] sm:$0xff] %v2865_v18   ;;  %v1757_v40 = vadd.f32 %v1756_v3, %v1467_v10  ;;  %2012 = vst [vmem:[%s3670_s20 + $0x148] sm:$0xff] %v1948_v48 }
 0x1b6   : > { %v1469_v15 = vpop.f32.mrf.mxu0  ;;  %v1758_v2 = vpop.f32.mrf.mxu1 }
 0x1b7   : > { %v1949_v49 = vadd.f32 %v3607_v51, %v1757_v40 }
 0x1b8   : > { %v1470_v33 = vpop.f32.mrf.mxu0  ;;  %v1759_v58 = vpop.f32.mrf.mxu1 }
 0x1b9   : > { %v1760_v27 = vadd.f32 %v1759_v58, %v1470_v33  ;;  %2013 = vst [vmem:[%s3670_s20 + $0x150] sm:$0xff] %v1949_v49 }
 0x1ba   : > { %v1472_v22 = vpop.f32.mrf.mxu0  ;;  %v1761_v41 = vpop.f32.mrf.mxu1 }
 0x1bb   : > { %v1950_v50 = vadd.f32 %v3610_v52, %v1760_v27  ;;  %v2870_v1 = vpack.c.bf16 %v1760_v27, %v1757_v40  ;;  %v3900_v40 = vld [vmem:[#allocation5_spill] sm:$0xff]  ;;  %v3901_v41 = vld [vmem:[#allocation6_spill] sm:$0xff] }
 0x1bc   : > { %v1475_v57 = vpop.f32.mrf.mxu0  ;;  %v1764_v34 = vpop.f32.mrf.mxu1 }
 0x1bd   : > { %2942 = vst [vmem:[%s3691_s24 + $0xa8] sm:$0xff] %v2870_v1   ;;  %v1765_v0 = vadd.f32 %v1764_v34, %v1475_v57  ;;  %2014 = vst [vmem:[%s3670_s20 + $0x158] sm:$0xff] %v1950_v50 }
 0x1be   : > { %v1477_v16 = vpop.f32.mrf.mxu0  ;;  %v1766_v42 = vpop.f32.mrf.mxu1 }
 0x1bf   : > { %v1951_v51 = vadd.f32 %v3613_v53, %v1765_v0  ;;  %v3902_v42 = vld [vmem:[#allocation7_spill] sm:$0xff] }
 0x1c0   : > { %v1478_v28 = vpop.f32.mrf.mxu0  ;;  %v1767_v13 = vpop.f32.mrf.mxu1 }
 0x1c1   : > { %v1768_v19 = vadd.f32 %v1767_v13, %v1478_v28  ;;  %2015 = vst [vmem:[%s3670_s20 + $0x160] sm:$0xff] %v1951_v51 }
 0x1c2   : > { %v1480_v4 = vpop.f32.mrf.mxu0  ;;  %v1769_v35 = vpop.f32.mrf.mxu1 }
 0x1c3   : > { %v1952_v52 = vadd.f32 %v3616_v54, %v1768_v19  ;;  %v2875_v23 = vpack.c.bf16 %v1768_v19, %v1765_v0 }
 0x1c4   : > { %v1483_v43 = vpop.f32.mrf.mxu0  ;;  %v1772_v59 = vpop.f32.mrf.mxu1 }
 0x1c5   : > { %2943 = vst [vmem:[%s3691_s24 + $0xb0] sm:$0xff] %v2875_v23   ;;  %v1773_v6 = vadd.f32 %v1772_v59, %v1483_v43  ;;  %2016 = vst [vmem:[%s3670_s20 + $0x168] sm:$0xff] %v1952_v52  ;;  %v3903_v23 = vld [vmem:[#allocation8_spill] sm:$0xff] }
 0x1c6   : > { %v1485_v29 = vpop.f32.mrf.mxu0  ;;  %v1774_v11 = vpop.f32.mrf.mxu1 }
 0x1c7   : > { %v1953_v53 = vadd.f32 %v3619_v55, %v1773_v6  ;;  %v3897_v55 = vld [vmem:[#allocation2_spill] sm:$0xff] }
 0x1c8   : > { %v1486_v36 = vpop.f32.mrf.mxu0  ;;  %v1775_v44 = vpop.f32.mrf.mxu1 }
 0x1c9   : > { %v1776_v8 = vadd.f32 %v1775_v44, %v1486_v36  ;;  %2017 = vst [vmem:[%s3670_s20 + $0x170] sm:$0xff] %v1953_v53  ;;  %v3904_v36 = vld [vmem:[#allocation9_spill] sm:$0xff] }
 0x1ca   : > { %v1488_v14 = vpop.f32.mrf.mxu0  ;;  %v1777_v24 = vpop.f32.mrf.mxu1 }
 0x1cb   : > { %v1954_v54 = vadd.f32 %v3622_v56, %v1776_v8  ;;  %v2880_v20 = vpack.c.bf16 %v1776_v8, %v1773_v6  ;;  %v3898_v56 = vld [vmem:[#allocation3_spill] sm:$0xff] }
 0x1cc   : > { %v1491_v30 = vpop.f32.mrf.mxu0  ;;  %v1780_v9 = vpop.f32.mrf.mxu1 }
 0x1cd   : > { %2944 = vst [vmem:[%s3691_s24 + $0xb8] sm:$0xff] %v2880_v20   ;;  %v1781_v45 = vadd.f32 %v1780_v9, %v1491_v30  ;;  %2018 = vst [vmem:[%s3670_s20 + $0x178] sm:$0xff] %v1954_v54  ;;  %v3905_v9 = vld [vmem:[#allocation10_spill] sm:$0xff] }
 0x1ce   : > { %v1493_v37 = vpop.f32.mrf.mxu0  ;;  %v1782_v62 = vpop.f32.mrf.mxu1 }
 0x1cf   : > { %v1955_v63 = vadd.f32 %v3897_v55, %v1781_v45 }
 0x1d0   : > { %v1494_v17 = vpop.f32.mrf.mxu0  ;;  %v1783_v5 = vpop.f32.mrf.mxu1 }
 0x1d1   : > { %v1784_v46 = vadd.f32 %v1783_v5, %v1494_v17  ;;  %2019 = vst [vmem:[%s3670_s20 + $0x180] sm:$0xff] %v1955_v63  ;;  %v3906_v5 = vld [vmem:[#allocation11_spill] sm:$0xff] }
 0x1d2   : > { %v1496_v25 = vpop.f32.mrf.mxu0  ;;  %v1785_v38 = vpop.f32.mrf.mxu1 }
 0x1d3   : > { %v1956_v31 = vadd.f32 %v3898_v56, %v1784_v46  ;;  %v2885_v12 = vpack.c.bf16 %v1784_v46, %v1781_v45 }
 0x1d4   : > { %v1499_v60 = vpop.f32.mrf.mxu0  ;;  %v1788_v7 = vpop.f32.mrf.mxu1 }
 0x1d5   : > { %2945 = vst [vmem:[%s3691_s24 + $0xc0] sm:$0xff] %v2885_v12   ;;  %v1789_v47 = vadd.f32 %v1788_v7, %v1499_v60  ;;  %2020 = vst [vmem:[%s3670_s20 + $0x188] sm:$0xff] %v1956_v31  ;;  %v3907_v7 = vld [vmem:[#allocation12_spill] sm:$0xff] }
 0x1d6   : > { %v1501_v21 = vpop.f32.mrf.mxu0  ;;  %v1790_v61 = vpop.f32.mrf.mxu1 }
 0x1d7   : > { %v1957_v32 = vadd.f32 %v3899_v39, %v1789_v47 }
 0x1d8   : > { %v1502_v26 = vpop.f32.mrf.mxu0  ;;  %v1791_v48 = vpop.f32.mrf.mxu1 }
 0x1d9   : > { %v1792_v18 = vadd.f32 %v1791_v48, %v1502_v26  ;;  %2021 = vst [vmem:[%s3670_s20 + $0x190] sm:$0xff] %v1957_v32  ;;  %v3908_v48 = vld [vmem:[#allocation13_spill] sm:$0xff] }
 0x1da   : > { %v1504_v10 = vpop.f32.mrf.mxu0  ;;  %v1793_v3 = vpop.f32.mrf.mxu1 }
 0x1db   : > { %v1958_v15 = vadd.f32 %v3900_v40, %v1792_v18  ;;  %v2890_v2 = vpack.c.bf16 %v1792_v18, %v1789_v47 }
 0x1dc   : > { %v1507_v49 = vpop.f32.mrf.mxu0  ;;  %v1796_v33 = vpop.f32.mrf.mxu1 }
 0x1dd   : > { %2946 = vst [vmem:[%s3691_s24 + $0xc8] sm:$0xff] %v2890_v2   ;;  %v1797_v58 = vadd.f32 %v1796_v33, %v1507_v49  ;;  %2022 = vst [vmem:[%s3670_s20 + $0x198] sm:$0xff] %v1958_v15  ;;  %v3909_v33 = vld [vmem:[#allocation14_spill] sm:$0xff] }
 0x1de   : > { %v1509_v27 = vpop.f32.mrf.mxu0  ;;  %v1798_v22 = vpop.f32.mrf.mxu1 }
 0x1df   : > { %v1959_v50 = vadd.f32 %v3901_v41, %v1797_v58 }
 0x1e0   : > { %v1510_v1 = vpop.f32.mrf.mxu0  ;;  %v1799_v57 = vpop.f32.mrf.mxu1 }
 0x1e1   : > { %v1800_v34 = vadd.f32 %v1799_v57, %v1510_v1  ;;  %2023 = vst [vmem:[%s3670_s20 + $0x1a0] sm:$0xff] %v1959_v50  ;;  %v3910_v57 = vld [vmem:[#allocation15_spill] sm:$0xff] }
 0x1e2   : > { %v1512_v0 = vpop.f32.mrf.mxu0  ;;  %v1801_v16 = vpop.f32.mrf.mxu1 }
 0x1e3   : > { %v1960_v51 = vadd.f32 %v3902_v42, %v1800_v34  ;;  %v2895_v28 = vpack.c.bf16 %v1800_v34, %v1797_v58 }
 0x1e4   : > { %v1515_v13 = vpop.f32.mrf.mxu0  ;;  %v1804_v19 = vpop.f32.mrf.mxu1 }
 0x1e5   : > { %2947 = vst [vmem:[%s3691_s24 + $0xd0] sm:$0xff] %v2895_v28   ;;  %v1805_v4 = vadd.f32 %v1804_v19, %v1515_v13  ;;  %2024 = vst [vmem:[%s3670_s20 + $0x1a8] sm:$0xff] %v1960_v51  ;;  %v3911_v19 = vld [vmem:[#allocation16_spill] sm:$0xff] }
 0x1e6   : > { %v1517_v35 = vpop.f32.mrf.mxu0  ;;  %v1806_v52 = vpop.f32.mrf.mxu1 }
 0x1e7   : > { %v1961_v43 = vadd.f32 %v3903_v23, %v1805_v4 }
 0x1e8   : > { %v1518_v59 = vpop.f32.mrf.mxu0  ;;  %v1807_v6 = vpop.f32.mrf.mxu1 }
 0x1e9   : > { %v1808_v29 = vadd.f32 %v1807_v6, %v1518_v59  ;;  %2025 = vst [vmem:[%s3670_s20 + $0x1b0] sm:$0xff] %v1961_v43  ;;  %v3912_v6 = vld [vmem:[#allocation17_spill] sm:$0xff] }
 0x1ea   : > { %v1520_v11 = vpop.f32.mrf.mxu0  ;;  %v1809_v53 = vpop.f32.mrf.mxu1 }
 0x1eb   : > { %v1962_v44 = vadd.f32 %v3904_v36, %v1808_v29  ;;  %v2900_v8 = vpack.c.bf16 %v1808_v29, %v1805_v4 }
 0x1ec   : > { %v1523_v14 = vpop.f32.mrf.mxu0  ;;  %v1812_v24 = vpop.f32.mrf.mxu1 }
 0x1ed   : > { %2948 = vst [vmem:[%s3691_s24 + $0xd8] sm:$0xff] %v2900_v8   ;;  %v1813_v54 = vadd.f32 %v1812_v24, %v1523_v14  ;;  %2026 = vst [vmem:[%s3670_s20 + $0x1b8] sm:$0xff] %v1962_v44 }
 0x1ee   : > { %v1525_v20 = vpop.f32.mrf.mxu0  ;;  %v1814_v30 = vpop.f32.mrf.mxu1 }
 0x1ef   : > { %v1963_v45 = vadd.f32 %v3905_v9, %v1813_v54 }
 0x1f0   : > { %v1526_v37 = vpop.f32.mrf.mxu0  ;;  %v1815_v62 = vpop.f32.mrf.mxu1 }
 0x1f1   : > { %v1816_v55 = vadd.f32 %v1815_v62, %v1526_v37  ;;  %2027 = vst [vmem:[%s3670_s20 + $0x1c0] sm:$0xff] %v1963_v45 }
 0x1f2   : > { %v1528_v63 = vpop.f32.mrf.mxu0  ;;  %v1817_v17 = vpop.f32.mrf.mxu1 }
 0x1f3   : > { %v1964_v46 = vadd.f32 %v3906_v5, %v1816_v55  ;;  %v2905_v25 = vpack.c.bf16 %v1816_v55, %v1813_v54 }
 0x1f4   : > { %v1531_v38 = vpop.f32.mrf.mxu0  ;;  %v1820_v56 = vpop.f32.mrf.mxu1 }
 0x1f5   : > { %2949 = vst [vmem:[%s3691_s24 + $0xe0] sm:$0xff] %v2905_v25   ;;  %v1821_v31 = vadd.f32 %v1820_v56, %v1531_v38  ;;  %2028 = vst [vmem:[%s3670_s20 + $0x1c8] sm:$0xff] %v1964_v46 }
 0x1f6   : > { %v1533_v12 = vpop.f32.mrf.mxu0  ;;  %v1822_v60 = vpop.f32.mrf.mxu1 }
 0x1f7   : > { %v1965_v47 = vadd.f32 %v3907_v7, %v1821_v31 }
 0x1f8   : > { %v1534_v21 = vpop.f32.mrf.mxu0  ;;  %v1823_v61 = vpop.f32.mrf.mxu1 }
 0x1f9   : > { %v1824_v39 = vadd.f32 %v1823_v61, %v1534_v21  ;;  %2029 = vst [vmem:[%s3670_s20 + $0x1d0] sm:$0xff] %v1965_v47 }
 0x1fa   : > { %v1536_v32 = vpop.f32.mrf.mxu0  ;;  %v1825_v26 = vpop.f32.mrf.mxu1 }
 0x1fb   : > { %v1966_v18 = vadd.f32 %v3908_v48, %v1824_v39  ;;  %v2910_v10 = vpack.c.bf16 %v1824_v39, %v1821_v31 }
 0x1fc   : > { %v1539_v3 = vpop.f32.mrf.mxu0  ;;  %v1828_v40 = vpop.f32.mrf.mxu1 }
 0x1fd   : > { %2950 = vst [vmem:[%s3691_s24 + $0xe8] sm:$0xff] %v2910_v10   ;;  %v1829_v15 = vadd.f32 %v1828_v40, %v1539_v3  ;;  %2030 = vst [vmem:[%s3670_s20 + $0x1d8] sm:$0xff] %v1966_v18 }
 0x1fe   : > { %v1541_v2 = vpop.f32.mrf.mxu0  ;;  %v1830_v49 = vpop.f32.mrf.mxu1 }
 0x1ff   : > { %v1967_v58 = vadd.f32 %v3909_v33, %v1829_v15 }
 0x200   : > { %v1542_v27 = vpop.f32.mrf.mxu0  ;;  %v1831_v22 = vpop.f32.mrf.mxu1 }
 0x201   : > { %v1832_v41 = vadd.f32 %v1831_v22, %v1542_v27  ;;  %2031 = vst [vmem:[%s3670_s20 + $0x1e0] sm:$0xff] %v1967_v58 }
 0x202   : > { %v1544_v50 = vpop.f32.mrf.mxu0  ;;  %v1833_v1 = vpop.f32.mrf.mxu1 }
 0x203   : > { %v1968_v34 = vadd.f32 %v3910_v57, %v1832_v41  ;;  %v2915_v0 = vpack.c.bf16 %v1832_v41, %v1829_v15 }
 0x204   : > { %v1547_v16 = vpop.f32.mrf.mxu0  ;;  %v1836_v42 = vpop.f32.mrf.mxu1 }
 0x205   : > { %2951 = vst [vmem:[%s3691_s24 + $0xf0] sm:$0xff] %v2915_v0   ;;  %v1837_v51 = vadd.f32 %v1836_v42, %v1547_v16  ;;  %2032 = vst [vmem:[%s3670_s20 + $0x1e8] sm:$0xff] %v1968_v34 }
 0x206   : > { %v1549_v28 = vpop.f32.mrf.mxu0  ;;  %v1838_v13 = vpop.f32.mrf.mxu1 }
 0x207   : > { %v1969_v4 = vadd.f32 %v3911_v19, %v1837_v51 }
 0x208   : > { %v1550_v35 = vpop.f32.mrf.mxu0  ;;  %v1839_v52 = vpop.f32.mrf.mxu1 }
 0x209   : > { %v1840_v23 = vadd.f32 %v1839_v52, %v1550_v35  ;;  %2033 = vst [vmem:[%s3670_s20 + $0x1f0] sm:$0xff] %v1969_v4 }
 0x20a   : > { %v1552_v43 = vpop.f32.mrf.mxu0  ;;  %v1841_v59 = vpop.f32.mrf.mxu1 }
 0x20b   : > { %v1970_v29 = vadd.f32 %v3912_v6, %v1840_v23  ;;  %v2920_v11 = vpack.c.bf16 %v1840_v23, %v1837_v51 }
 0x20d   : > { %2034 = vst [vmem:[%s3670_s20 + $0x1f8] sm:$0xff] %v1970_v29  ;;  %2952 = vst [vmem:[%s3691_s24 + $0xf8] sm:$0xff] %v2920_v11  }
 0x20e PF: > { %s15_s15 = sadd.s32 1, %s3192_s15  }
 0x20f   : > { %p12_p4 = scmp.ge.s32.totalorder %s15_s15, 4  }
 0x211   :  { %14 = sbr.rel (!%p12_p4) target bundleno = 1 (0x1), region = 77 }

// kernel: hypergraph_convolution.7
= control target key start
LH: loop header
LB: loop body
LE: loop exit
PB: predicated region body
PF: predicated region fallthrough
CT: control target
= control target key end

     0   :  { %10 = vsyncpa [#allocation3], 0  ;;  %s4072_s0 = inlined_call_operand.vmem [shape: bf16[1024,512], index: 0, kind: input, shape index: {}]   ;;  %s4073_s1 = inlined_call_operand.vmem [shape: bf16[512,128], index: 1, kind: input, shape index: {}]   ;;  %s4074_s2 = inlined_call_operand.vmem [shape: f32[1024,128], index: 2, kind: input, shape index: {}, may-alias: {2,3}]   ;;  %s4075_s3 = inlined_call_operand.vmem [shape: f32[1024,128], index: 3, kind: output, shape index: {0}, may-alias: {2,3}]   ;;  %s4076_s4 = inlined_call_operand.hbm [shape: bf16[1024,128], index: 4, kind: output, shape index: {1}]  }
   0x1   :  { %12 = vsyncpa [#allocation3 + $0x1], 0  ;;  %s3330_s15 = smov 0   ;;  %s3332_s16 = smov 0  }
   0x2   :  { %s3334_s17 = smov 0   ;;  %s3336_s18 = smov 0  }
   0x3 LB: > { %s3351_s19 = sadd.s32 4294967295, %s3299_s18   ;;  %s2475_s20 = sadd.s32 4294967294, %s3299_s18   ;;  %s3299_s18 = sphi %s3336_s18, %s4114_s18   ;;  %s3295_s17 = sphi %s3334_s17, %s4113_s17   ;;  %s3291_s16 = sphi %s3332_s16, %s4112_s16   ;;  %s3287_s15 = sphi %s3330_s15, %s4111_s15  }
   0x4   : > { %s3355_s21 = sadd.s32 1, %s3299_s18   ;;  %s124_s22 = sadd.s32 1, %s3295_s17 }
   0x5   : > { %s121_s23 = ssub.s32 %s3299_s18, %s3355_s21  ;;  %p134_p0 = scmp.ne.s32.totalorder %s3295_s17, %s3291_s16 }
   0x6   : > { %p122_p1 = scmp.eq.s32.totalorder %s121_s23, 0  ;;  %p135_p2 = scmp.eq.s32.totalorder %s3351_s19, 1 }
   0x7   : > { %p140_p3 = scmp.ne.s32.totalorder %s3291_s16, %s3287_s15  ;;  %p141_p4 = scmp.eq.s32.totalorder %s2475_s20, 1 }
   0x8   : > { %s3366_s24 = scalar_select %p122_p1, %s3295_s17, %s124_s22  }
   0x9   : > { %p3368_p5 = por %p135_p2, %p134_p0  ;;  %p3372_p6 = por %p141_p4, %p140_p3 }
   0xa   : > { %p2478_p7 = scmp.ge.s32.totalorder %s3299_s18, 1  ;;  %p181_p8 = scmp.lt.s32.totalorder %s3299_s18, 3 }
   0xc   : > { %p182_p9 = pnand %p2478_p7, %p181_p8 }
   0xe   : > { %185 = sbr.rel (%p182_p9) target bundleno = 547 (0x223), region = 32 }
  0x13   : > { %v3015_v0 = vld [vmem:[%s4073_s1 + $0x38] sm:$0xff]   ;;  %v3301_v1 = vmov 0   ;;  %v3017_v3 = vld [vmem:[%s4073_s1 + $0x30] sm:$0xff]   ;;  %v3019_v5 = vld [vmem:[%s4073_s1 + $0x28] sm:$0xff]   ;;  %s2480_s30 = sshll.u32 %s3351_s19, 6  ;;  %s215_s11 = sand.u32 1, %s3291_s16  }
  0x14   : > { %1263 = vmatprep.subr.bf16.mxu0 %v3301_v1  ;;  %1552 = vmatprep.subr.bf16.mxu1 %v3301_v1  ;;  %v3016_v2 = vld [vmem:[%s4073_s1 + $0xb8] sm:$0xff]   ;;  %v3018_v4 = vld [vmem:[%s4073_s1 + $0xb0] sm:$0xff]   ;;  %v3020_v6 = vld [vmem:[%s4073_s1 + $0xa8] sm:$0xff]   ;;  %p219_p10 = scmp.lt.s32.totalorder %s2480_s30, 127  ;;  %s2479_s20 = sshll.u32 %s215_s11, 8 }
  0x15   : > { %1264 = vmatpush1.bf16.msra.mxu0 %v3015_v0  ;;  %1553 = vmatpush1.bf16.msra.mxu1 %v3016_v2  ;;  %v3021_v7 = vld [vmem:[%s4073_s1 + $0x20] sm:$0xff]   ;;  %v3023_v9 = vld [vmem:[%s4073_s1 + $0x18] sm:$0xff]   ;;  %v3025_v11 = vld [vmem:[%s4073_s1 + $0x10] sm:$0xff]   ;;  %s3302_s5 = smov [#allocation2]  }
  0x16   : > { %1265 = vmatprep.subr.bf16.mxu0 %v3301_v1  ;;  %1554 = vmatprep.subr.bf16.mxu1 %v3301_v1  ;;  %v3022_v8 = vld [vmem:[%s4073_s1 + $0xa0] sm:$0xff]   ;;  %v3024_v10 = vld [vmem:[%s4073_s1 + $0x98] sm:$0xff]   ;;  %v3026_v12 = vld [vmem:[%s4073_s1 + $0x90] sm:$0xff]   ;;  %s4116_s30 = smov (!%p219_p10, %s2480_s30), 127 }
  0x17   : > { %v3027_v13 = vld [vmem:[%s4073_s1 + $0x8] sm:$0xff]   ;;  %v3029_v15 = vld [vmem:[%s4073_s1] sm:$0xff]   ;;  %s2716_s23 = sshll.u32 %s4116_s30, 4  ;;  %v3031_v17 = vld [vmem:[%s4073_s1 + $0x78] sm:$0xff]   ;;  %s2484_s7 = sshll.u32 %s4116_s30, 3 }
  0x18   : > { %v3028_v14 = vld [vmem:[%s4073_s1 + $0x88] sm:$0xff]   ;;  %v3030_v16 = vld [vmem:[%s4073_s1 + $0x80] sm:$0xff]   ;;  %s3452_s6 = scalar_lea.vmem %s4072_s0, %s2716_s23  ;;  %v3032_v18 = vld [vmem:[%s4073_s1 + $0xf8] sm:$0xff]   ;;  %s3620_s10 = scalar_lea.vmem %s4074_s2, %s2484_s7 }
  0x19   : > { %1266 = vmatpush1.bf16.msra.mxu0 %v3017_v3  ;;  %1555 = vmatpush1.bf16.msra.mxu1 %v3018_v4  ;;  %v3049_v19 = vld [vmem:[%s3452_s6 + $0x4] ss:$16 sps:$4 sm:$0xff]   ;;  %v3052_v21 = vld [vmem:[%s3452_s6 + $0xc] ss:$16 sps:$4 sm:$0xff]   ;;  %v3047_v35 = vld [vmem:[%s3452_s6] ss:$16 sps:$4 sm:$0xff]   ;;  %s3820_s14 = scalar_lea.vmem %s4075_s3, %s2484_s7 }
  0x1a   : > { %1267 = vmatprep.subr.bf16.mxu0 %v3301_v1  ;;  %1556 = vmatprep.subr.bf16.mxu1 %v3301_v1  ;;  %v3033_v20 = vld [vmem:[%s4073_s1 + $0x70] sm:$0xff]   ;;  %v3035_v23 = vld [vmem:[%s4073_s1 + $0x68] sm:$0xff]   ;;  %v3037_v25 = vld [vmem:[%s4073_s1 + $0x60] sm:$0xff]   ;;  %s3840_s30 = scalar_lea.vmem [#allocation2], %s2479_s20  ;;  %s3243_s7 = sshll.u32 %s3302_s5, 4  ;;  %s3244_s7 = int_to_ptr.vmem [resolvable:$false] %s3243_s7 }
  0x1b   : > { %v3034_v22 = vld [vmem:[%s4073_s1 + $0xf0] sm:$0xff]   ;;  %1295 = vmatprep.mubr.bf16.mxu0 %v3049_v19  ;;  %1584 = vmatprep.mubr.bf16.mxu1 %v3052_v21  ;;  %v3036_v24 = vld [vmem:[%s4073_s1 + $0xe8] sm:$0xff]   ;;  %v3038_v26 = vld [vmem:[%s4073_s1 + $0xe0] sm:$0xff]   ;;  %s2376_s22 = sshll.u32 %s3840_s30, 4  ;;  %s3245_s8 = scalar_lea.vmem %s3244_s7, 8192  ;;  %s4025_s22 = int_to_ptr.vmem [resolvable:$true] %s2376_s22 }
  0x1c   : > { %v3039_v27 = vld [vmem:[%s4073_s1 + $0x58] sm:$0xff]   ;;  %v3041_v29 = vld [vmem:[%s4073_s1 + $0x50] sm:$0xff]   ;;  %v3043_v31 = vld [vmem:[%s4073_s1 + $0x48] sm:$0xff]   ;;  %s3239_s29 = scalar_lea.vmem %s4025_s22, 4096  ;;  %p3246_p0 = scmp.lt.s32.totalorder %s4025_s22, %s3244_s7 }
  0x1d   : > { %1268 = vmatpush1.bf16.msra.mxu0 %v3019_v5  ;;  %1557 = vmatpush1.bf16.msra.mxu1 %v3020_v6  ;;  %v3040_v28 = vld [vmem:[%s4073_s1 + $0xd8] sm:$0xff]   ;;  %v3042_v30 = vld [vmem:[%s4073_s1 + $0xd0] sm:$0xff]   ;;  %v3044_v32 = vld [vmem:[%s4073_s1 + $0xc8] sm:$0xff]   ;;  %p3240_p11 = scmp.ne.s32.totalorder %s4025_s22, %s3239_s29  ;;  %p3247_p1 = scmp.lt.s32.totalorder %s3245_s8, %s3239_s29 }
  0x1e   : > { %1269 = vmatprep.subr.bf16.mxu0 %v3301_v1  ;;  %1558 = vmatprep.subr.bf16.mxu1 %v3301_v1  ;;  %v3045_v33 = vld [vmem:[%s4073_s1 + $0x40] sm:$0xff]   ;;  %v3050_v36 = vld [vmem:[%s3452_s6 + $0x8] ss:$16 sps:$4 sm:$0xff]   ;;  %v3055_v38 = vld [vmem:[%s3452_s6 + $0x2c] ss:$16 sps:$4 sm:$0xff]  }
  0x1f   : > { %v3046_v34 = vld [vmem:[%s4073_s1 + $0xc0] sm:$0xff]   ;;  %v3058_v40 = vld [vmem:[%s3452_s6 + $0x28] ss:$16 sps:$4 sm:$0xff]   ;;  %v3061_v42 = vld [vmem:[%s3452_s6 + $0x4c] ss:$16 sps:$4 sm:$0xff]   ;;  %p3241_p12 = pnand %p3240_p11, %p3368_p5  ;;  %p3248_p2 = por %p3247_p1, %p3246_p0 }
  0x20   : > { %v3053_v37 = vld [vmem:[%s3452_s6 + $0x24] ss:$16 sps:$4 sm:$0xff]   ;;  %v3057_v39 = vld [vmem:[%s3452_s6 + $0x20] ss:$16 sps:$4 sm:$0xff]   ;;  %v3064_v44 = vld [vmem:[%s3452_s6 + $0x48] ss:$16 sps:$4 sm:$0xff]  }
  0x21   : > { %1270 = vmatpush1.bf16.msra.mxu0 %v3021_v7  ;;  %1559 = vmatpush1.bf16.msra.mxu1 %v3022_v8  ;;  %v3059_v41 = vld [vmem:[%s3452_s6 + $0x44] ss:$16 sps:$4 sm:$0xff]   ;;  %v3063_v43 = vld [vmem:[%s3452_s6 + $0x40] ss:$16 sps:$4 sm:$0xff]   ;;  %v3067_v46 = vld [vmem:[%s3452_s6 + $0x6c] ss:$16 sps:$4 sm:$0xff]   ;;  %p3242_p13 = pneg %p3241_p12 }
  0x22   : > { %1271 = vmatprep.subr.bf16.mxu0 %v3301_v1  ;;  %1560 = vmatprep.subr.bf16.mxu1 %v3301_v1  ;;  %v3065_v45 = vld [vmem:[%s3452_s6 + $0x64] ss:$16 sps:$4 sm:$0xff]   ;;  %v3069_v47 = vld [vmem:[%s3452_s6 + $0x60] ss:$16 sps:$4 sm:$0xff]   ;;  %v3070_v48 = vld [vmem:[%s3452_s6 + $0x68] ss:$16 sps:$4 sm:$0xff]  }
  0x23   : > { %v3071_v49 = vld [vmem:[%s3452_s6 + $0x84] ss:$16 sps:$4 sm:$0xff]   ;;  %v3073_v50 = vld [vmem:[%s3452_s6 + $0x8c] ss:$16 sps:$4 sm:$0xff]   ;;  %v3075_v51 = vld [vmem:[%s3452_s6 + $0x80] ss:$16 sps:$4 sm:$0xff]   ;;  %p3249_p3 = pnand %p3248_p2, %p3242_p13 }
  0x24   : > { %v3076_v52 = vld [vmem:[%s3452_s6 + $0x88] ss:$16 sps:$4 sm:$0xff]   ;;  %v3077_v53 = vld [vmem:[%s3452_s6 + $0xa4] ss:$16 sps:$4 sm:$0xff]   ;;  %v3079_v54 = vld [vmem:[%s3452_s6 + $0xac] ss:$16 sps:$4 sm:$0xff]  }
  0x25   : > { %1272 = vmatpush1.bf16.msra.mxu0 %v3023_v9  ;;  %1561 = vmatpush1.bf16.msra.mxu1 %v3024_v10  ;;  %v3081_v55 = vld [vmem:[%s3452_s6 + $0xa0] ss:$16 sps:$4 sm:$0xff]   ;;  %v3082_v56 = vld [vmem:[%s3452_s6 + $0xa8] ss:$16 sps:$4 sm:$0xff]   ;;  %v3083_v57 = vld [vmem:[%s3452_s6 + $0xc4] ss:$16 sps:$4 sm:$0xff]  }
  0x26   : > { %1273 = vmatprep.subr.bf16.mxu0 %v3301_v1  ;;  %1562 = vmatprep.subr.bf16.mxu1 %v3301_v1  ;;  %v3085_v58 = vld [vmem:[%s3452_s6 + $0xcc] ss:$16 sps:$4 sm:$0xff]   ;;  %v3087_v59 = vld [vmem:[%s3452_s6 + $0xc0] ss:$16 sps:$4 sm:$0xff]   ;;  %v3088_v60 = vld [vmem:[%s3452_s6 + $0xc8] ss:$16 sps:$4 sm:$0xff]  }
  0x27   : > { %v3089_v61 = vld [vmem:[%s3452_s6 + $0xe4] ss:$16 sps:$4 sm:$0xff]   ;;  %v3091_v62 = vld [vmem:[%s3452_s6 + $0xec] ss:$16 sps:$4 sm:$0xff]   ;;  %v3093_v63 = vld [vmem:[%s3452_s6 + $0xe0] ss:$16 sps:$4 sm:$0xff]  }
  0x28   : > { %v3094_v0 = vld [vmem:[%s3452_s6 + $0xe8] ss:$16 sps:$4 sm:$0xff]   ;;  %v3097_v2 = vld [vmem:[%s3452_s6 + $0x10c] ss:$16 sps:$4 sm:$0xff]   ;;  %v3099_v3 = vld [vmem:[%s3452_s6 + $0x100] ss:$16 sps:$4 sm:$0xff]  }
  0x29   : > { %1274 = vmatpush1.bf16.msra.mxu0 %v3025_v11  ;;  %1563 = vmatpush1.bf16.msra.mxu1 %v3026_v12  ;;  %v3100_v4 = vld [vmem:[%s3452_s6 + $0x108] ss:$16 sps:$4 sm:$0xff]   ;;  %v3101_v5 = vld [vmem:[%s3452_s6 + $0x124] ss:$16 sps:$4 sm:$0xff]   ;;  %v3103_v6 = vld [vmem:[%s3452_s6 + $0x12c] ss:$16 sps:$4 sm:$0xff]  }
  0x2a   : > { %1275 = vmatprep.subr.bf16.mxu0 %v3301_v1  ;;  %1564 = vmatprep.subr.bf16.mxu1 %v3301_v1  ;;  %v3105_v7 = vld [vmem:[%s3452_s6 + $0x120] ss:$16 sps:$4 sm:$0xff]   ;;  %v3106_v8 = vld [vmem:[%s3452_s6 + $0x128] ss:$16 sps:$4 sm:$0xff]   ;;  %v3107_v9 = vld [vmem:[%s3452_s6 + $0x144] ss:$16 sps:$4 sm:$0xff]  }
  0x2b   : > { %v3109_v10 = vld [vmem:[%s3452_s6 + $0x14c] ss:$16 sps:$4 sm:$0xff]   ;;  %v3111_v11 = vld [vmem:[%s3452_s6 + $0x140] ss:$16 sps:$4 sm:$0xff]   ;;  %v3112_v12 = vld [vmem:[%s3452_s6 + $0x148] ss:$16 sps:$4 sm:$0xff]  }
  0x2c   : > { %v3123_v19 = vld [vmem:[%s3452_s6 + $0x180] ss:$16 sps:$4 sm:$0xff]   ;;  %v3125_v21 = vld [vmem:[%s3452_s6 + $0x1a4] ss:$16 sps:$4 sm:$0xff]  }
  0x2d   : > { %1276 = vmatpush1.bf16.msra.mxu0 %v3027_v13  ;;  %1565 = vmatpush1.bf16.msra.mxu1 %v3028_v14  ;;  %v3113_v13 = vld [vmem:[%s3452_s6 + $0x164] ss:$16 sps:$4 sm:$0xff]   ;;  %v3115_v14 = vld [vmem:[%s3452_s6 + $0x16c] ss:$16 sps:$4 sm:$0xff]  }
  0x2e   : > { %1277 = vmatprep.subr.bf16.mxu0 %v3301_v1  ;;  %1566 = vmatprep.subr.bf16.mxu1 %v3301_v1 }
  0x31   : > { %1278 = vmatpush1.bf16.msra.mxu0 %v3029_v15  ;;  %1567 = vmatpush1.bf16.msra.mxu1 %v3030_v16  ;;  %v3117_v15 = vld [vmem:[%s3452_s6 + $0x160] ss:$16 sps:$4 sm:$0xff]   ;;  %v3118_v16 = vld [vmem:[%s3452_s6 + $0x168] ss:$16 sps:$4 sm:$0xff]  }
  0x32   : > { %1279 = vmatprep.subr.bf16.mxu0 %v3301_v1  ;;  %1568 = vmatprep.subr.bf16.mxu1 %v3301_v1 }
  0x35   : > { %1280 = vmatpush2.bf16.msra.mxu0 %v3031_v17  ;;  %1569 = vmatpush2.bf16.msra.mxu1 %v3032_v18  ;;  %v3119_v17 = vld [vmem:[%s3452_s6 + $0x184] ss:$16 sps:$4 sm:$0xff]   ;;  %v3121_v18 = vld [vmem:[%s3452_s6 + $0x18c] ss:$16 sps:$4 sm:$0xff]  }
  0x36   : > { %1281 = vmatprep.subr.bf16.mxu0 %v3301_v1  ;;  %1570 = vmatprep.subr.bf16.mxu1 %v3301_v1 }
  0x39   : > { %1282 = vmatpush2.bf16.msra.mxu0 %v3033_v20  ;;  %1571 = vmatpush2.bf16.msra.mxu1 %v3034_v22  ;;  %v3124_v20 = vld [vmem:[%s3452_s6 + $0x188] ss:$16 sps:$4 sm:$0xff]   ;;  %v3127_v22 = vld [vmem:[%s3452_s6 + $0x1ac] ss:$16 sps:$4 sm:$0xff]  }
  0x3a   : > { %1283 = vmatprep.subr.bf16.mxu0 %v3301_v1  ;;  %1572 = vmatprep.subr.bf16.mxu1 %v3301_v1 }
  0x3d   : > { %1284 = vmatpush2.bf16.msra.mxu0 %v3035_v23  ;;  %1573 = vmatpush2.bf16.msra.mxu1 %v3036_v24  ;;  %v3129_v23 = vld [vmem:[%s3452_s6 + $0x1a0] ss:$16 sps:$4 sm:$0xff]   ;;  %v3130_v24 = vld [vmem:[%s3452_s6 + $0x1a8] ss:$16 sps:$4 sm:$0xff]  }
  0x3e   : > { %1285 = vmatprep.subr.bf16.mxu0 %v3301_v1  ;;  %1574 = vmatprep.subr.bf16.mxu1 %v3301_v1 }
  0x41   : > { %1286 = vmatpush2.bf16.msra.mxu0 %v3037_v25  ;;  %1575 = vmatpush2.bf16.msra.mxu1 %v3038_v26  ;;  %v3131_v25 = vld [vmem:[%s3452_s6 + $0x1c4] ss:$16 sps:$4 sm:$0xff]   ;;  %v3133_v26 = vld [vmem:[%s3452_s6 + $0x1cc] ss:$16 sps:$4 sm:$0xff]  }
  0x42   : > { %1287 = vmatprep.subr.bf16.mxu0 %v3301_v1  ;;  %1576 = vmatprep.subr.bf16.mxu1 %v3301_v1 }
  0x45   : > { %1288 = vmatpush2.bf16.msra.mxu0 %v3039_v27  ;;  %1577 = vmatpush2.bf16.msra.mxu1 %v3040_v28  ;;  %v3135_v27 = vld [vmem:[%s3452_s6 + $0x1c0] ss:$16 sps:$4 sm:$0xff]   ;;  %v3136_v28 = vld [vmem:[%s3452_s6 + $0x1c8] ss:$16 sps:$4 sm:$0xff]  }
  0x46   : > { %1289 = vmatprep.subr.bf16.mxu0 %v3301_v1  ;;  %1578 = vmatprep.subr.bf16.mxu1 %v3301_v1 }
  0x49   : > { %1290 = vmatpush2.bf16.msra.mxu0 %v3041_v29  ;;  %1579 = vmatpush2.bf16.msra.mxu1 %v3042_v30  ;;  %v3137_v29 = vld [vmem:[%s3452_s6 + $0x1e4] ss:$16 sps:$4 sm:$0xff]   ;;  %v3139_v30 = vld [vmem:[%s3452_s6 + $0x1ec] ss:$16 sps:$4 sm:$0xff]  }
  0x4a   : > { %1291 = vmatprep.subr.bf16.mxu0 %v3301_v1  ;;  %1580 = vmatprep.subr.bf16.mxu1 %v3301_v1 }
  0x4d   : > { %1292 = vmatpush2.bf16.msra.mxu0 %v3043_v31  ;;  %1581 = vmatpush2.bf16.msra.mxu1 %v3044_v32  ;;  %v3141_v31 = vld [vmem:[%s3452_s6 + $0x1e0] ss:$16 sps:$4 sm:$0xff]   ;;  %v3142_v32 = vld [vmem:[%s3452_s6 + $0x1e8] ss:$16 sps:$4 sm:$0xff]  }
  0x4e   : > { %1293 = vmatprep.subr.bf16.mxu0 %v3301_v1  ;;  %1582 = vmatprep.subr.bf16.mxu1 %v3301_v1  ;;  %v3095_v1 = vld [vmem:[%s3452_s6 + $0x104] ss:$16 sps:$4 sm:$0xff]  }
  0x51   : > { %1294 = vmatpush2.bf16.msra.mxu0 %v3045_v33  ;;  %1583 = vmatpush2.bf16.msra.mxu1 %v3046_v34  ;;  %v3143_v33 = vld [vmem:[%s3452_s6 + $0x204] ss:$16 sps:$4 sm:$0xff]   ;;  %v3145_v34 = vld [vmem:[%s3452_s6 + $0x20c] ss:$16 sps:$4 sm:$0xff]  }
  0x54   : > { %1296 = vmatmul.mubr.bf16.vlgmr.msra.gmra.mxu0 %v3047_v35  ;;  %1585 = vmatmul.mubr.bf16.vlgmr.msra.gmra.mxu1 %v3050_v36  ;;  %v3147_v35 = vld [vmem:[%s3452_s6 + $0x200] ss:$16 sps:$4 sm:$0xff]   ;;  %v3148_v36 = vld [vmem:[%s3452_s6 + $0x208] ss:$16 sps:$4 sm:$0xff]  }
  0x55   : > { %1303 = vmatprep.mubr.bf16.mxu0 %v3053_v37  ;;  %1592 = vmatprep.mubr.bf16.mxu1 %v3055_v38  ;;  %v3149_v37 = vld [vmem:[%s3452_s6 + $0x224] ss:$16 sps:$4 sm:$0xff]   ;;  %v3151_v38 = vld [vmem:[%s3452_s6 + $0x22c] ss:$16 sps:$4 sm:$0xff]  }
  0x5c   : > { %1304 = vmatmul.mubr.bf16.gmra.mxu0 %v3057_v39  ;;  %1593 = vmatmul.mubr.bf16.gmra.mxu1 %v3058_v40  ;;  %v3153_v39 = vld [vmem:[%s3452_s6 + $0x220] ss:$16 sps:$4 sm:$0xff]   ;;  %v3154_v40 = vld [vmem:[%s3452_s6 + $0x228] ss:$16 sps:$4 sm:$0xff]  }
  0x5d   : > { %1311 = vmatprep.mubr.bf16.mxu0 %v3059_v41  ;;  %1600 = vmatprep.mubr.bf16.mxu1 %v3061_v42  ;;  %v3155_v41 = vld [vmem:[%s3452_s6 + $0x244] ss:$16 sps:$4 sm:$0xff]   ;;  %v3157_v42 = vld [vmem:[%s3452_s6 + $0x24c] ss:$16 sps:$4 sm:$0xff]  }
  0x64   : > { %1312 = vmatmul.mubr.bf16.gmra.mxu0 %v3063_v43  ;;  %1601 = vmatmul.mubr.bf16.gmra.mxu1 %v3064_v44  ;;  %v3159_v43 = vld [vmem:[%s3452_s6 + $0x240] ss:$16 sps:$4 sm:$0xff]   ;;  %v3160_v44 = vld [vmem:[%s3452_s6 + $0x248] ss:$16 sps:$4 sm:$0xff]  }
  0x65   : > { %1319 = vmatprep.mubr.bf16.mxu0 %v3065_v45  ;;  %1608 = vmatprep.mubr.bf16.mxu1 %v3067_v46  ;;  %v3161_v45 = vld [vmem:[%s3452_s6 + $0x264] ss:$16 sps:$4 sm:$0xff]   ;;  %v3163_v46 = vld [vmem:[%s3452_s6 + $0x26c] ss:$16 sps:$4 sm:$0xff]  }
  0x6c   : > { %1320 = vmatmul.mubr.bf16.gmra.mxu0 %v3069_v47  ;;  %1609 = vmatmul.mubr.bf16.gmra.mxu1 %v3070_v48  ;;  %v3165_v47 = vld [vmem:[%s3452_s6 + $0x260] ss:$16 sps:$4 sm:$0xff]   ;;  %v3166_v48 = vld [vmem:[%s3452_s6 + $0x268] ss:$16 sps:$4 sm:$0xff]  }
  0x6d   : > { %1327 = vmatprep.mubr.bf16.mxu0 %v3071_v49  ;;  %1616 = vmatprep.mubr.bf16.mxu1 %v3073_v50  ;;  %v3167_v49 = vld [vmem:[%s3452_s6 + $0x284] ss:$16 sps:$4 sm:$0xff]   ;;  %v3169_v50 = vld [vmem:[%s3452_s6 + $0x28c] ss:$16 sps:$4 sm:$0xff]  }
  0x74   : > { %1328 = vmatmul.mubr.bf16.gmra.mxu0 %v3075_v51  ;;  %1617 = vmatmul.mubr.bf16.gmra.mxu1 %v3076_v52  ;;  %v3171_v51 = vld [vmem:[%s3452_s6 + $0x280] ss:$16 sps:$4 sm:$0xff]   ;;  %v3172_v52 = vld [vmem:[%s3452_s6 + $0x288] ss:$16 sps:$4 sm:$0xff]  }
  0x75   : > { %1335 = vmatprep.mubr.bf16.mxu0 %v3077_v53  ;;  %1624 = vmatprep.mubr.bf16.mxu1 %v3079_v54  ;;  %v3173_v53 = vld [vmem:[%s3452_s6 + $0x2a4] ss:$16 sps:$4 sm:$0xff]   ;;  %v3175_v54 = vld [vmem:[%s3452_s6 + $0x2ac] ss:$16 sps:$4 sm:$0xff]  }
  0x7c   : > { %1336 = vmatmul.mubr.bf16.gmra.mxu0 %v3081_v55  ;;  %1625 = vmatmul.mubr.bf16.gmra.mxu1 %v3082_v56  ;;  %v3177_v55 = vld [vmem:[%s3452_s6 + $0x2a0] ss:$16 sps:$4 sm:$0xff]   ;;  %v3178_v56 = vld [vmem:[%s3452_s6 + $0x2a8] ss:$16 sps:$4 sm:$0xff]  }
  0x7d   : > { %1343 = vmatprep.mubr.bf16.mxu0 %v3083_v57  ;;  %1632 = vmatprep.mubr.bf16.mxu1 %v3085_v58  ;;  %v3179_v57 = vld [vmem:[%s3452_s6 + $0x2c4] ss:$16 sps:$4 sm:$0xff]   ;;  %v3181_v58 = vld [vmem:[%s3452_s6 + $0x2cc] ss:$16 sps:$4 sm:$0xff]  }
  0x84   : > { %1344 = vmatmul.mubr.bf16.gmra.mxu0 %v3087_v59  ;;  %1633 = vmatmul.mubr.bf16.gmra.mxu1 %v3088_v60  ;;  %v3183_v59 = vld [vmem:[%s3452_s6 + $0x2c0] ss:$16 sps:$4 sm:$0xff]   ;;  %v3184_v60 = vld [vmem:[%s3452_s6 + $0x2c8] ss:$16 sps:$4 sm:$0xff]  }
  0x85   : > { %1351 = vmatprep.mubr.bf16.mxu0 %v3089_v61  ;;  %1640 = vmatprep.mubr.bf16.mxu1 %v3091_v62  ;;  %v3185_v61 = vld [vmem:[%s3452_s6 + $0x2e4] ss:$16 sps:$4 sm:$0xff]   ;;  %v3187_v62 = vld [vmem:[%s3452_s6 + $0x2ec] ss:$16 sps:$4 sm:$0xff]  }
  0x8c   : > { %1352 = vmatmul.mubr.bf16.gmra.mxu0 %v3093_v63  ;;  %1641 = vmatmul.mubr.bf16.gmra.mxu1 %v3094_v0  ;;  %v3189_v63 = vld [vmem:[%s3452_s6 + $0x2e0] ss:$16 sps:$4 sm:$0xff]   ;;  %v3190_v0 = vld [vmem:[%s3452_s6 + $0x2e8] ss:$16 sps:$4 sm:$0xff]  }
  0x8d   : > { %1359 = vmatprep.mubr.bf16.mxu0 %v3095_v1  ;;  %1648 = vmatprep.mubr.bf16.mxu1 %v3097_v2  ;;  %v3191_v1 = vld [vmem:[%s3452_s6 + $0x304] ss:$16 sps:$4 sm:$0xff]   ;;  %v3193_v2 = vld [vmem:[%s3452_s6 + $0x30c] ss:$16 sps:$4 sm:$0xff]  }
  0x94   : > { %1360 = vmatmul.mubr.bf16.gmra.mxu0 %v3099_v3  ;;  %1649 = vmatmul.mubr.bf16.gmra.mxu1 %v3100_v4  ;;  %v3195_v3 = vld [vmem:[%s3452_s6 + $0x300] ss:$16 sps:$4 sm:$0xff]   ;;  %v3196_v4 = vld [vmem:[%s3452_s6 + $0x308] ss:$16 sps:$4 sm:$0xff]  }
  0x95   : > { %1367 = vmatprep.mubr.bf16.mxu0 %v3101_v5  ;;  %1656 = vmatprep.mubr.bf16.mxu1 %v3103_v6  ;;  %v3197_v5 = vld [vmem:[%s3452_s6 + $0x324] ss:$16 sps:$4 sm:$0xff]   ;;  %v3625_v6 = vld [vmem:[%s3452_s6 + $0x32c] ss:$16 sps:$4 sm:$0xff]  }
  0x9c   : > { %1368 = vmatmul.mubr.bf16.gmra.mxu0 %v3105_v7  ;;  %1657 = vmatmul.mubr.bf16.gmra.mxu1 %v3106_v8  ;;  %v3630_v8 = vld [vmem:[%s3620_s10] sm:$0xff] }
  0x9d   : > { %1375 = vmatprep.mubr.bf16.mxu0 %v3107_v9  ;;  %1664 = vmatprep.mubr.bf16.mxu1 %v3109_v10  ;;  %v3634_v10 = vld [vmem:[%s3620_s10 + $0x8] sm:$0xff] }
  0xa4   : > { %1376 = vmatmul.mubr.bf16.gmra.mxu0 %v3111_v11  ;;  %1665 = vmatmul.mubr.bf16.gmra.mxu1 %v3112_v12  ;;  %v3637_v11 = vld [vmem:[%s3620_s10 + $0x10] sm:$0xff]  ;;  %v3640_v12 = vld [vmem:[%s3620_s10 + $0x18] sm:$0xff] }
  0xa5   : > { %1383 = vmatprep.mubr.bf16.mxu0 %v3113_v13  ;;  %1672 = vmatprep.mubr.bf16.mxu1 %v3115_v14  ;;  %v3643_v13 = vld [vmem:[%s3620_s10 + $0x20] sm:$0xff]  ;;  %v3646_v14 = vld [vmem:[%s3620_s10 + $0x28] sm:$0xff] }
  0xac   : > { %1384 = vmatmul.mubr.bf16.gmra.mxu0 %v3117_v15  ;;  %1673 = vmatmul.mubr.bf16.gmra.mxu1 %v3118_v16  ;;  %v3649_v15 = vld [vmem:[%s3620_s10 + $0x30] sm:$0xff]  ;;  %v3652_v16 = vld [vmem:[%s3620_s10 + $0x38] sm:$0xff] }
  0xad   : > { %1391 = vmatprep.mubr.bf16.mxu0 %v3119_v17  ;;  %1680 = vmatprep.mubr.bf16.mxu1 %v3121_v18  ;;  %v3655_v17 = vld [vmem:[%s3620_s10 + $0x40] sm:$0xff]  ;;  %v3658_v18 = vld [vmem:[%s3620_s10 + $0x48] sm:$0xff] }
  0xb4   : > { %1392 = vmatmul.mubr.bf16.gmra.mxu0 %v3123_v19  ;;  %1681 = vmatmul.mubr.bf16.gmra.mxu1 %v3124_v20  ;;  %v3661_v19 = vld [vmem:[%s3620_s10 + $0x50] sm:$0xff]  ;;  %v3664_v20 = vld [vmem:[%s3620_s10 + $0x58] sm:$0xff] }
  0xb5   : > { %1399 = vmatprep.mubr.bf16.mxu0 %v3125_v21  ;;  %1688 = vmatprep.mubr.bf16.mxu1 %v3127_v22  ;;  %v3667_v21 = vld [vmem:[%s3620_s10 + $0x60] sm:$0xff]  ;;  %v3670_v22 = vld [vmem:[%s3620_s10 + $0x68] sm:$0xff] }
  0xbc   : > { %1400 = vmatmul.mubr.bf16.gmra.mxu0 %v3129_v23  ;;  %1689 = vmatmul.mubr.bf16.gmra.mxu1 %v3130_v24  ;;  %v3673_v23 = vld [vmem:[%s3620_s10 + $0x70] sm:$0xff]  ;;  %v3676_v24 = vld [vmem:[%s3620_s10 + $0x78] sm:$0xff] }
  0xbd   : > { %1407 = vmatprep.mubr.bf16.mxu0 %v3131_v25  ;;  %1696 = vmatprep.mubr.bf16.mxu1 %v3133_v26  ;;  %v3679_v25 = vld [vmem:[%s3620_s10 + $0x80] sm:$0xff]  ;;  %v3682_v26 = vld [vmem:[%s3620_s10 + $0x88] sm:$0xff] }
  0xc4   : > { %1408 = vmatmul.mubr.bf16.gmra.mxu0 %v3135_v27  ;;  %1697 = vmatmul.mubr.bf16.gmra.mxu1 %v3136_v28  ;;  %v3685_v27 = vld [vmem:[%s3620_s10 + $0x90] sm:$0xff]  ;;  %v3688_v28 = vld [vmem:[%s3620_s10 + $0x98] sm:$0xff] }
  0xc5   : > { %1415 = vmatprep.mubr.bf16.mxu0 %v3137_v29  ;;  %1704 = vmatprep.mubr.bf16.mxu1 %v3139_v30  ;;  %v3691_v29 = vld [vmem:[%s3620_s10 + $0xa0] sm:$0xff]  ;;  %v3694_v30 = vld [vmem:[%s3620_s10 + $0xa8] sm:$0xff] }
  0xcc   : > { %1416 = vmatmul.mubr.bf16.gmra.mxu0 %v3141_v31  ;;  %1705 = vmatmul.mubr.bf16.gmra.mxu1 %v3142_v32  ;;  %v3697_v31 = vld [vmem:[%s3620_s10 + $0xb0] sm:$0xff]  ;;  %v3700_v32 = vld [vmem:[%s3620_s10 + $0xb8] sm:$0xff] }
  0xcd   : > { %1423 = vmatprep.mubr.bf16.mxu0 %v3143_v33  ;;  %1712 = vmatprep.mubr.bf16.mxu1 %v3145_v34  ;;  %v3703_v33 = vld [vmem:[%s3620_s10 + $0xc0] sm:$0xff]  ;;  %v3706_v34 = vld [vmem:[%s3620_s10 + $0xc8] sm:$0xff] }
  0xd4   : > { %1424 = vmatmul.mubr.bf16.gmra.mxu0 %v3147_v35  ;;  %1713 = vmatmul.mubr.bf16.gmra.mxu1 %v3148_v36  ;;  %v3709_v35 = vld [vmem:[%s3620_s10 + $0xd0] sm:$0xff]  ;;  %v3712_v36 = vld [vmem:[%s3620_s10 + $0xd8] sm:$0xff] }
  0xd5   : > { %1431 = vmatprep.mubr.bf16.mxu0 %v3149_v37  ;;  %1720 = vmatprep.mubr.bf16.mxu1 %v3151_v38  ;;  %v3715_v37 = vld [vmem:[%s3620_s10 + $0xe0] sm:$0xff]  ;;  %v3718_v38 = vld [vmem:[%s3620_s10 + $0xe8] sm:$0xff] }
  0xdc   : > { %1432 = vmatmul.mubr.bf16.gmra.mxu0 %v3153_v39  ;;  %1721 = vmatmul.mubr.bf16.gmra.mxu1 %v3154_v40  ;;  %v3721_v39 = vld [vmem:[%s3620_s10 + $0xf0] sm:$0xff]  ;;  %v3724_v40 = vld [vmem:[%s3620_s10 + $0xf8] sm:$0xff] }
  0xdd   : > { %1439 = vmatprep.mubr.bf16.mxu0 %v3155_v41  ;;  %1728 = vmatprep.mubr.bf16.mxu1 %v3157_v42  ;;  %v3727_v41 = vld [vmem:[%s3620_s10 + $0x100] sm:$0xff]  ;;  %v3730_v42 = vld [vmem:[%s3620_s10 + $0x108] sm:$0xff] }
  0xe4   : > { %1440 = vmatmul.mubr.bf16.gmra.mxu0 %v3159_v43  ;;  %1729 = vmatmul.mubr.bf16.gmra.mxu1 %v3160_v44  ;;  %v3733_v43 = vld [vmem:[%s3620_s10 + $0x110] sm:$0xff]  ;;  %v3736_v44 = vld [vmem:[%s3620_s10 + $0x118] sm:$0xff] }
  0xe5   : > { %1447 = vmatprep.mubr.bf16.mxu0 %v3161_v45  ;;  %1736 = vmatprep.mubr.bf16.mxu1 %v3163_v46  ;;  %v3739_v45 = vld [vmem:[%s3620_s10 + $0x120] sm:$0xff]  ;;  %v3742_v46 = vld [vmem:[%s3620_s10 + $0x128] sm:$0xff] }
  0xec   : > { %1448 = vmatmul.mubr.bf16.gmra.mxu0 %v3165_v47  ;;  %1737 = vmatmul.mubr.bf16.gmra.mxu1 %v3166_v48  ;;  %v3745_v47 = vld [vmem:[%s3620_s10 + $0x130] sm:$0xff]  ;;  %v3748_v48 = vld [vmem:[%s3620_s10 + $0x138] sm:$0xff] }
  0xed   : > { %1455 = vmatprep.mubr.bf16.mxu0 %v3167_v49  ;;  %1744 = vmatprep.mubr.bf16.mxu1 %v3169_v50  ;;  %v3751_v49 = vld [vmem:[%s3620_s10 + $0x140] sm:$0xff]  ;;  %v3754_v50 = vld [vmem:[%s3620_s10 + $0x148] sm:$0xff] }
  0xf4   : > { %1456 = vmatmul.mubr.bf16.gmra.mxu0 %v3171_v51  ;;  %1745 = vmatmul.mubr.bf16.gmra.mxu1 %v3172_v52  ;;  %v3757_v51 = vld [vmem:[%s3620_s10 + $0x150] sm:$0xff]  ;;  %v3760_v52 = vld [vmem:[%s3620_s10 + $0x158] sm:$0xff] }
  0xf5   : > { %1463 = vmatprep.mubr.bf16.mxu0 %v3173_v53  ;;  %1752 = vmatprep.mubr.bf16.mxu1 %v3175_v54  ;;  %v3763_v53 = vld [vmem:[%s3620_s10 + $0x160] sm:$0xff]  ;;  %v3766_v54 = vld [vmem:[%s3620_s10 + $0x168] sm:$0xff] }
  0xfc   : > { %1464 = vmatmul.mubr.bf16.gmra.mxu0 %v3177_v55  ;;  %1753 = vmatmul.mubr.bf16.gmra.mxu1 %v3178_v56  ;;  %v3769_v55 = vld [vmem:[%s3620_s10 + $0x170] sm:$0xff]  ;;  %v3772_v56 = vld [vmem:[%s3620_s10 + $0x178] sm:$0xff] }
  0xfd   : > { %1471 = vmatprep.mubr.bf16.mxu0 %v3179_v57  ;;  %1760 = vmatprep.mubr.bf16.mxu1 %v3181_v58  ;;  %v3775_v57 = vld [vmem:[%s3620_s10 + $0x180] sm:$0xff]  ;;  %v3778_v58 = vld [vmem:[%s3620_s10 + $0x188] sm:$0xff] }
  0xfe   : > { %4079 = vst [vmem:[#allocation5_spill] sm:$0xff] %v3775_v57  ;;  %4080 = vst [vmem:[#allocation6_spill] sm:$0xff] %v3778_v58  ;;  %v3211_v58 = vld [vmem:[%s3452_s6 + $0x36c] ss:$16 sps:$4 sm:$0xff]  }
 0x104   : > { %1472 = vmatmul.mubr.bf16.gmra.mxu0 %v3183_v59  ;;  %1761 = vmatmul.mubr.bf16.gmra.mxu1 %v3184_v60  ;;  %v3781_v59 = vld [vmem:[%s3620_s10 + $0x190] sm:$0xff]  ;;  %v3784_v60 = vld [vmem:[%s3620_s10 + $0x198] sm:$0xff] }
 0x105   : > { %1479 = vmatprep.mubr.bf16.mxu0 %v3185_v61  ;;  %1768 = vmatprep.mubr.bf16.mxu1 %v3187_v62  ;;  %4081 = vst [vmem:[#allocation7_spill] sm:$0xff] %v3781_v59  ;;  %4082 = vst [vmem:[#allocation8_spill] sm:$0xff] %v3784_v60  ;;  %v3787_v61 = vld [vmem:[%s3620_s10 + $0x1a0] sm:$0xff]  ;;  %v3790_v62 = vld [vmem:[%s3620_s10 + $0x1a8] sm:$0xff] }
 0x106   : > { %4083 = vst [vmem:[#allocation9_spill] sm:$0xff] %v3787_v61  ;;  %4084 = vst [vmem:[#allocation10_spill] sm:$0xff] %v3790_v62  ;;  %v3810_v62 = vld [vmem:[%s3620_s10 + $0x1d8] sm:$0xff] }
 0x107   : > { %4090 = vst [vmem:[#allocation16_spill] sm:$0xff] %v3810_v62  ;;  %v3205_v59 = vld [vmem:[%s3452_s6 + $0x34c] ss:$16 sps:$4 sm:$0xff]  }
 0x10c   : > { %1480 = vmatmul.mubr.bf16.gmra.mxu0 %v3189_v63  ;;  %1769 = vmatmul.mubr.bf16.gmra.mxu1 %v3190_v0  ;;  %v3793_v63 = vld [vmem:[%s3620_s10 + $0x1b0] sm:$0xff]  ;;  %v3796_v0 = vld [vmem:[%s3620_s10 + $0x1b8] sm:$0xff] }
 0x10d   : > { %1487 = vmatprep.mubr.bf16.mxu0 %v3191_v1  ;;  %1776 = vmatprep.mubr.bf16.mxu1 %v3193_v2  ;;  %4085 = vst [vmem:[#allocation11_spill] sm:$0xff] %v3793_v63  ;;  %4086 = vst [vmem:[#allocation12_spill] sm:$0xff] %v3796_v0  ;;  %v3799_v1 = vld [vmem:[%s3620_s10 + $0x1c0] sm:$0xff]  ;;  %v3802_v2 = vld [vmem:[%s3620_s10 + $0x1c8] sm:$0xff] }
 0x10e   : > { %4087 = vst [vmem:[#allocation13_spill] sm:$0xff] %v3799_v1  ;;  %4088 = vst [vmem:[#allocation14_spill] sm:$0xff] %v3802_v2  ;;  %v3813_v63 = vld [vmem:[%s3620_s10 + $0x1e0] sm:$0xff]  ;;  %v3202_v1 = vld [vmem:[%s3452_s6 + $0x328] ss:$16 sps:$4 sm:$0xff]  }
 0x10f   : > { %4091 = vst [vmem:[#allocation17_spill] sm:$0xff] %v3813_v63  ;;  %v3201_v63 = vld [vmem:[%s3452_s6 + $0x320] ss:$16 sps:$4 sm:$0xff]   ;;  %v3203_v0 = vld [vmem:[%s3452_s6 + $0x344] ss:$16 sps:$4 sm:$0xff]  }
 0x114   : > { %v3627_v7 = vpop.f32.mrf.mxu0  ;;  %1488 = vmatmul.mubr.bf16.gmra.mxu0 %v3195_v3  ;;  %v1586_v9 = vpop.f32.mrf.mxu1  ;;  %1777 = vmatmul.mubr.bf16.gmra.mxu1 %v3196_v4 }
 0x115   : > { %1495 = vmatprep.mubr.bf16.mxu0 %v3197_v5  ;;  %v1587_v3 = vadd.f32 %v1586_v9, %v3627_v7  ;;  %1784 = vmatprep.mubr.bf16.mxu1 %v3625_v6  ;;  %v3807_v5 = vld [vmem:[%s3620_s10 + $0x1d0] sm:$0xff]  ;;  %v3823_v9 = vld [vmem:[%s3620_s10 + $0x1e8] sm:$0xff]  ;;  %v3829_v6 = vld [vmem:[%s3620_s10 + $0x1f8] sm:$0xff] }
 0x116   : > { %v1299_v4 = vpop.f32.mrf.mxu0  ;;  %4089 = vst [vmem:[#allocation15_spill] sm:$0xff] %v3807_v5  ;;  %v1588_v7 = vpop.f32.mrf.mxu1  ;;  %4092 = vst [vmem:[#allocation18_spill] sm:$0xff] %v3823_v9 }
 0x117   : > { %v3826_v4 = vld [vmem:[%s3620_s10 + $0x1f0] sm:$0xff]  ;;  %4094 = vst [vmem:[#allocation20_spill] sm:$0xff] %v3829_v6  ;;  %v1905_v5 = vadd.f32 %v3630_v8, %v1587_v3 }
 0x118   : > { %4093 = vst [vmem:[#allocation19_spill] sm:$0xff] %v3826_v4  ;;  %v1300_v62 = vpop.f32.mrf.mxu0  ;;  %v1589_v2 = vpop.f32.mrf.mxu1 }
 0x119   : > { %v1590_v61 = vadd.f32 %v1589_v2, %v1300_v62  ;;  %1969 = vst [vmem:[%s3820_s14] sm:$0xff] %v1905_v5  ;;  %v3208_v5 = vld [vmem:[%s3452_s6 + $0x348] ss:$16 sps:$4 sm:$0xff]  }
 0x11a   : > { %v1302_v60 = vpop.f32.mrf.mxu0  ;;  %v1591_v7 = vpop.f32.mrf.mxu1 }
 0x11b   : > { %v1906_v9 = vadd.f32 %v3634_v10, %v1590_v61  ;;  %v2785_v4 = vpack.c.bf16 %v1590_v61, %v1587_v3  ;;  %v3207_v3 = vld [vmem:[%s3452_s6 + $0x340] ss:$16 sps:$4 sm:$0xff]  }
 0x11c   : > { %v1305_v6 = vpop.f32.mrf.mxu0  ;;  %1496 = vmatmul.mubr.bf16.gmra.mxu0 %v3201_v63  ;;  %v1594_v8 = vpop.f32.mrf.mxu1  ;;  %1785 = vmatmul.mubr.bf16.gmra.mxu1 %v3202_v1  ;;  %v3209_v1 = vld [vmem:[%s3452_s6 + $0x364] ss:$16 sps:$4 sm:$0xff]  }
 0x11d   : > { %1503 = vmatprep.mubr.bf16.mxu0 %v3203_v0  ;;  %2786 = vst [vmem:[%s3840_s30] sm:$0xff] %v2785_v4   ;;  %v1595_v60 = vadd.f32 %v1594_v8, %v1305_v6  ;;  %1792 = vmatprep.mubr.bf16.mxu1 %v3205_v59  ;;  %1970 = vst [vmem:[%s3820_s14 + $0x8] sm:$0xff] %v1906_v9 }
 0x11e   : > { %v1307_v62 = vpop.f32.mrf.mxu0  ;;  %v1596_v10 = vpop.f32.mrf.mxu1 }
 0x11f   : > { %v1907_v61 = vadd.f32 %v3637_v11, %v1595_v60 }
 0x120   : > { %v1308_v2 = vpop.f32.mrf.mxu0  ;;  %v1597_v63 = vpop.f32.mrf.mxu1 }
 0x121   : > { %v1598_v0 = vadd.f32 %v1597_v63, %v1308_v2  ;;  %1971 = vst [vmem:[%s3820_s14 + $0x10] sm:$0xff] %v1907_v61  ;;  %v3214_v61 = vld [vmem:[%s3452_s6 + $0x368] ss:$16 sps:$4 sm:$0xff]   ;;  %v3217_v2 = vld [vmem:[%s3452_s6 + $0x384] ss:$16 sps:$4 sm:$0xff]  }
 0x122   : > { %v1310_v7 = vpop.f32.mrf.mxu0  ;;  %v1599_v57 = vpop.f32.mrf.mxu1 }
 0x123   : > { %v1908_v4 = vadd.f32 %v3640_v12, %v1598_v0  ;;  %v2790_v59 = vpack.c.bf16 %v1598_v0, %v1595_v60  ;;  %v3213_v12 = vld [vmem:[%s3452_s6 + $0x360] ss:$16 sps:$4 sm:$0xff]  }
 0x124   : > { %v1313_v9 = vpop.f32.mrf.mxu0  ;;  %1504 = vmatmul.mubr.bf16.gmra.mxu0 %v3207_v3  ;;  %v1602_v11 = vpop.f32.mrf.mxu1  ;;  %1793 = vmatmul.mubr.bf16.gmra.mxu1 %v3208_v5  ;;  %v3220_v5 = vld [vmem:[%s3452_s6 + $0x38c] ss:$16 sps:$4 sm:$0xff]  }
 0x125   : > { %1511 = vmatprep.mubr.bf16.mxu0 %v3209_v1  ;;  %2942 = vst [vmem:[%s3840_s30 + $0x8] sm:$0xff] %v2790_v59   ;;  %v1603_v6 = vadd.f32 %v1602_v11, %v1313_v9  ;;  %1800 = vmatprep.mubr.bf16.mxu1 %v3211_v58  ;;  %1972 = vst [vmem:[%s3820_s14 + $0x18] sm:$0xff] %v1908_v4 }
 0x126   : > { %v1315_v8 = vpop.f32.mrf.mxu0  ;;  %v1604_v62 = vpop.f32.mrf.mxu1 }
 0x127   : > { %v1909_v57 = vadd.f32 %v3643_v13, %v1603_v6  ;;  %v3218_v62 = vld [vmem:[%s3452_s6 + $0x388] ss:$16 sps:$4 sm:$0xff]  }
 0x128   : > { %v1316_v10 = vpop.f32.mrf.mxu0  ;;  %v1605_v60 = vpop.f32.mrf.mxu1 }
 0x129   : > { %v1606_v3 = vadd.f32 %v1605_v60, %v1316_v10  ;;  %1973 = vst [vmem:[%s3820_s14 + $0x20] sm:$0xff] %v1909_v57  ;;  %v3223_v57 = vld [vmem:[%s3452_s6 + $0x3a4] ss:$16 sps:$4 sm:$0xff]   ;;  %v3226_v60 = vld [vmem:[%s3452_s6 + $0x3ac] ss:$16 sps:$4 sm:$0xff]  }
 0x12a   : > { %v1318_v63 = vpop.f32.mrf.mxu0  ;;  %v1607_v1 = vpop.f32.mrf.mxu1 }
 0x12b   : > { %v1910_v0 = vadd.f32 %v3646_v14, %v1606_v3  ;;  %v2795_v58 = vpack.c.bf16 %v1606_v3, %v1603_v6  ;;  %v3215_v14 = vld [vmem:[%s3452_s6 + $0x380] ss:$16 sps:$4 sm:$0xff]  }
 0x12c   : > { %v1321_v7 = vpop.f32.mrf.mxu0  ;;  %1512 = vmatmul.mubr.bf16.gmra.mxu0 %v3213_v12  ;;  %v1610_v13 = vpop.f32.mrf.mxu1  ;;  %1801 = vmatmul.mubr.bf16.gmra.mxu1 %v3214_v61 }
 0x12d   : > { %1519 = vmatprep.mubr.bf16.mxu0 %v3217_v2  ;;  %2943 = vst [vmem:[%s3840_s30 + $0x10] sm:$0xff] %v2795_v58   ;;  %v1611_v4 = vadd.f32 %v1610_v13, %v1321_v7  ;;  %1808 = vmatprep.mubr.bf16.mxu1 %v3220_v5  ;;  %1974 = vst [vmem:[%s3820_s14 + $0x28] sm:$0xff] %v1910_v0 }
 0x12e   : > { %v1323_v59 = vpop.f32.mrf.mxu0  ;;  %v1612_v9 = vpop.f32.mrf.mxu1 }
 0x12f   : > { %v1911_v11 = vadd.f32 %v3649_v15, %v1611_v4  ;;  %v3229_v59 = vld [vmem:[%s3452_s6 + $0x3c4] ss:$16 sps:$4 sm:$0xff]  }
 0x130   : > { %v1324_v8 = vpop.f32.mrf.mxu0  ;;  %v1613_v6 = vpop.f32.mrf.mxu1 }
 0x131   : > { %v1614_v10 = vadd.f32 %v1613_v6, %v1324_v8  ;;  %1975 = vst [vmem:[%s3820_s14 + $0x30] sm:$0xff] %v1911_v11  ;;  %v3232_v8 = vld [vmem:[%s3452_s6 + $0x3cc] ss:$16 sps:$4 sm:$0xff]  }
 0x132   : > { %v1326_v12 = vpop.f32.mrf.mxu0  ;;  %v1615_v61 = vpop.f32.mrf.mxu1 }
 0x133   : > { %v1912_v2 = vadd.f32 %v3652_v16, %v1614_v10  ;;  %v2800_v3 = vpack.c.bf16 %v1614_v10, %v1611_v4  ;;  %v3221_v16 = vld [vmem:[%s3452_s6 + $0x3a0] ss:$16 sps:$4 sm:$0xff]   ;;  %v3224_v4 = vld [vmem:[%s3452_s6 + $0x3a8] ss:$16 sps:$4 sm:$0xff]  }
 0x134   : > { %v1329_v63 = vpop.f32.mrf.mxu0  ;;  %1520 = vmatmul.mubr.bf16.gmra.mxu0 %v3215_v14  ;;  %v1618_v15 = vpop.f32.mrf.mxu1  ;;  %1809 = vmatmul.mubr.bf16.gmra.mxu1 %v3218_v62 }
 0x135   : > { %1527 = vmatprep.mubr.bf16.mxu0 %v3223_v57  ;;  %2944 = vst [vmem:[%s3840_s30 + $0x18] sm:$0xff] %v2800_v3   ;;  %v1619_v5 = vadd.f32 %v1618_v15, %v1329_v63  ;;  %1816 = vmatprep.mubr.bf16.mxu1 %v3226_v60  ;;  %1976 = vst [vmem:[%s3820_s14 + $0x38] sm:$0xff] %v1912_v2  ;;  %v3230_v63 = vld [vmem:[%s3452_s6 + $0x3c8] ss:$16 sps:$4 sm:$0xff]   ;;  %v3235_v15 = vld [vmem:[%s3452_s6 + $0x3e4] ss:$16 sps:$4 sm:$0xff]  }
 0x136   : > { %v1331_v1 = vpop.f32.mrf.mxu0  ;;  %v1620_v0 = vpop.f32.mrf.mxu1 }
 0x137   : > { %v1913_v58 = vadd.f32 %v3655_v17, %v1619_v5  ;;  %v3238_v0 = vld [vmem:[%s3452_s6 + $0x3ec] ss:$16 sps:$4 sm:$0xff]  }
 0x138   : > { %v1332_v7 = vpop.f32.mrf.mxu0  ;;  %v1621_v13 = vpop.f32.mrf.mxu1 }
 0x139   : > { %v1622_v9 = vadd.f32 %v1621_v13, %v1332_v7  ;;  %1977 = vst [vmem:[%s3820_s14 + $0x40] sm:$0xff] %v1913_v58 }
 0x13a   : > { %v1334_v11 = vpop.f32.mrf.mxu0  ;;  %v1623_v14 = vpop.f32.mrf.mxu1 }
 0x13b   : > { %v1914_v6 = vadd.f32 %v3658_v18, %v1622_v9  ;;  %v2805_v62 = vpack.c.bf16 %v1622_v9, %v1619_v5  ;;  %v3227_v18 = vld [vmem:[%s3452_s6 + $0x3c0] ss:$16 sps:$4 sm:$0xff]  }
 0x13c   : > { %v1337_v57 = vpop.f32.mrf.mxu0  ;;  %1528 = vmatmul.mubr.bf16.gmra.mxu0 %v3221_v16  ;;  %v1626_v17 = vpop.f32.mrf.mxu1  ;;  %1817 = vmatmul.mubr.bf16.gmra.mxu1 %v3224_v4  ;;  %v3233_v14 = vld [vmem:[%s3452_s6 + $0x3e0] ss:$16 sps:$4 sm:$0xff]  }
 0x13d   : > { %1535 = vmatprep.mubr.bf16.mxu0 %v3229_v59  ;;  %2945 = vst [vmem:[%s3840_s30 + $0x20] sm:$0xff] %v2805_v62   ;;  %v1627_v10 = vadd.f32 %v1626_v17, %v1337_v57  ;;  %1824 = vmatprep.mubr.bf16.mxu1 %v3232_v8  ;;  %1978 = vst [vmem:[%s3820_s14 + $0x48] sm:$0xff] %v1914_v6  ;;  %v3236_v6 = vld [vmem:[%s3452_s6 + $0x3e8] ss:$16 sps:$4 sm:$0xff]   ;;  %s2781_s6 = sshll.u32 %s3351_s19, 12  ;;  %s4032_s19 = scalar_lea.sflag [#allocation3], %s215_s11 }
 0x13e   : > { %v1339_v12 = vpop.f32.mrf.mxu0  ;;  %v1628_v60 = vpop.f32.mrf.mxu1  ;;  %s4023_s28 = scalar_lea.hbm %s4076_s4, %s2781_s6 }
 0x13f   : > { %v1915_v61 = vadd.f32 %v3661_v19, %v1627_v10 }
 0x140   : > { %v1340_v2 = vpop.f32.mrf.mxu0  ;;  %v1629_v3 = vpop.f32.mrf.mxu1 }
 0x141   : > { %v1630_v5 = vadd.f32 %v1629_v3, %v1340_v2  ;;  %1979 = vst [vmem:[%s3820_s14 + $0x50] sm:$0xff] %v1915_v61 }
 0x142   : > { %v1342_v1 = vpop.f32.mrf.mxu0  ;;  %v1631_v58 = vpop.f32.mrf.mxu1 }
 0x143   : > { %v1916_v7 = vadd.f32 %v3664_v20, %v1630_v5  ;;  %v2810_v16 = vpack.c.bf16 %v1630_v5, %v1627_v10 }
 0x144   : > { %v1345_v13 = vpop.f32.mrf.mxu0  ;;  %1536 = vmatmul.mubr.bf16.gmra.mxu0 %v3227_v18  ;;  %v1634_v19 = vpop.f32.mrf.mxu1  ;;  %1825 = vmatmul.mubr.bf16.gmra.mxu1 %v3230_v63 }
 0x145   : > { %1543 = vmatprep.mubr.bf16.mxu0 %v3235_v15  ;;  %2946 = vst [vmem:[%s3840_s30 + $0x28] sm:$0xff] %v2810_v16   ;;  %v1635_v4 = vadd.f32 %v1634_v19, %v1345_v13  ;;  %1832 = vmatprep.mubr.bf16.mxu1 %v3238_v0  ;;  %1980 = vst [vmem:[%s3820_s14 + $0x58] sm:$0xff] %v1916_v7 }
 0x146   : > { %v1347_v59 = vpop.f32.mrf.mxu0  ;;  %v1636_v9 = vpop.f32.mrf.mxu1 }
 0x147   : > { %v1917_v11 = vadd.f32 %v3667_v21, %v1635_v4 }
 0x148   : > { %v1348_v8 = vpop.f32.mrf.mxu0  ;;  %v1637_v20 = vpop.f32.mrf.mxu1 }
 0x149   : > { %v1638_v62 = vadd.f32 %v1637_v20, %v1348_v8  ;;  %1981 = vst [vmem:[%s3820_s14 + $0x60] sm:$0xff] %v1917_v11 }
 0x14a   : > { %v1350_v57 = vpop.f32.mrf.mxu0  ;;  %v1639_v17 = vpop.f32.mrf.mxu1 }
 0x14b   : > { %v1918_v10 = vadd.f32 %v3670_v22, %v1638_v62  ;;  %v2815_v12 = vpack.c.bf16 %v1638_v62, %v1635_v4 }
 0x14c   : > { %v1353_v60 = vpop.f32.mrf.mxu0  ;;  %1544 = vmatmul.mubr.bf16.gmra.mxu0 %v3233_v14  ;;  %v1642_v61 = vpop.f32.mrf.mxu1  ;;  %1833 = vmatmul.mubr.bf16.gmra.mxu1 %v3236_v6 }
 0x14d   : > { %2947 = vst [vmem:[%s3840_s30 + $0x30] sm:$0xff] %v2815_v12   ;;  %v1643_v21 = vadd.f32 %v1642_v61, %v1353_v60  ;;  %1982 = vst [vmem:[%s3820_s14 + $0x68] sm:$0xff] %v1918_v10 }
 0x14e   : > { %v1355_v2 = vpop.f32.mrf.mxu0  ;;  %v1644_v18 = vpop.f32.mrf.mxu1 }
 0x14f   : > { %v1919_v3 = vadd.f32 %v3673_v23, %v1643_v21 }
 0x150   : > { %v1356_v63 = vpop.f32.mrf.mxu0  ;;  %v1645_v15 = vpop.f32.mrf.mxu1 }
 0x151   : > { %v1646_v5 = vadd.f32 %v1645_v15, %v1356_v63  ;;  %1983 = vst [vmem:[%s3820_s14 + $0x70] sm:$0xff] %v1919_v3 }
 0x152   : > { %v1358_v1 = vpop.f32.mrf.mxu0  ;;  %v1647_v22 = vpop.f32.mrf.mxu1 }
 0x153   : > { %v1920_v0 = vadd.f32 %v3676_v24, %v1646_v5  ;;  %v2820_v58 = vpack.c.bf16 %v1646_v5, %v1643_v21 }
 0x154   : > { %v1361_v7 = vpop.f32.mrf.mxu0  ;;  %v1650_v16 = vpop.f32.mrf.mxu1 }
 0x155   : > { %2948 = vst [vmem:[%s3840_s30 + $0x38] sm:$0xff] %v2820_v58   ;;  %v1651_v13 = vadd.f32 %v1650_v16, %v1361_v7  ;;  %1984 = vst [vmem:[%s3820_s14 + $0x78] sm:$0xff] %v1920_v0 }
 0x156   : > { %v1363_v19 = vpop.f32.mrf.mxu0  ;;  %v1652_v4 = vpop.f32.mrf.mxu1 }
 0x157   : > { %v1921_v23 = vadd.f32 %v3679_v25, %v1651_v13 }
 0x158   : > { %v1364_v59 = vpop.f32.mrf.mxu0  ;;  %v1653_v9 = vpop.f32.mrf.mxu1 }
 0x159   : > { %v1654_v11 = vadd.f32 %v1653_v9, %v1364_v59  ;;  %1985 = vst [vmem:[%s3820_s14 + $0x80] sm:$0xff] %v1921_v23 }
 0x15a   : > { %v1366_v8 = vpop.f32.mrf.mxu0  ;;  %v1655_v14 = vpop.f32.mrf.mxu1 }
 0x15b   : > { %v1922_v24 = vadd.f32 %v3682_v26, %v1654_v11  ;;  %v2825_v20 = vpack.c.bf16 %v1654_v11, %v1651_v13 }
 0x15c   : > { %v1369_v6 = vpop.f32.mrf.mxu0  ;;  %v1658_v62 = vpop.f32.mrf.mxu1 }
 0x15d   : > { %2949 = vst [vmem:[%s3840_s30 + $0x40] sm:$0xff] %v2825_v20   ;;  %v1659_v57 = vadd.f32 %v1658_v62, %v1369_v6  ;;  %1986 = vst [vmem:[%s3820_s14 + $0x88] sm:$0xff] %v1922_v24 }
 0x15e   : > { %v1371_v17 = vpop.f32.mrf.mxu0  ;;  %v1660_v10 = vpop.f32.mrf.mxu1 }
 0x15f   : > { %v1923_v25 = vadd.f32 %v3685_v27, %v1659_v57 }
 0x160   : > { %v1372_v12 = vpop.f32.mrf.mxu0  ;;  %v1661_v60 = vpop.f32.mrf.mxu1 }
 0x161   : > { %v1662_v61 = vadd.f32 %v1661_v60, %v1372_v12  ;;  %1987 = vst [vmem:[%s3820_s14 + $0x90] sm:$0xff] %v1923_v25 }
 0x162   : > { %v1374_v21 = vpop.f32.mrf.mxu0  ;;  %v1663_v2 = vpop.f32.mrf.mxu1 }
 0x163   : > { %v1924_v26 = vadd.f32 %v3688_v28, %v1662_v61  ;;  %v2830_v18 = vpack.c.bf16 %v1662_v61, %v1659_v57 }
 0x164   : > { %v1377_v3 = vpop.f32.mrf.mxu0  ;;  %v1666_v63 = vpop.f32.mrf.mxu1 }
 0x165   : > { %2950 = vst [vmem:[%s3840_s30 + $0x48] sm:$0xff] %v2830_v18   ;;  %v1667_v15 = vadd.f32 %v1666_v63, %v1377_v3  ;;  %1988 = vst [vmem:[%s3820_s14 + $0x98] sm:$0xff] %v1924_v26 }
 0x166   : > { %v1379_v5 = vpop.f32.mrf.mxu0  ;;  %v1668_v1 = vpop.f32.mrf.mxu1 }
 0x167   : > { %v1925_v27 = vadd.f32 %v3691_v29, %v1667_v15 }
 0x168   : > { %v1380_v22 = vpop.f32.mrf.mxu0  ;;  %v1669_v0 = vpop.f32.mrf.mxu1 }
 0x169   : > { %v1670_v58 = vadd.f32 %v1669_v0, %v1380_v22  ;;  %1989 = vst [vmem:[%s3820_s14 + $0xa0] sm:$0xff] %v1925_v27 }
 0x16a   : > { %v1382_v7 = vpop.f32.mrf.mxu0  ;;  %v1671_v16 = vpop.f32.mrf.mxu1 }
 0x16b   : > { %v1926_v28 = vadd.f32 %v3694_v30, %v1670_v58  ;;  %v2835_v13 = vpack.c.bf16 %v1670_v58, %v1667_v15 }
 0x16c   : > { %v1385_v19 = vpop.f32.mrf.mxu0  ;;  %v1674_v4 = vpop.f32.mrf.mxu1 }
 0x16d   : > { %2951 = vst [vmem:[%s3840_s30 + $0x50] sm:$0xff] %v2835_v13   ;;  %v1675_v23 = vadd.f32 %v1674_v4, %v1385_v19  ;;  %1990 = vst [vmem:[%s3820_s14 + $0xa8] sm:$0xff] %v1926_v28 }
 0x16e   : > { %v1387_v59 = vpop.f32.mrf.mxu0  ;;  %v1676_v9 = vpop.f32.mrf.mxu1 }
 0x16f   : > { %v1927_v29 = vadd.f32 %v3697_v31, %v1675_v23 }
 0x170   : > { %v1388_v11 = vpop.f32.mrf.mxu0  ;;  %v1677_v8 = vpop.f32.mrf.mxu1 }
 0x171   : > { %v1678_v14 = vadd.f32 %v1677_v8, %v1388_v11  ;;  %1991 = vst [vmem:[%s3820_s14 + $0xb0] sm:$0xff] %v1927_v29 }
 0x172   : > { %v1390_v24 = vpop.f32.mrf.mxu0  ;;  %v1679_v20 = vpop.f32.mrf.mxu1 }
 0x173   : > { %v1928_v30 = vadd.f32 %v3700_v32, %v1678_v14  ;;  %v2840_v6 = vpack.c.bf16 %v1678_v14, %v1675_v23 }
 0x174   : > { %v1393_v62 = vpop.f32.mrf.mxu0  ;;  %v1682_v57 = vpop.f32.mrf.mxu1 }
 0x175   : > { %2952 = vst [vmem:[%s3840_s30 + $0x58] sm:$0xff] %v2840_v6   ;;  %v1683_v17 = vadd.f32 %v1682_v57, %v1393_v62  ;;  %1992 = vst [vmem:[%s3820_s14 + $0xb8] sm:$0xff] %v1928_v30 }
 0x176   : > { %v1395_v10 = vpop.f32.mrf.mxu0  ;;  %v1684_v25 = vpop.f32.mrf.mxu1 }
 0x177   : > { %v1929_v31 = vadd.f32 %v3703_v33, %v1683_v17 }
 0x178   : > { %v1396_v12 = vpop.f32.mrf.mxu0  ;;  %v1685_v60 = vpop.f32.mrf.mxu1 }
 0x179   : > { %v1686_v61 = vadd.f32 %v1685_v60, %v1396_v12  ;;  %1993 = vst [vmem:[%s3820_s14 + $0xc0] sm:$0xff] %v1929_v31 }
 0x17a   : > { %v1398_v21 = vpop.f32.mrf.mxu0  ;;  %v1687_v2 = vpop.f32.mrf.mxu1 }
 0x17b   : > { %v1930_v32 = vadd.f32 %v3706_v34, %v1686_v61  ;;  %v2845_v26 = vpack.c.bf16 %v1686_v61, %v1683_v17 }
 0x17c   : > { %v1401_v18 = vpop.f32.mrf.mxu0  ;;  %v1690_v3 = vpop.f32.mrf.mxu1 }
 0x17d   : > { %2953 = vst [vmem:[%s3840_s30 + $0x60] sm:$0xff] %v2845_v26   ;;  %v1691_v63 = vadd.f32 %v1690_v3, %v1401_v18  ;;  %1994 = vst [vmem:[%s3820_s14 + $0xc8] sm:$0xff] %v1930_v32 }
 0x17e   : > { %v1403_v15 = vpop.f32.mrf.mxu0  ;;  %v1692_v5 = vpop.f32.mrf.mxu1 }
 0x17f   : > { %v1931_v33 = vadd.f32 %v3709_v35, %v1691_v63 }
 0x180   : > { %v1404_v1 = vpop.f32.mrf.mxu0  ;;  %v1693_v27 = vpop.f32.mrf.mxu1 }
 0x181   : > { %v1694_v22 = vadd.f32 %v1693_v27, %v1404_v1  ;;  %1995 = vst [vmem:[%s3820_s14 + $0xd0] sm:$0xff] %v1931_v33 }
 0x182   : > { %v1406_v0 = vpop.f32.mrf.mxu0  ;;  %v1695_v58 = vpop.f32.mrf.mxu1 }
 0x183   : > { %v1932_v34 = vadd.f32 %v3712_v36, %v1694_v22  ;;  %v2850_v7 = vpack.c.bf16 %v1694_v22, %v1691_v63 }
 0x184   : > { %v1409_v16 = vpop.f32.mrf.mxu0  ;;  %v1698_v28 = vpop.f32.mrf.mxu1 }
 0x185   : > { %2954 = vst [vmem:[%s3840_s30 + $0x68] sm:$0xff] %v2850_v7   ;;  %v1699_v13 = vadd.f32 %v1698_v28, %v1409_v16  ;;  %1996 = vst [vmem:[%s3820_s14 + $0xd8] sm:$0xff] %v1932_v34 }
 0x186   : > { %v1411_v19 = vpop.f32.mrf.mxu0  ;;  %v1700_v4 = vpop.f32.mrf.mxu1 }
 0x187   : > { %v1933_v35 = vadd.f32 %v3715_v37, %v1699_v13 }
 0x188   : > { %v1412_v23 = vpop.f32.mrf.mxu0  ;;  %v1701_v59 = vpop.f32.mrf.mxu1 }
 0x189   : > { %v1702_v9 = vadd.f32 %v1701_v59, %v1412_v23  ;;  %1997 = vst [vmem:[%s3820_s14 + $0xe0] sm:$0xff] %v1933_v35 }
 0x18a   : > { %v1414_v29 = vpop.f32.mrf.mxu0  ;;  %v1703_v11 = vpop.f32.mrf.mxu1 }
 0x18b   : > { %v1934_v36 = vadd.f32 %v3718_v38, %v1702_v9  ;;  %v2855_v8 = vpack.c.bf16 %v1702_v9, %v1699_v13 }
 0x18c   : > { %v1417_v14 = vpop.f32.mrf.mxu0  ;;  %v1706_v24 = vpop.f32.mrf.mxu1 }
 0x18d   : > { %2955 = vst [vmem:[%s3840_s30 + $0x70] sm:$0xff] %v2855_v8   ;;  %v1707_v20 = vadd.f32 %v1706_v24, %v1417_v14  ;;  %1998 = vst [vmem:[%s3820_s14 + $0xe8] sm:$0xff] %v1934_v36 }
 0x18e   : > { %v1419_v30 = vpop.f32.mrf.mxu0  ;;  %v1708_v6 = vpop.f32.mrf.mxu1 }
 0x18f   : > { %v1935_v37 = vadd.f32 %v3721_v39, %v1707_v20 }
 0x190   : > { %v1420_v62 = vpop.f32.mrf.mxu0  ;;  %v1709_v57 = vpop.f32.mrf.mxu1 }
 0x191   : > { %v1710_v17 = vadd.f32 %v1709_v57, %v1420_v62  ;;  %1999 = vst [vmem:[%s3820_s14 + $0xf0] sm:$0xff] %v1935_v37 }
 0x192   : > { %v1422_v10 = vpop.f32.mrf.mxu0  ;;  %v1711_v25 = vpop.f32.mrf.mxu1 }
 0x193   : > { %v1936_v38 = vadd.f32 %v3724_v40, %v1710_v17  ;;  %v2860_v31 = vpack.c.bf16 %v1710_v17, %v1707_v20 }
 0x194   : > { %v1425_v12 = vpop.f32.mrf.mxu0  ;;  %v1714_v60 = vpop.f32.mrf.mxu1 }
 0x195   : > { %2956 = vst [vmem:[%s3840_s30 + $0x78] sm:$0xff] %v2860_v31   ;;  %v1715_v61 = vadd.f32 %v1714_v60, %v1425_v12  ;;  %2000 = vst [vmem:[%s3820_s14 + $0xf8] sm:$0xff] %v1936_v38 }
 0x196   : > { %v1427_v21 = vpop.f32.mrf.mxu0  ;;  %v1716_v2 = vpop.f32.mrf.mxu1 }
 0x197   : > { %v1937_v39 = vadd.f32 %v3727_v41, %v1715_v61 }
 0x198   : > { %v1428_v32 = vpop.f32.mrf.mxu0  ;;  %v1717_v26 = vpop.f32.mrf.mxu1 }
 0x199   : > { %v1718_v18 = vadd.f32 %v1717_v26, %v1428_v32  ;;  %2001 = vst [vmem:[%s3820_s14 + $0x100] sm:$0xff] %v1937_v39 }
 0x19a   : > { %v1430_v3 = vpop.f32.mrf.mxu0  ;;  %v1719_v63 = vpop.f32.mrf.mxu1 }
 0x19b   : > { %v1938_v40 = vadd.f32 %v3730_v42, %v1718_v18  ;;  %v2865_v15 = vpack.c.bf16 %v1718_v18, %v1715_v61 }
 0x19c   : > { %v1433_v5 = vpop.f32.mrf.mxu0  ;;  %v1722_v33 = vpop.f32.mrf.mxu1 }
 0x19d   : > { %2957 = vst [vmem:[%s3840_s30 + $0x80] sm:$0xff] %v2865_v15   ;;  %v1723_v1 = vadd.f32 %v1722_v33, %v1433_v5  ;;  %2002 = vst [vmem:[%s3820_s14 + $0x108] sm:$0xff] %v1938_v40 }
 0x19e   : > { %v1435_v27 = vpop.f32.mrf.mxu0  ;;  %v1724_v22 = vpop.f32.mrf.mxu1 }
 0x19f   : > { %v1939_v41 = vadd.f32 %v3733_v43, %v1723_v1 }
 0x1a0   : > { %v1436_v0 = vpop.f32.mrf.mxu0  ;;  %v1725_v58 = vpop.f32.mrf.mxu1 }
 0x1a1   : > { %v1726_v34 = vadd.f32 %v1725_v58, %v1436_v0  ;;  %2003 = vst [vmem:[%s3820_s14 + $0x110] sm:$0xff] %v1939_v41 }
 0x1a2   : > { %v1438_v7 = vpop.f32.mrf.mxu0  ;;  %v1727_v16 = vpop.f32.mrf.mxu1 }
 0x1a3   : > { %v1940_v42 = vadd.f32 %v3736_v44, %v1726_v34  ;;  %v2870_v28 = vpack.c.bf16 %v1726_v34, %v1723_v1 }
 0x1a4   : > { %v1441_v13 = vpop.f32.mrf.mxu0  ;;  %v1730_v19 = vpop.f32.mrf.mxu1 }
 0x1a5   : > { %2958 = vst [vmem:[%s3840_s30 + $0x88] sm:$0xff] %v2870_v28   ;;  %v1731_v4 = vadd.f32 %v1730_v19, %v1441_v13  ;;  %2004 = vst [vmem:[%s3820_s14 + $0x118] sm:$0xff] %v1940_v42 }
 0x1a6   : > { %v1443_v35 = vpop.f32.mrf.mxu0  ;;  %v1732_v23 = vpop.f32.mrf.mxu1 }
 0x1a7   : > { %v1941_v43 = vadd.f32 %v3739_v45, %v1731_v4 }
 0x1a8   : > { %v1444_v59 = vpop.f32.mrf.mxu0  ;;  %v1733_v9 = vpop.f32.mrf.mxu1 }
 0x1a9   : > { %v1734_v29 = vadd.f32 %v1733_v9, %v1444_v59  ;;  %2005 = vst [vmem:[%s3820_s14 + $0x120] sm:$0xff] %v1941_v43 }
 0x1aa   : > { %v1446_v11 = vpop.f32.mrf.mxu0  ;;  %v1735_v36 = vpop.f32.mrf.mxu1 }
 0x1ab   : > { %v1942_v44 = vadd.f32 %v3742_v46, %v1734_v29  ;;  %v2875_v8 = vpack.c.bf16 %v1734_v29, %v1731_v4 }
 0x1ac   : > { %v1449_v14 = vpop.f32.mrf.mxu0  ;;  %v1738_v24 = vpop.f32.mrf.mxu1 }
 0x1ad   : > { %2959 = vst [vmem:[%s3840_s30 + $0x90] sm:$0xff] %v2875_v8   ;;  %v1739_v20 = vadd.f32 %v1738_v24, %v1449_v14  ;;  %2006 = vst [vmem:[%s3820_s14 + $0x128] sm:$0xff] %v1942_v44 }
 0x1ae   : > { %v1451_v30 = vpop.f32.mrf.mxu0  ;;  %v1740_v6 = vpop.f32.mrf.mxu1 }
 0x1af   : > { %v1943_v45 = vadd.f32 %v3745_v47, %v1739_v20 }
 0x1b0   : > { %v1452_v37 = vpop.f32.mrf.mxu0  ;;  %v1741_v62 = vpop.f32.mrf.mxu1 }
 0x1b1   : > { %v1742_v57 = vadd.f32 %v1741_v62, %v1452_v37  ;;  %2007 = vst [vmem:[%s3820_s14 + $0x130] sm:$0xff] %v1943_v45 }
 0x1b2   : > { %v1454_v17 = vpop.f32.mrf.mxu0  ;;  %v1743_v10 = vpop.f32.mrf.mxu1 }
 0x1b3   : > { %v1944_v46 = vadd.f32 %v3748_v48, %v1742_v57  ;;  %v2880_v25 = vpack.c.bf16 %v1742_v57, %v1739_v20 }
 0x1b4   : > { %v1457_v38 = vpop.f32.mrf.mxu0  ;;  %v1746_v31 = vpop.f32.mrf.mxu1 }
 0x1b5   : > { %2960 = vst [vmem:[%s3840_s30 + $0x98] sm:$0xff] %v2880_v25   ;;  %v1747_v12 = vadd.f32 %v1746_v31, %v1457_v38  ;;  %2008 = vst [vmem:[%s3820_s14 + $0x138] sm:$0xff] %v1944_v46 }
 0x1b6   : > { %v1459_v60 = vpop.f32.mrf.mxu0  ;;  %v1748_v61 = vpop.f32.mrf.mxu1 }
 0x1b7   : > { %v1945_v47 = vadd.f32 %v3751_v49, %v1747_v12 }
 0x1b8   : > { %v1460_v21 = vpop.f32.mrf.mxu0  ;;  %v1749_v2 = vpop.f32.mrf.mxu1 }
 0x1b9   : > { %v1750_v39 = vadd.f32 %v1749_v2, %v1460_v21  ;;  %2009 = vst [vmem:[%s3820_s14 + $0x140] sm:$0xff] %v1945_v47 }
 0x1ba   : > { %v1462_v32 = vpop.f32.mrf.mxu0  ;;  %v1751_v26 = vpop.f32.mrf.mxu1 }
 0x1bb   : > { %v1946_v48 = vadd.f32 %v3754_v50, %v1750_v39  ;;  %v2885_v18 = vpack.c.bf16 %v1750_v39, %v1747_v12  ;;  %v4097_v39 = vld [vmem:[#allocation7_spill] sm:$0xff] }
 0x1bc   : > { %v1465_v3 = vpop.f32.mrf.mxu0  ;;  %v1754_v63 = vpop.f32.mrf.mxu1 }
 0x1bd   : > { %2961 = vst [vmem:[%s3840_s30 + $0xa0] sm:$0xff] %v2885_v18   ;;  %v1755_v40 = vadd.f32 %v1754_v63, %v1465_v3  ;;  %2010 = vst [vmem:[%s3820_s14 + $0x148] sm:$0xff] %v1946_v48 }
 0x1be   : > { %v1467_v15 = vpop.f32.mrf.mxu0  ;;  %v1756_v5 = vpop.f32.mrf.mxu1 }
 0x1bf   : > { %v1947_v49 = vadd.f32 %v3757_v51, %v1755_v40 }
 0x1c0   : > { %v1468_v33 = vpop.f32.mrf.mxu0  ;;  %v1757_v1 = vpop.f32.mrf.mxu1 }
 0x1c1   : > { %v1758_v27 = vadd.f32 %v1757_v1, %v1468_v33  ;;  %2011 = vst [vmem:[%s3820_s14 + $0x150] sm:$0xff] %v1947_v49 }
 0x1c2   : > { %v1470_v22 = vpop.f32.mrf.mxu0  ;;  %v1759_v41 = vpop.f32.mrf.mxu1 }
 0x1c3   : > { %v1948_v50 = vadd.f32 %v3760_v52, %v1758_v27  ;;  %v2890_v0 = vpack.c.bf16 %v1758_v27, %v1755_v40  ;;  %v4098_v40 = vld [vmem:[#allocation8_spill] sm:$0xff]  ;;  %v4099_v41 = vld [vmem:[#allocation9_spill] sm:$0xff] }
 0x1c4   : > { %v1473_v58 = vpop.f32.mrf.mxu0  ;;  %v1762_v34 = vpop.f32.mrf.mxu1 }
 0x1c5   : > { %2962 = vst [vmem:[%s3840_s30 + $0xa8] sm:$0xff] %v2890_v0   ;;  %v1763_v7 = vadd.f32 %v1762_v34, %v1473_v58  ;;  %2012 = vst [vmem:[%s3820_s14 + $0x158] sm:$0xff] %v1948_v50 }
 0x1c6   : > { %v1475_v16 = vpop.f32.mrf.mxu0  ;;  %v1764_v42 = vpop.f32.mrf.mxu1 }
 0x1c7   : > { %v1949_v51 = vadd.f32 %v3763_v53, %v1763_v7  ;;  %v4100_v42 = vld [vmem:[#allocation10_spill] sm:$0xff] }
 0x1c8   : > { %v1476_v28 = vpop.f32.mrf.mxu0  ;;  %v1765_v13 = vpop.f32.mrf.mxu1 }
 0x1c9   : > { %v1766_v19 = vadd.f32 %v1765_v13, %v1476_v28  ;;  %2013 = vst [vmem:[%s3820_s14 + $0x160] sm:$0xff] %v1949_v51 }
 0x1ca   : > { %v1478_v4 = vpop.f32.mrf.mxu0  ;;  %v1767_v35 = vpop.f32.mrf.mxu1 }
 0x1cb   : > { %v1950_v52 = vadd.f32 %v3766_v54, %v1766_v19  ;;  %v2895_v23 = vpack.c.bf16 %v1766_v19, %v1763_v7 }
 0x1cc   : > { %v1481_v43 = vpop.f32.mrf.mxu0  ;;  %v1770_v59 = vpop.f32.mrf.mxu1 }
 0x1cd   : > { %2963 = vst [vmem:[%s3840_s30 + $0xb0] sm:$0xff] %v2895_v23   ;;  %v1771_v9 = vadd.f32 %v1770_v59, %v1481_v43  ;;  %2014 = vst [vmem:[%s3820_s14 + $0x168] sm:$0xff] %v1950_v52  ;;  %v4101_v23 = vld [vmem:[#allocation11_spill] sm:$0xff] }
 0x1ce   : > { %v1483_v29 = vpop.f32.mrf.mxu0  ;;  %v1772_v11 = vpop.f32.mrf.mxu1 }
 0x1cf   : > { %v1951_v53 = vadd.f32 %v3769_v55, %v1771_v9  ;;  %v4095_v55 = vld [vmem:[#allocation5_spill] sm:$0xff] }
 0x1d0   : > { %v1484_v36 = vpop.f32.mrf.mxu0  ;;  %v1773_v44 = vpop.f32.mrf.mxu1 }
 0x1d1   : > { %v1774_v8 = vadd.f32 %v1773_v44, %v1484_v36  ;;  %2015 = vst [vmem:[%s3820_s14 + $0x170] sm:$0xff] %v1951_v53  ;;  %v4102_v36 = vld [vmem:[#allocation12_spill] sm:$0xff] }
 0x1d2   : > { %v1486_v14 = vpop.f32.mrf.mxu0  ;;  %v1775_v24 = vpop.f32.mrf.mxu1 }
 0x1d3   : > { %v1952_v54 = vadd.f32 %v3772_v56, %v1774_v8  ;;  %v2900_v20 = vpack.c.bf16 %v1774_v8, %v1771_v9  ;;  %v4096_v56 = vld [vmem:[#allocation6_spill] sm:$0xff] }
 0x1d4   : > { %v1489_v30 = vpop.f32.mrf.mxu0  ;;  %v1778_v6 = vpop.f32.mrf.mxu1 }
 0x1d5   : > { %2964 = vst [vmem:[%s3840_s30 + $0xb8] sm:$0xff] %v2900_v20   ;;  %v1779_v45 = vadd.f32 %v1778_v6, %v1489_v30  ;;  %2016 = vst [vmem:[%s3820_s14 + $0x178] sm:$0xff] %v1952_v54  ;;  %v4103_v6 = vld [vmem:[#allocation13_spill] sm:$0xff] }
 0x1d6   : > { %v1491_v37 = vpop.f32.mrf.mxu0  ;;  %v1780_v62 = vpop.f32.mrf.mxu1 }
 0x1d7   : > { %v1953_v57 = vadd.f32 %v4095_v55, %v1779_v45 }
 0x1d8   : > { %v1492_v17 = vpop.f32.mrf.mxu0  ;;  %v1781_v10 = vpop.f32.mrf.mxu1 }
 0x1d9   : > { %v1782_v46 = vadd.f32 %v1781_v10, %v1492_v17  ;;  %2017 = vst [vmem:[%s3820_s14 + $0x180] sm:$0xff] %v1953_v57  ;;  %v4104_v10 = vld [vmem:[#allocation14_spill] sm:$0xff] }
 0x1da   : > { %v1494_v25 = vpop.f32.mrf.mxu0  ;;  %v1783_v38 = vpop.f32.mrf.mxu1 }
 0x1db   : > { %v1954_v31 = vadd.f32 %v4096_v56, %v1782_v46  ;;  %v2905_v12 = vpack.c.bf16 %v1782_v46, %v1779_v45 }
 0x1dc   : > { %v1497_v60 = vpop.f32.mrf.mxu0  ;;  %v1786_v61 = vpop.f32.mrf.mxu1 }
 0x1dd   : > { %2965 = vst [vmem:[%s3840_s30 + $0xc0] sm:$0xff] %v2905_v12   ;;  %v1787_v47 = vadd.f32 %v1786_v61, %v1497_v60  ;;  %2018 = vst [vmem:[%s3820_s14 + $0x188] sm:$0xff] %v1954_v31  ;;  %v4105_v61 = vld [vmem:[#allocation15_spill] sm:$0xff] }
 0x1de   : > { %v1499_v21 = vpop.f32.mrf.mxu0  ;;  %v1788_v2 = vpop.f32.mrf.mxu1 }
 0x1df   : > { %v1955_v32 = vadd.f32 %v4097_v39, %v1787_v47 }
 0x1e0   : > { %v1500_v26 = vpop.f32.mrf.mxu0  ;;  %v1789_v48 = vpop.f32.mrf.mxu1 }
 0x1e1   : > { %v1790_v18 = vadd.f32 %v1789_v48, %v1500_v26  ;;  %2019 = vst [vmem:[%s3820_s14 + $0x190] sm:$0xff] %v1955_v32  ;;  %v4106_v48 = vld [vmem:[#allocation16_spill] sm:$0xff] }
 0x1e2   : > { %v1502_v3 = vpop.f32.mrf.mxu0  ;;  %v1791_v63 = vpop.f32.mrf.mxu1 }
 0x1e3   : > { %v1956_v15 = vadd.f32 %v4098_v40, %v1790_v18  ;;  %v2910_v5 = vpack.c.bf16 %v1790_v18, %v1787_v47 }
 0x1e4   : > { %v1505_v49 = vpop.f32.mrf.mxu0  ;;  %v1794_v33 = vpop.f32.mrf.mxu1 }
 0x1e5   : > { %2966 = vst [vmem:[%s3840_s30 + $0xc8] sm:$0xff] %v2910_v5   ;;  %v1795_v1 = vadd.f32 %v1794_v33, %v1505_v49  ;;  %2020 = vst [vmem:[%s3820_s14 + $0x198] sm:$0xff] %v1956_v15  ;;  %v4107_v33 = vld [vmem:[#allocation17_spill] sm:$0xff] }
 0x1e6   : > { %v1507_v27 = vpop.f32.mrf.mxu0  ;;  %v1796_v22 = vpop.f32.mrf.mxu1 }
 0x1e7   : > { %v1957_v50 = vadd.f32 %v4099_v41, %v1795_v1 }
 0x1e8   : > { %v1508_v0 = vpop.f32.mrf.mxu0  ;;  %v1797_v58 = vpop.f32.mrf.mxu1 }
 0x1e9   : > { %v1798_v34 = vadd.f32 %v1797_v58, %v1508_v0  ;;  %2021 = vst [vmem:[%s3820_s14 + $0x1a0] sm:$0xff] %v1957_v50  ;;  %v4108_v58 = vld [vmem:[#allocation18_spill] sm:$0xff] }
 0x1ea   : > { %v1510_v7 = vpop.f32.mrf.mxu0  ;;  %v1799_v16 = vpop.f32.mrf.mxu1 }
 0x1eb   : > { %v1958_v51 = vadd.f32 %v4100_v42, %v1798_v34  ;;  %v2915_v28 = vpack.c.bf16 %v1798_v34, %v1795_v1 }
 0x1ec   : > { %v1513_v13 = vpop.f32.mrf.mxu0  ;;  %v1802_v19 = vpop.f32.mrf.mxu1 }
 0x1ed   : > { %2967 = vst [vmem:[%s3840_s30 + $0xd0] sm:$0xff] %v2915_v28   ;;  %v1803_v4 = vadd.f32 %v1802_v19, %v1513_v13  ;;  %2022 = vst [vmem:[%s3820_s14 + $0x1a8] sm:$0xff] %v1958_v51  ;;  %v4109_v19 = vld [vmem:[#allocation19_spill] sm:$0xff] }
 0x1ee   : > { %v1515_v35 = vpop.f32.mrf.mxu0  ;;  %v1804_v52 = vpop.f32.mrf.mxu1 }
 0x1ef   : > { %v1959_v43 = vadd.f32 %v4101_v23, %v1803_v4 }
 0x1f0   : > { %v1516_v59 = vpop.f32.mrf.mxu0  ;;  %v1805_v9 = vpop.f32.mrf.mxu1 }
 0x1f1   : > { %v1806_v29 = vadd.f32 %v1805_v9, %v1516_v59  ;;  %2023 = vst [vmem:[%s3820_s14 + $0x1b0] sm:$0xff] %v1959_v43  ;;  %v4110_v9 = vld [vmem:[#allocation20_spill] sm:$0xff] }
 0x1f2   : > { %v1518_v11 = vpop.f32.mrf.mxu0  ;;  %v1807_v53 = vpop.f32.mrf.mxu1 }
 0x1f3   : > { %v1960_v44 = vadd.f32 %v4102_v36, %v1806_v29  ;;  %v2920_v8 = vpack.c.bf16 %v1806_v29, %v1803_v4 }
 0x1f4   : > { %v1521_v14 = vpop.f32.mrf.mxu0  ;;  %v1810_v24 = vpop.f32.mrf.mxu1 }
 0x1f5   : > { %2968 = vst [vmem:[%s3840_s30 + $0xd8] sm:$0xff] %v2920_v8   ;;  %v1811_v54 = vadd.f32 %v1810_v24, %v1521_v14  ;;  %2024 = vst [vmem:[%s3820_s14 + $0x1b8] sm:$0xff] %v1960_v44 }
 0x1f6   : > { %v1523_v20 = vpop.f32.mrf.mxu0  ;;  %v1812_v30 = vpop.f32.mrf.mxu1 }
 0x1f7   : > { %v1961_v45 = vadd.f32 %v4103_v6, %v1811_v54 }
 0x1f8   : > { %v1524_v37 = vpop.f32.mrf.mxu0  ;;  %v1813_v62 = vpop.f32.mrf.mxu1 }
 0x1f9   : > { %v1814_v55 = vadd.f32 %v1813_v62, %v1524_v37  ;;  %2025 = vst [vmem:[%s3820_s14 + $0x1c0] sm:$0xff] %v1961_v45 }
 0x1fa   : > { %v1526_v57 = vpop.f32.mrf.mxu0  ;;  %v1815_v17 = vpop.f32.mrf.mxu1 }
 0x1fb   : > { %v1962_v46 = vadd.f32 %v4104_v10, %v1814_v55  ;;  %v2925_v25 = vpack.c.bf16 %v1814_v55, %v1811_v54 }
 0x1fc   : > { %v1529_v38 = vpop.f32.mrf.mxu0  ;;  %v1818_v56 = vpop.f32.mrf.mxu1 }
 0x1fd   : > { %2969 = vst [vmem:[%s3840_s30 + $0xe0] sm:$0xff] %v2925_v25   ;;  %v1819_v31 = vadd.f32 %v1818_v56, %v1529_v38  ;;  %2026 = vst [vmem:[%s3820_s14 + $0x1c8] sm:$0xff] %v1962_v46 }
 0x1fe   : > { %v1531_v12 = vpop.f32.mrf.mxu0  ;;  %v1820_v60 = vpop.f32.mrf.mxu1 }
 0x1ff   : > { %v1963_v47 = vadd.f32 %v4105_v61, %v1819_v31 }
 0x200   : > { %v1532_v21 = vpop.f32.mrf.mxu0  ;;  %v1821_v2 = vpop.f32.mrf.mxu1 }
 0x201   : > { %v1822_v39 = vadd.f32 %v1821_v2, %v1532_v21  ;;  %2027 = vst [vmem:[%s3820_s14 + $0x1d0] sm:$0xff] %v1963_v47 }
 0x202   : > { %v1534_v32 = vpop.f32.mrf.mxu0  ;;  %v1823_v26 = vpop.f32.mrf.mxu1 }
 0x203   : > { %v1964_v18 = vadd.f32 %v4106_v48, %v1822_v39  ;;  %v2930_v3 = vpack.c.bf16 %v1822_v39, %v1819_v31 }
 0x204   : > { %v1537_v63 = vpop.f32.mrf.mxu0  ;;  %v1826_v40 = vpop.f32.mrf.mxu1 }
 0x205   : > { %2970 = vst [vmem:[%s3840_s30 + $0xe8] sm:$0xff] %v2930_v3   ;;  %v1827_v15 = vadd.f32 %v1826_v40, %v1537_v63  ;;  %2028 = vst [vmem:[%s3820_s14 + $0x1d8] sm:$0xff] %v1964_v18 }
 0x206   : > { %v1539_v5 = vpop.f32.mrf.mxu0  ;;  %v1828_v49 = vpop.f32.mrf.mxu1 }
 0x207   : > { %v1965_v1 = vadd.f32 %v4107_v33, %v1827_v15 }
 0x208   : > { %v1540_v27 = vpop.f32.mrf.mxu0  ;;  %v1829_v22 = vpop.f32.mrf.mxu1 }
 0x209   : > { %v1830_v41 = vadd.f32 %v1829_v22, %v1540_v27  ;;  %2029 = vst [vmem:[%s3820_s14 + $0x1e0] sm:$0xff] %v1965_v1 }
 0x20a   : > { %v1542_v50 = vpop.f32.mrf.mxu0  ;;  %v1831_v0 = vpop.f32.mrf.mxu1 }
 0x20b   : > { %v1966_v34 = vadd.f32 %v4108_v58, %v1830_v41  ;;  %v2935_v7 = vpack.c.bf16 %v1830_v41, %v1827_v15 }
 0x20c   : > { %v1545_v16 = vpop.f32.mrf.mxu0  ;;  %v1834_v42 = vpop.f32.mrf.mxu1 }
 0x20d   : > { %2971 = vst [vmem:[%s3840_s30 + $0xf0] sm:$0xff] %v2935_v7   ;;  %v1835_v51 = vadd.f32 %v1834_v42, %v1545_v16  ;;  %2030 = vst [vmem:[%s3820_s14 + $0x1e8] sm:$0xff] %v1966_v34 }
 0x20e   : > { %v1547_v28 = vpop.f32.mrf.mxu0  ;;  %v1836_v13 = vpop.f32.mrf.mxu1 }
 0x20f   : > { %v1967_v4 = vadd.f32 %v4109_v19, %v1835_v51 }
 0x210   : > { %v1548_v35 = vpop.f32.mrf.mxu0  ;;  %v1837_v52 = vpop.f32.mrf.mxu1 }
 0x211   : > { %v1838_v23 = vadd.f32 %v1837_v52, %v1548_v35  ;;  %2031 = vst [vmem:[%s3820_s14 + $0x1f0] sm:$0xff] %v1967_v4 }
 0x212   : > { %v1550_v43 = vpop.f32.mrf.mxu0  ;;  %v1839_v59 = vpop.f32.mrf.mxu1 }
 0x213   : > { %v1968_v29 = vadd.f32 %v4110_v9, %v1838_v23  ;;  %v2940_v11 = vpack.c.bf16 %v1838_v23, %v1835_v51 }
 0x215   : > { %2032 = vst [vmem:[%s3820_s14 + $0x1f8] sm:$0xff] %v1968_v29  ;;  %2972 = vst [vmem:[%s3840_s30 + $0xf8] sm:$0xff] %v2940_v11  }
 0x216   : > { %3252 = shalt.err (!%p3249_p3)
}
 0x217   : > { %s3253_s9 = scalar_lea.hbm %s4023_s28, 4096  ;;  %s3257_s12 = scalar_lea.hbm %s4076_s4, 8192 }
 0x218   : > { %p3254_p4 = scmp.ne.s32.totalorder %s4023_s28, %s3253_s9  ;;  %p3258_p9 = scmp.lt.s32.totalorder %s4023_s28, %s4076_s4 }
 0x219   : > { %p3259_p10 = scmp.lt.s32.totalorder %s3257_s12, %s3253_s9 }
 0x21a   : > { %p3255_p7 = pnand %p3254_p4, %p3368_p5 }
 0x21b   : > { %p3260_p11 = por %p3259_p10, %p3258_p9 }
 0x21c   : > { %p3256_p8 = pneg %p3255_p7 }
 0x21e   : > { %p3261_p12 = pnand %p3260_p11, %p3256_p8 }
 0x220   : > { %3264 = shalt.err (!%p3261_p12)
}
 0x221   : > { %s3303_s20 = smov 64   ;;  %s3304_s30 = smov 4  }
 0x222   : > { %2973 = dma.vmem_to_hbm [thread:$0]  (%p3368_p5), %s4025_s22, 4096, %s4023_s28, %s4032_s19, %s3303_s20, %s3303_s20, %s3304_s30  }
 0x223 PF: > { %p2979_p13 = scmp.ge.s32.totalorder %s3299_s18, 2  ;;  %s2399_s6 = sand.u32 1, %s3287_s15  }
 0x224   : > { %s2400_s23 = scalar_lea.sflag [#allocation3], %s2399_s6 }
 0x225   : > { %p2976_p0 = pnand %p2979_p13, %p3372_p6 }
 0x227   : > { %p2977_p1 = pneg %p2976_p0 }
 0x229   : > { %3282 = dma.done.wait (%p2977_p1), %s2400_s23, 4096  }
 0x22a   : > { %3284 = vsyncadd (%p2977_p1), %s2400_s23, 4294963200  ;;  %p15_p2 = scmp.ge.s32.totalorder %s3355_s21, 4   ;;  %s4111_s15 = smov %s3291_s16 }
 0x22b   : > { %s4112_s16 = smov %s3295_s17  ;;  %s4113_s17 = smov %s3366_s24 }
 0x22c   : > { %s4114_s18 = smov %s3355_s21  ;;  %17 = sbr.rel (!%p15_p2) target bundleno = 3 (0x3), region = 82 }
 0x231   :  { %2405 = vsyncpa [#allocation3], 1 }
 0x232   :  { %2407 = vsyncpa [#allocation3 + $0x1], 1 }

</bundles_post_ra>
